<compile_context>
chip_gen: v5e
topology: v5e:2x2
jax: 0.10.0
libtpu: 0.0.40
codegen_flags: <defaults>
</compile_context>

<pallas_src>
import functools

import jax
import jax.numpy as jnp
from jax import lax
from jax.experimental import pallas as pl
from jax.experimental.pallas import tpu as pltpu

# ---- model constants (match the PyTorch module) ----
N_EMBD = 192
N_HEAD = 6
HEAD_SIZE = N_EMBD // N_HEAD           # 32
N_LAYER = 2
BLOCK_SIZE = 256
FF = 4 * N_EMBD                        # 768
VOCAB_SIZE = 65                        # input.txt not read; deterministic synthetic vocab
VOCAB_PAD = 128                        # lane-dense padded logits width (sliced back to 65)
LN_EPS = 1e-5
# Reference Head scales by C**-0.5 where (B, T, C) = x.shape, i.e. C = n_embd (not head_size).
ATTN_SCALE = float(N_EMBD) ** -0.5

VEC_ROWS_PER_BLOCK = 7                 # ln1_g, ln1_b, proj_b, ln2_g, ln2_b, b1, b2
VEC_ROWS_TOTAL = N_LAYER * VEC_ROWS_PER_BLOCK + 3   # + final ln_g, ln_b, b_lm


def _layernorm(x, gamma, beta):
    mu = jnp.mean(x, axis=-1, keepdims=True)
    xc = x - mu
    var = jnp.mean(xc * xc, axis=-1, keepdims=True)
    return xc * lax.rsqrt(var + LN_EPS) * gamma + beta


def model_kernel(x_ref, mask_ref, wqkv_ref, wproj_ref, w1_ref, w2_ref, wlm_ref,
                 vec_ref, o_ref, *, softmax_dtype):
    """Fused forward: N_LAYER transformer blocks + final LayerNorm + lm_head."""
    x = x_ref[...]                      # (Bblk, T, C) f32
    Bb, T, C = x.shape
    mask_add = mask_ref[...]            # (T, T) additive causal mask (0 / -inf), built once
    vecs = vec_ref[...]                 # (VEC_ROWS_TOTAL, FF) f32 packed vector params

    for l in range(N_LAYER):            # static unrolled loop over layers
        base = l * VEC_ROWS_PER_BLOCK
        ln1_g = vecs[base + 0, :C]
        ln1_b = vecs[base + 1, :C]
        proj_b = vecs[base + 2, :C]
        ln2_g = vecs[base + 3, :C]
        ln2_b = vecs[base + 4, :C]
        b1 = vecs[base + 5, :FF]
        b2 = vecs[base + 6, :C]

        # ---- multi-head causal self-attention on ln1(x) ----
        xln = _layernorm(x, ln1_g, ln1_b)
        xf = xln.reshape(Bb * T, C).astype(jnp.bfloat16)
        # Single fused QKV projection (K = 192, N = 576): LHS streams through MXU once.
        qkv = jnp.dot(xf, wqkv_ref[l],
                      preferred_element_type=jnp.float32).reshape(Bb, T, 3 * C)

        head_outs = []
        for h in range(N_HEAD):          # static unrolled loop over heads
            q_off = h * HEAD_SIZE
            qh = qkv[:, :, q_off:q_off + HEAD_SIZE].astype(jnp.bfloat16)
            kh = qkv[:, :, C + q_off:C + q_off + HEAD_SIZE].astype(jnp.bfloat16)
            vh = qkv[:, :, 2 * C + q_off:2 * C + q_off + HEAD_SIZE].astype(jnp.bfloat16)

            s = jnp.einsum('bqd,bkd->bqk', qh, kh,
                           preferred_element_type=jnp.float32) * ATTN_SCALE
            s = s + mask_add                             # additive causal mask
            s = s - jnp.max(s, axis=-1, keepdims=True)
            p = jnp.exp(s.astype(softmax_dtype))         # bf16 EUP on v6e/v7x, f32 on v5e
            denom = jnp.sum(p.astype(jnp.float32), axis=-1, keepdims=True)
            oh = jnp.einsum('bqk,bkd->bqd', p.astype(jnp.bfloat16), vh,
                            preferred_element_type=jnp.float32)
            # Post-AV normalization: scale the (T, 32) head output, not the (T, T) probs.
            head_outs.append(oh * pl.reciprocal(denom, approx=True))

        att = jnp.concatenate(head_outs, axis=-1)        # (Bb, T, C)
        sa = jnp.dot(att.reshape(Bb * T, C).astype(jnp.bfloat16), wproj_ref[l],
                     preferred_element_type=jnp.float32) + proj_b
        x = x + sa.reshape(Bb, T, C)                     # residual (dropout == identity)

        # ---- feed-forward on ln2(x) ----
        xln2 = _layernorm(x, ln2_g, ln2_b)
        h1 = jnp.dot(xln2.reshape(Bb * T, C).astype(jnp.bfloat16), w1_ref[l],
                     preferred_element_type=jnp.float32) + b1
        h1 = jnp.maximum(h1, 0.0)                        # ReLU
        ff = jnp.dot(h1.astype(jnp.bfloat16), w2_ref[l],
                     preferred_element_type=jnp.float32) + b2
        x = x + ff.reshape(Bb, T, C)

    fbase = N_LAYER * VEC_ROWS_PER_BLOCK
    ln_g = vecs[fbase + 0, :C]
    ln_b = vecs[fbase + 1, :C]
    b_lm = vecs[fbase + 2, :VOCAB_PAD]
    xln = _layernorm(x, ln_g, ln_b)
    logits = jnp.dot(xln.reshape(Bb * T, C).astype(jnp.bfloat16), wlm_ref[...],
                     preferred_element_type=jnp.float32) + b_lm
    # Lane-dense 128-wide bf16 store (halves writeback bytes; upcast + slice outside).
    o_ref[...] = logits.reshape(Bb, T, VOCAB_PAD).astype(o_ref.dtype)


def _softmax_dtype():
    """bf16 softmax where the EUP supports bf16 (v6e/v7x); f32 elsewhere (v5e/unknown)."""
    try:
        kind = jax.devices()[0].device_kind.lower()
    except Exception:
        return jnp.float32
    if ("v6" in kind) or ("v7" in kind) or ("7x" in kind):
        return jnp.bfloat16
    return jnp.float32


def _pick_batch_tile(B, T):
    """Largest divisor of B giving ~2048 rows (Bblk*T) per step, but grid >= 2 when B >= 2
    so v7x megacore has work for both TensorCores."""
    target_b = max(1, 2048 // max(T, 1))
    limit = min(target_b, max(1, B // 2)) if B >= 2 else target_b
    best = 1
    for d in range(1, B + 1):
        if B % d == 0 and d <= limit:
            best = d
    return best


def bigram_forward(idx, params):
    """Equivalent of BigramLanguageModel.forward(idx, targets=None) -> logits."""
    B, T = idx.shape
    tok_emb = params["tok_table"][idx]              # (B, T, C) gather glue in plain JAX
    pos_emb = params["pos_table"][:T]               # (T, C)
    x = (tok_emb + pos_emb[None]).astype(jnp.float32)

    # Additive causal mask built once (shared by all heads / layers / grid steps).
    row = jnp.arange(T, dtype=jnp.int32)[:, None]
    col = jnp.arange(T, dtype=jnp.int32)[None, :]
    mask_add = jnp.where(col <= row, 0.0, -jnp.inf).astype(jnp.float32)

    bblk = _pick_batch_tile(B, T)
    grid = (B // bblk,)

    def full_spec(shape):
        return pl.BlockSpec(shape, lambda b, _n=len(shape): (0,) * _n)

    in_specs = [
        pl.BlockSpec((bblk, T, N_EMBD), lambda b: (b, 0, 0)),   # activations
        full_spec(mask_add.shape),                              # causal mask
        full_spec(params["wqkv"].shape),
        full_spec(params["wproj"].shape),
        full_spec(params["w1"].shape),
        full_spec(params["w2"].shape),
        full_spec(params["w_lm"].shape),
        full_spec(params["vec"].shape),
    ]

    kernel = functools.partial(model_kernel, softmax_dtype=_softmax_dtype())

    padded = pl.pallas_call(
        kernel,
        out_shape=jax.ShapeDtypeStruct((B, T, VOCAB_PAD), jnp.bfloat16),
        grid=grid,
        in_specs=in_specs,
        out_specs=pl.BlockSpec((bblk, T, VOCAB_PAD), lambda b: (b, 0, 0)),
        compiler_params=pltpu.CompilerParams(
            dimension_semantics=("parallel",),      # batch tiles shard across TCs (v7x)
            vmem_limit_bytes=48 * 1024 * 1024),     # room for the larger batch tile
    )(x, mask_add, params["wqkv"], params["wproj"], params["w1"],
      params["w2"], params["w_lm"], params["vec"])

    # loss is None when targets is None; only the logits are returned here.
    return padded[..., :VOCAB_SIZE].astype(jnp.float32)


def init_params(key):
    keys = iter(jax.random.split(key, 64))

    def w(shape):
        return jax.random.normal(next(keys), shape, jnp.float32) * 0.02

    tok_table = w((VOCAB_SIZE, N_EMBD))
    pos_table = w((BLOCK_SIZE, N_EMBD))

    # Per-matrix-type bf16 stacks with a leading layer axis (few, large DMA slabs).
    wqkv = jnp.stack([jnp.concatenate(
        [w((N_EMBD, N_EMBD)), w((N_EMBD, N_EMBD)), w((N_EMBD, N_EMBD))], axis=-1)
        for _ in range(N_LAYER)]).astype(jnp.bfloat16)              # (L, 192, 576)
    wproj = jnp.stack([w((N_EMBD, N_EMBD))
                       for _ in range(N_LAYER)]).astype(jnp.bfloat16)   # (L, 192, 192)
    w1 = jnp.stack([w((N_EMBD, FF))
                    for _ in range(N_LAYER)]).astype(jnp.bfloat16)      # (L, 192, 768)
    w2 = jnp.stack([w((FF, N_EMBD))
                    for _ in range(N_LAYER)]).astype(jnp.bfloat16)      # (L, 768, 192)
    w_lm = (jnp.zeros((N_EMBD, VOCAB_PAD), jnp.float32)
            .at[:, :VOCAB_SIZE].set(w((N_EMBD, VOCAB_SIZE)))
            .astype(jnp.bfloat16))                                      # zero-padded vocab cols

    # Packed f32 vector slab: one (padded) row per gamma/beta/bias.
    vec = jnp.zeros((VEC_ROWS_TOTAL, FF), jnp.float32)
    for l in range(N_LAYER):
        base = l * VEC_ROWS_PER_BLOCK
        vec = vec.at[base + 0, :N_EMBD].set(1.0)    # ln1 gamma
        vec = vec.at[base + 3, :N_EMBD].set(1.0)    # ln2 gamma
        # ln1/ln2 beta, proj bias, ffwd b1/b2 stay zero
    fbase = N_LAYER * VEC_ROWS_PER_BLOCK
    vec = vec.at[fbase + 0, :N_EMBD].set(1.0)       # final ln gamma
    # final ln beta and lm_head bias stay zero (padded vocab columns must be zero)

    return {
        "tok_table": tok_table,
        "pos_table": pos_table,
        "wqkv": wqkv,
        "wproj": wproj,
        "w1": w1,
        "w2": w2,
        "w_lm": w_lm,
        "vec": vec,
    }


if __name__ == "__main__":
    key = jax.random.PRNGKey(0)
    pkey, ikey = jax.random.split(key)
    params = init_params(pkey)

    B, T = 2, 8                                     # small sequence (T <= blockSize)
    idx = jax.random.randint(ikey, (B, T), 0, VOCAB_SIZE, dtype=jnp.int32)

    logits = bigram_forward(idx, params)
    logits = jax.block_until_ready(logits)
    assert logits.shape == (B, T, VOCAB_SIZE)
    assert bool(jnp.all(jnp.isfinite(logits)))
    print("KERNEL_OK")
</pallas_src>

<mosaic_0001>
module attributes {stable_mosaic.version = 11 : i64} {
  func.func @model_kernel(%arg0: i32, %arg1: memref<1x8x192xf32, #tpu.memory_space<vmem>>, %arg2: memref<8x8xf32, #tpu.memory_space<vmem>>, %arg3: memref<2x192x576xbf16, #tpu.memory_space<vmem>>, %arg4: memref<2x192x192xbf16, #tpu.memory_space<vmem>>, %arg5: memref<2x192x768xbf16, #tpu.memory_space<vmem>>, %arg6: memref<2x768x192xbf16, #tpu.memory_space<vmem>>, %arg7: memref<192x128xbf16, #tpu.memory_space<vmem>>, %arg8: memref<17x768xf32, #tpu.memory_space<vmem>>, %arg9: memref<1x8x128xbf16, #tpu.memory_space<vmem>>) attributes {dimension_semantics = [#tpu.dimension_semantics<parallel>], iteration_bounds = array<i64: 2>, scalar_prefetch = 0 : i64, scratch_operands = 0 : i64, tpu.core_type = #tpu.core_type<tc>, window_params = [{transform_indices = @transform_0, window_bounds = array<i64: 1, 8, 192>}, {pipeline_mode = #tpu.pipeline_mode<synchronous>, transform_indices = @transform_1, window_bounds = array<i64: 8, 8>}, {pipeline_mode = #tpu.pipeline_mode<synchronous>, transform_indices = @transform_2, window_bounds = array<i64: 2, 192, 576>}, {pipeline_mode = #tpu.pipeline_mode<synchronous>, transform_indices = @transform_3, window_bounds = array<i64: 2, 192, 192>}, {pipeline_mode = #tpu.pipeline_mode<synchronous>, transform_indices = @transform_4, window_bounds = array<i64: 2, 192, 768>}, {pipeline_mode = #tpu.pipeline_mode<synchronous>, transform_indices = @transform_5, window_bounds = array<i64: 2, 768, 192>}, {pipeline_mode = #tpu.pipeline_mode<synchronous>, transform_indices = @transform_6, window_bounds = array<i64: 192, 128>}, {pipeline_mode = #tpu.pipeline_mode<synchronous>, transform_indices = @transform_7, window_bounds = array<i64: 17, 768>}, {transform_indices = @transform_8, window_bounds = array<i64: 1, 8, 128>}]} {
    %c0 = arith.constant 0 : index
    %c0_0 = arith.constant 0 : index
    %c0_1 = arith.constant 0 : index
    %0 = vector.load %arg1[%c0, %c0_0, %c0_1] : memref<1x8x192xf32, #tpu.memory_space<vmem>>, vector<1x8x192xf32>
    %c0_2 = arith.constant 0 : index
    %c0_3 = arith.constant 0 : index
    %1 = vector.load %arg2[%c0_2, %c0_3] : memref<8x8xf32, #tpu.memory_space<vmem>>, vector<8x8xf32>
    %c0_4 = arith.constant 0 : index
    %c0_5 = arith.constant 0 : index
    %2 = vector.load %arg8[%c0_4, %c0_5] : memref<17x768xf32, #tpu.memory_space<vmem>>, vector<17x768xf32>
    %3 = vector.extract_strided_slice %2 {offsets = [0, 0], sizes = [1, 192], strides = [1, 1]} : vector<17x768xf32> to vector<1x192xf32>
    %4 = vector.shape_cast %3 : vector<1x192xf32> to vector<192xf32>
    %5 = vector.extract_strided_slice %2 {offsets = [1, 0], sizes = [1, 192], strides = [1, 1]} : vector<17x768xf32> to vector<1x192xf32>
    %6 = vector.shape_cast %5 : vector<1x192xf32> to vector<192xf32>
    %7 = vector.extract_strided_slice %2 {offsets = [2, 0], sizes = [1, 192], strides = [1, 1]} : vector<17x768xf32> to vector<1x192xf32>
    %8 = vector.shape_cast %7 : vector<1x192xf32> to vector<192xf32>
    %9 = vector.extract_strided_slice %2 {offsets = [3, 0], sizes = [1, 192], strides = [1, 1]} : vector<17x768xf32> to vector<1x192xf32>
    %10 = vector.shape_cast %9 : vector<1x192xf32> to vector<192xf32>
    %11 = vector.extract_strided_slice %2 {offsets = [4, 0], sizes = [1, 192], strides = [1, 1]} : vector<17x768xf32> to vector<1x192xf32>
    %12 = vector.shape_cast %11 : vector<1x192xf32> to vector<192xf32>
    %13 = vector.extract_strided_slice %2 {offsets = [5, 0], sizes = [1, 768], strides = [1, 1]} : vector<17x768xf32> to vector<1x768xf32>
    %14 = vector.shape_cast %13 : vector<1x768xf32> to vector<768xf32>
    %15 = vector.extract_strided_slice %2 {offsets = [6, 0], sizes = [1, 192], strides = [1, 1]} : vector<17x768xf32> to vector<1x192xf32>
    %16 = vector.shape_cast %15 : vector<1x192xf32> to vector<192xf32>
    %cst = arith.constant dense<0.000000e+00> : vector<1x8xf32>
    %17 = vector.multi_reduction <add>, %0, %cst [2] : vector<1x8x192xf32> to vector<1x8xf32>
    %18 = vector.shape_cast %17 : vector<1x8xf32> to vector<1x8x1xf32>
    %cst_6 = arith.constant 1.920000e+02 : f32
    %19 = vector.broadcast %cst_6 : f32 to vector<1x8x1xf32>
    %20 = arith.divf %18, %19 : vector<1x8x1xf32>
    %21 = vector.broadcast %20 : vector<1x8x1xf32> to vector<1x8x192xf32>
    %22 = arith.subf %0, %21 : vector<1x8x192xf32>
    %23 = arith.mulf %22, %22 : vector<1x8x192xf32>
    %cst_7 = arith.constant dense<0.000000e+00> : vector<1x8xf32>
    %24 = vector.multi_reduction <add>, %23, %cst_7 [2] : vector<1x8x192xf32> to vector<1x8xf32>
    %25 = vector.shape_cast %24 : vector<1x8xf32> to vector<1x8x1xf32>
    %cst_8 = arith.constant 1.920000e+02 : f32
    %26 = vector.broadcast %cst_8 : f32 to vector<1x8x1xf32>
    %27 = arith.divf %25, %26 : vector<1x8x1xf32>
    %cst_9 = arith.constant 9.99999974E-6 : f32
    %28 = vector.broadcast %cst_9 : f32 to vector<1x8x1xf32>
    %29 = arith.addf %27, %28 : vector<1x8x1xf32>
    %30 = math.rsqrt %29 : vector<1x8x1xf32>
    %31 = vector.broadcast %30 : vector<1x8x1xf32> to vector<1x8x192xf32>
    %32 = arith.mulf %22, %31 : vector<1x8x192xf32>
    %33 = vector.shape_cast %4 : vector<192xf32> to vector<1x1x192xf32>
    %34 = vector.broadcast %33 : vector<1x1x192xf32> to vector<1x8x192xf32>
    %35 = arith.mulf %32, %34 : vector<1x8x192xf32>
    %36 = vector.shape_cast %6 : vector<192xf32> to vector<1x1x192xf32>
    %37 = vector.broadcast %36 : vector<1x1x192xf32> to vector<1x8x192xf32>
    %38 = arith.addf %35, %37 : vector<1x8x192xf32>
    %39 = vector.shape_cast %38 : vector<1x8x192xf32> to vector<8x192xf32>
    %40 = arith.truncf %39 : vector<8x192xf32> to vector<8x192xbf16>
    %c0_10 = arith.constant 0 : index
    %c0_11 = arith.constant 0 : index
    %c0_12 = arith.constant 0 : index
    %41 = vector.load %arg3[%c0_10, %c0_11, %c0_12] : memref<2x192x576xbf16, #tpu.memory_space<vmem>>, vector<1x192x576xbf16>
    %42 = vector.shape_cast %41 : vector<1x192x576xbf16> to vector<192x576xbf16>
    %cst_13 = arith.constant dense<0.000000e+00> : vector<8x576xf32>
    %43 = tpu.matmul %40, %42, %cst_13 {dimension_numbers = #tpu.dot_dimension_numbers<[1], [0], [0], [1], [0, 0, 1, 1], [], []>} : vector<8x192xbf16>, vector<192x576xbf16>, vector<8x576xf32> -> vector<8x576xf32>
    %44 = vector.shape_cast %43 : vector<8x576xf32> to vector<1x8x576xf32>
    %45 = vector.extract_strided_slice %44 {offsets = [0, 0, 0], sizes = [1, 8, 32], strides = [1, 1, 1]} : vector<1x8x576xf32> to vector<1x8x32xf32>
    %46 = arith.truncf %45 : vector<1x8x32xf32> to vector<1x8x32xbf16>
    %47 = vector.extract_strided_slice %44 {offsets = [0, 0, 192], sizes = [1, 8, 32], strides = [1, 1, 1]} : vector<1x8x576xf32> to vector<1x8x32xf32>
    %48 = arith.truncf %47 : vector<1x8x32xf32> to vector<1x8x32xbf16>
    %49 = vector.extract_strided_slice %44 {offsets = [0, 0, 384], sizes = [1, 8, 32], strides = [1, 1, 1]} : vector<1x8x576xf32> to vector<1x8x32xf32>
    %50 = arith.truncf %49 : vector<1x8x32xf32> to vector<1x8x32xbf16>
    "tpu.trace_start"() <{level = 10 : i32, message = "bqd,bkd->bqk"}> : () -> ()
    %cst_14 = arith.constant dense<0.000000e+00> : vector<1x8x8xf32>
    %51 = tpu.matmul %46, %48, %cst_14 {dimension_numbers = #tpu.dot_dimension_numbers<[2], [2], [1], [1], [0, 0, 0, 1, 1, 1], [0], [0]>} : vector<1x8x32xbf16>, vector<1x8x32xbf16>, vector<1x8x8xf32> -> vector<1x8x8xf32>
    "tpu.trace_stop"() : () -> ()
    %cst_15 = arith.constant 0.0721687824 : f32
    %52 = vector.broadcast %cst_15 : f32 to vector<1x8x8xf32>
    %53 = arith.mulf %51, %52 : vector<1x8x8xf32>
    %54 = vector.shape_cast %1 : vector<8x8xf32> to vector<1x8x8xf32>
    %55 = arith.addf %53, %54 : vector<1x8x8xf32>
    %cst_16 = arith.constant dense<0xFF800000> : vector<1x8xf32>
    %56 = vector.multi_reduction <maximumf>, %55, %cst_16 [2] : vector<1x8x8xf32> to vector<1x8xf32>
    %57 = vector.shape_cast %56 : vector<1x8xf32> to vector<1x8x1xf32>
    %58 = vector.broadcast %57 : vector<1x8x1xf32> to vector<1x8x8xf32>
    %59 = arith.subf %55, %58 : vector<1x8x8xf32>
    %60 = math.exp %59 : vector<1x8x8xf32>
    %cst_17 = arith.constant dense<0.000000e+00> : vector<1x8xf32>
    %61 = vector.multi_reduction <add>, %60, %cst_17 [2] : vector<1x8x8xf32> to vector<1x8xf32>
    %62 = vector.shape_cast %61 : vector<1x8xf32> to vector<1x8x1xf32>
    %63 = arith.truncf %60 : vector<1x8x8xf32> to vector<1x8x8xbf16>
    "tpu.trace_start"() <{level = 10 : i32, message = "bqk,bkd->bqd"}> : () -> ()
    %cst_18 = arith.constant dense<0.000000e+00> : vector<1x8x32xf32>
    %64 = tpu.matmul %63, %50, %cst_18 {dimension_numbers = #tpu.dot_dimension_numbers<[2], [1], [1], [2], [0, 0, 0, 1, 1, 2], [0], [0]>} : vector<1x8x8xbf16>, vector<1x8x32xbf16>, vector<1x8x32xf32> -> vector<1x8x32xf32>
    "tpu.trace_stop"() : () -> ()
    %65 = tpu.reciprocal %62 {approx = true} : vector<1x8x1xf32> -> vector<1x8x1xf32>
    %66 = vector.broadcast %65 : vector<1x8x1xf32> to vector<1x8x32xf32>
    %67 = arith.mulf %64, %66 : vector<1x8x32xf32>
    %68 = vector.extract_strided_slice %44 {offsets = [0, 0, 32], sizes = [1, 8, 32], strides = [1, 1, 1]} : vector<1x8x576xf32> to vector<1x8x32xf32>
    %69 = arith.truncf %68 : vector<1x8x32xf32> to vector<1x8x32xbf16>
    %70 = vector.extract_strided_slice %44 {offsets = [0, 0, 224], sizes = [1, 8, 32], strides = [1, 1, 1]} : vector<1x8x576xf32> to vector<1x8x32xf32>
    %71 = arith.truncf %70 : vector<1x8x32xf32> to vector<1x8x32xbf16>
    %72 = vector.extract_strided_slice %44 {offsets = [0, 0, 416], sizes = [1, 8, 32], strides = [1, 1, 1]} : vector<1x8x576xf32> to vector<1x8x32xf32>
    %73 = arith.truncf %72 : vector<1x8x32xf32> to vector<1x8x32xbf16>
    "tpu.trace_start"() <{level = 10 : i32, message = "bqd,bkd->bqk"}> : () -> ()
    %cst_19 = arith.constant dense<0.000000e+00> : vector<1x8x8xf32>
    %74 = tpu.matmul %69, %71, %cst_19 {dimension_numbers = #tpu.dot_dimension_numbers<[2], [2], [1], [1], [0, 0, 0, 1, 1, 1], [0], [0]>} : vector<1x8x32xbf16>, vector<1x8x32xbf16>, vector<1x8x8xf32> -> vector<1x8x8xf32>
    "tpu.trace_stop"() : () -> ()
    %cst_20 = arith.constant 0.0721687824 : f32
    %75 = vector.broadcast %cst_20 : f32 to vector<1x8x8xf32>
    %76 = arith.mulf %74, %75 : vector<1x8x8xf32>
    %77 = vector.shape_cast %1 : vector<8x8xf32> to vector<1x8x8xf32>
    %78 = arith.addf %76, %77 : vector<1x8x8xf32>
    %cst_21 = arith.constant dense<0xFF800000> : vector<1x8xf32>
    %79 = vector.multi_reduction <maximumf>, %78, %cst_21 [2] : vector<1x8x8xf32> to vector<1x8xf32>
    %80 = vector.shape_cast %79 : vector<1x8xf32> to vector<1x8x1xf32>
    %81 = vector.broadcast %80 : vector<1x8x1xf32> to vector<1x8x8xf32>
    %82 = arith.subf %78, %81 : vector<1x8x8xf32>
    %83 = math.exp %82 : vector<1x8x8xf32>
    %cst_22 = arith.constant dense<0.000000e+00> : vector<1x8xf32>
    %84 = vector.multi_reduction <add>, %83, %cst_22 [2] : vector<1x8x8xf32> to vector<1x8xf32>
    %85 = vector.shape_cast %84 : vector<1x8xf32> to vector<1x8x1xf32>
    %86 = arith.truncf %83 : vector<1x8x8xf32> to vector<1x8x8xbf16>
    "tpu.trace_start"() <{level = 10 : i32, message = "bqk,bkd->bqd"}> : () -> ()
    %cst_23 = arith.constant dense<0.000000e+00> : vector<1x8x32xf32>
    %87 = tpu.matmul %86, %73, %cst_23 {dimension_numbers = #tpu.dot_dimension_numbers<[2], [1], [1], [2], [0, 0, 0, 1, 1, 2], [0], [0]>} : vector<1x8x8xbf16>, vector<1x8x32xbf16>, vector<1x8x32xf32> -> vector<1x8x32xf32>
    "tpu.trace_stop"() : () -> ()
    %88 = tpu.reciprocal %85 {approx = true} : vector<1x8x1xf32> -> vector<1x8x1xf32>
    %89 = vector.broadcast %88 : vector<1x8x1xf32> to vector<1x8x32xf32>
    %90 = arith.mulf %87, %89 : vector<1x8x32xf32>
    %91 = vector.extract_strided_slice %44 {offsets = [0, 0, 64], sizes = [1, 8, 32], strides = [1, 1, 1]} : vector<1x8x576xf32> to vector<1x8x32xf32>
    %92 = arith.truncf %91 : vector<1x8x32xf32> to vector<1x8x32xbf16>
    %93 = vector.extract_strided_slice %44 {offsets = [0, 0, 256], sizes = [1, 8, 32], strides = [1, 1, 1]} : vector<1x8x576xf32> to vector<1x8x32xf32>
    %94 = arith.truncf %93 : vector<1x8x32xf32> to vector<1x8x32xbf16>
    %95 = vector.extract_strided_slice %44 {offsets = [0, 0, 448], sizes = [1, 8, 32], strides = [1, 1, 1]} : vector<1x8x576xf32> to vector<1x8x32xf32>
    %96 = arith.truncf %95 : vector<1x8x32xf32> to vector<1x8x32xbf16>
    "tpu.trace_start"() <{level = 10 : i32, message = "bqd,bkd->bqk"}> : () -> ()
    %cst_24 = arith.constant dense<0.000000e+00> : vector<1x8x8xf32>
    %97 = tpu.matmul %92, %94, %cst_24 {dimension_numbers = #tpu.dot_dimension_numbers<[2], [2], [1], [1], [0, 0, 0, 1, 1, 1], [0], [0]>} : vector<1x8x32xbf16>, vector<1x8x32xbf16>, vector<1x8x8xf32> -> vector<1x8x8xf32>
    "tpu.trace_stop"() : () -> ()
    %cst_25 = arith.constant 0.0721687824 : f32
    %98 = vector.broadcast %cst_25 : f32 to vector<1x8x8xf32>
    %99 = arith.mulf %97, %98 : vector<1x8x8xf32>
    %100 = vector.shape_cast %1 : vector<8x8xf32> to vector<1x8x8xf32>
    %101 = arith.addf %99, %100 : vector<1x8x8xf32>
    %cst_26 = arith.constant dense<0xFF800000> : vector<1x8xf32>
    %102 = vector.multi_reduction <maximumf>, %101, %cst_26 [2] : vector<1x8x8xf32> to vector<1x8xf32>
    %103 = vector.shape_cast %102 : vector<1x8xf32> to vector<1x8x1xf32>
    %104 = vector.broadcast %103 : vector<1x8x1xf32> to vector<1x8x8xf32>
    %105 = arith.subf %101, %104 : vector<1x8x8xf32>
    %106 = math.exp %105 : vector<1x8x8xf32>
    %cst_27 = arith.constant dense<0.000000e+00> : vector<1x8xf32>
    %107 = vector.multi_reduction <add>, %106, %cst_27 [2] : vector<1x8x8xf32> to vector<1x8xf32>
    %108 = vector.shape_cast %107 : vector<1x8xf32> to vector<1x8x1xf32>
    %109 = arith.truncf %106 : vector<1x8x8xf32> to vector<1x8x8xbf16>
    "tpu.trace_start"() <{level = 10 : i32, message = "bqk,bkd->bqd"}> : () -> ()
    %cst_28 = arith.constant dense<0.000000e+00> : vector<1x8x32xf32>
    %110 = tpu.matmul %109, %96, %cst_28 {dimension_numbers = #tpu.dot_dimension_numbers<[2], [1], [1], [2], [0, 0, 0, 1, 1, 2], [0], [0]>} : vector<1x8x8xbf16>, vector<1x8x32xbf16>, vector<1x8x32xf32> -> vector<1x8x32xf32>
    "tpu.trace_stop"() : () -> ()
    %111 = tpu.reciprocal %108 {approx = true} : vector<1x8x1xf32> -> vector<1x8x1xf32>
    %112 = vector.broadcast %111 : vector<1x8x1xf32> to vector<1x8x32xf32>
    %113 = arith.mulf %110, %112 : vector<1x8x32xf32>
    %114 = vector.extract_strided_slice %44 {offsets = [0, 0, 96], sizes = [1, 8, 32], strides = [1, 1, 1]} : vector<1x8x576xf32> to vector<1x8x32xf32>
    %115 = arith.truncf %114 : vector<1x8x32xf32> to vector<1x8x32xbf16>
    %116 = vector.extract_strided_slice %44 {offsets = [0, 0, 288], sizes = [1, 8, 32], strides = [1, 1, 1]} : vector<1x8x576xf32> to vector<1x8x32xf32>
    %117 = arith.truncf %116 : vector<1x8x32xf32> to vector<1x8x32xbf16>
    %118 = vector.extract_strided_slice %44 {offsets = [0, 0, 480], sizes = [1, 8, 32], strides = [1, 1, 1]} : vector<1x8x576xf32> to vector<1x8x32xf32>
    %119 = arith.truncf %118 : vector<1x8x32xf32> to vector<1x8x32xbf16>
    "tpu.trace_start"() <{level = 10 : i32, message = "bqd,bkd->bqk"}> : () -> ()
    %cst_29 = arith.constant dense<0.000000e+00> : vector<1x8x8xf32>
    %120 = tpu.matmul %115, %117, %cst_29 {dimension_numbers = #tpu.dot_dimension_numbers<[2], [2], [1], [1], [0, 0, 0, 1, 1, 1], [0], [0]>} : vector<1x8x32xbf16>, vector<1x8x32xbf16>, vector<1x8x8xf32> -> vector<1x8x8xf32>
    "tpu.trace_stop"() : () -> ()
    %cst_30 = arith.constant 0.0721687824 : f32
    %121 = vector.broadcast %cst_30 : f32 to vector<1x8x8xf32>
    %122 = arith.mulf %120, %121 : vector<1x8x8xf32>
    %123 = vector.shape_cast %1 : vector<8x8xf32> to vector<1x8x8xf32>
    %124 = arith.addf %122, %123 : vector<1x8x8xf32>
    %cst_31 = arith.constant dense<0xFF800000> : vector<1x8xf32>
    %125 = vector.multi_reduction <maximumf>, %124, %cst_31 [2] : vector<1x8x8xf32> to vector<1x8xf32>
    %126 = vector.shape_cast %125 : vector<1x8xf32> to vector<1x8x1xf32>
    %127 = vector.broadcast %126 : vector<1x8x1xf32> to vector<1x8x8xf32>
    %128 = arith.subf %124, %127 : vector<1x8x8xf32>
    %129 = math.exp %128 : vector<1x8x8xf32>
    %cst_32 = arith.constant dense<0.000000e+00> : vector<1x8xf32>
    %130 = vector.multi_reduction <add>, %129, %cst_32 [2] : vector<1x8x8xf32> to vector<1x8xf32>
    %131 = vector.shape_cast %130 : vector<1x8xf32> to vector<1x8x1xf32>
    %132 = arith.truncf %129 : vector<1x8x8xf32> to vector<1x8x8xbf16>
    "tpu.trace_start"() <{level = 10 : i32, message = "bqk,bkd->bqd"}> : () -> ()
    %cst_33 = arith.constant dense<0.000000e+00> : vector<1x8x32xf32>
    %133 = tpu.matmul %132, %119, %cst_33 {dimension_numbers = #tpu.dot_dimension_numbers<[2], [1], [1], [2], [0, 0, 0, 1, 1, 2], [0], [0]>} : vector<1x8x8xbf16>, vector<1x8x32xbf16>, vector<1x8x32xf32> -> vector<1x8x32xf32>
    "tpu.trace_stop"() : () -> ()
    %134 = tpu.reciprocal %131 {approx = true} : vector<1x8x1xf32> -> vector<1x8x1xf32>
    %135 = vector.broadcast %134 : vector<1x8x1xf32> to vector<1x8x32xf32>
    %136 = arith.mulf %133, %135 : vector<1x8x32xf32>
    %137 = vector.extract_strided_slice %44 {offsets = [0, 0, 128], sizes = [1, 8, 32], strides = [1, 1, 1]} : vector<1x8x576xf32> to vector<1x8x32xf32>
    %138 = arith.truncf %137 : vector<1x8x32xf32> to vector<1x8x32xbf16>
    %139 = vector.extract_strided_slice %44 {offsets = [0, 0, 320], sizes = [1, 8, 32], strides = [1, 1, 1]} : vector<1x8x576xf32> to vector<1x8x32xf32>
    %140 = arith.truncf %139 : vector<1x8x32xf32> to vector<1x8x32xbf16>
    %141 = vector.extract_strided_slice %44 {offsets = [0, 0, 512], sizes = [1, 8, 32], strides = [1, 1, 1]} : vector<1x8x576xf32> to vector<1x8x32xf32>
    %142 = arith.truncf %141 : vector<1x8x32xf32> to vector<1x8x32xbf16>
    "tpu.trace_start"() <{level = 10 : i32, message = "bqd,bkd->bqk"}> : () -> ()
    %cst_34 = arith.constant dense<0.000000e+00> : vector<1x8x8xf32>
    %143 = tpu.matmul %138, %140, %cst_34 {dimension_numbers = #tpu.dot_dimension_numbers<[2], [2], [1], [1], [0, 0, 0, 1, 1, 1], [0], [0]>} : vector<1x8x32xbf16>, vector<1x8x32xbf16>, vector<1x8x8xf32> -> vector<1x8x8xf32>
    "tpu.trace_stop"() : () -> ()
    %cst_35 = arith.constant 0.0721687824 : f32
    %144 = vector.broadcast %cst_35 : f32 to vector<1x8x8xf32>
    %145 = arith.mulf %143, %144 : vector<1x8x8xf32>
    %146 = vector.shape_cast %1 : vector<8x8xf32> to vector<1x8x8xf32>
    %147 = arith.addf %145, %146 : vector<1x8x8xf32>
    %cst_36 = arith.constant dense<0xFF800000> : vector<1x8xf32>
    %148 = vector.multi_reduction <maximumf>, %147, %cst_36 [2] : vector<1x8x8xf32> to vector<1x8xf32>
    %149 = vector.shape_cast %148 : vector<1x8xf32> to vector<1x8x1xf32>
    %150 = vector.broadcast %149 : vector<1x8x1xf32> to vector<1x8x8xf32>
    %151 = arith.subf %147, %150 : vector<1x8x8xf32>
    %152 = math.exp %151 : vector<1x8x8xf32>
    %cst_37 = arith.constant dense<0.000000e+00> : vector<1x8xf32>
    %153 = vector.multi_reduction <add>, %152, %cst_37 [2] : vector<1x8x8xf32> to vector<1x8xf32>
    %154 = vector.shape_cast %153 : vector<1x8xf32> to vector<1x8x1xf32>
    %155 = arith.truncf %152 : vector<1x8x8xf32> to vector<1x8x8xbf16>
    "tpu.trace_start"() <{level = 10 : i32, message = "bqk,bkd->bqd"}> : () -> ()
    %cst_38 = arith.constant dense<0.000000e+00> : vector<1x8x32xf32>
    %156 = tpu.matmul %155, %142, %cst_38 {dimension_numbers = #tpu.dot_dimension_numbers<[2], [1], [1], [2], [0, 0, 0, 1, 1, 2], [0], [0]>} : vector<1x8x8xbf16>, vector<1x8x32xbf16>, vector<1x8x32xf32> -> vector<1x8x32xf32>
    "tpu.trace_stop"() : () -> ()
    %157 = tpu.reciprocal %154 {approx = true} : vector<1x8x1xf32> -> vector<1x8x1xf32>
    %158 = vector.broadcast %157 : vector<1x8x1xf32> to vector<1x8x32xf32>
    %159 = arith.mulf %156, %158 : vector<1x8x32xf32>
    %160 = vector.extract_strided_slice %44 {offsets = [0, 0, 160], sizes = [1, 8, 32], strides = [1, 1, 1]} : vector<1x8x576xf32> to vector<1x8x32xf32>
    %161 = arith.truncf %160 : vector<1x8x32xf32> to vector<1x8x32xbf16>
    %162 = vector.extract_strided_slice %44 {offsets = [0, 0, 352], sizes = [1, 8, 32], strides = [1, 1, 1]} : vector<1x8x576xf32> to vector<1x8x32xf32>
    %163 = arith.truncf %162 : vector<1x8x32xf32> to vector<1x8x32xbf16>
    %164 = vector.extract_strided_slice %44 {offsets = [0, 0, 544], sizes = [1, 8, 32], strides = [1, 1, 1]} : vector<1x8x576xf32> to vector<1x8x32xf32>
    %165 = arith.truncf %164 : vector<1x8x32xf32> to vector<1x8x32xbf16>
    "tpu.trace_start"() <{level = 10 : i32, message = "bqd,bkd->bqk"}> : () -> ()
    %cst_39 = arith.constant dense<0.000000e+00> : vector<1x8x8xf32>
    %166 = tpu.matmul %161, %163, %cst_39 {dimension_numbers = #tpu.dot_dimension_numbers<[2], [2], [1], [1], [0, 0, 0, 1, 1, 1], [0], [0]>} : vector<1x8x32xbf16>, vector<1x8x32xbf16>, vector<1x8x8xf32> -> vector<1x8x8xf32>
    "tpu.trace_stop"() : () -> ()
    %cst_40 = arith.constant 0.0721687824 : f32
    %167 = vector.broadcast %cst_40 : f32 to vector<1x8x8xf32>
    %168 = arith.mulf %166, %167 : vector<1x8x8xf32>
    %169 = vector.shape_cast %1 : vector<8x8xf32> to vector<1x8x8xf32>
    %170 = arith.addf %168, %169 : vector<1x8x8xf32>
    %cst_41 = arith.constant dense<0xFF800000> : vector<1x8xf32>
    %171 = vector.multi_reduction <maximumf>, %170, %cst_41 [2] : vector<1x8x8xf32> to vector<1x8xf32>
    %172 = vector.shape_cast %171 : vector<1x8xf32> to vector<1x8x1xf32>
    %173 = vector.broadcast %172 : vector<1x8x1xf32> to vector<1x8x8xf32>
    %174 = arith.subf %170, %173 : vector<1x8x8xf32>
    %175 = math.exp %174 : vector<1x8x8xf32>
    %cst_42 = arith.constant dense<0.000000e+00> : vector<1x8xf32>
    %176 = vector.multi_reduction <add>, %175, %cst_42 [2] : vector<1x8x8xf32> to vector<1x8xf32>
    %177 = vector.shape_cast %176 : vector<1x8xf32> to vector<1x8x1xf32>
    %178 = arith.truncf %175 : vector<1x8x8xf32> to vector<1x8x8xbf16>
    "tpu.trace_start"() <{level = 10 : i32, message = "bqk,bkd->bqd"}> : () -> ()
    %cst_43 = arith.constant dense<0.000000e+00> : vector<1x8x32xf32>
    %179 = tpu.matmul %178, %165, %cst_43 {dimension_numbers = #tpu.dot_dimension_numbers<[2], [1], [1], [2], [0, 0, 0, 1, 1, 2], [0], [0]>} : vector<1x8x8xbf16>, vector<1x8x32xbf16>, vector<1x8x32xf32> -> vector<1x8x32xf32>
    "tpu.trace_stop"() : () -> ()
    %180 = tpu.reciprocal %177 {approx = true} : vector<1x8x1xf32> -> vector<1x8x1xf32>
    %181 = vector.broadcast %180 : vector<1x8x1xf32> to vector<1x8x32xf32>
    %182 = arith.mulf %179, %181 : vector<1x8x32xf32>
    %183 = tpu.concatenate %67, %90, %113, %136, %159, %182 in 2 : vector<1x8x32xf32>, vector<1x8x32xf32>, vector<1x8x32xf32>, vector<1x8x32xf32>, vector<1x8x32xf32>, vector<1x8x32xf32> -> vector<1x8x192xf32>
    %184 = vector.shape_cast %183 : vector<1x8x192xf32> to vector<8x192xf32>
    %185 = arith.truncf %184 : vector<8x192xf32> to vector<8x192xbf16>
    %c0_44 = arith.constant 0 : index
    %c0_45 = arith.constant 0 : index
    %c0_46 = arith.constant 0 : index
    %186 = vector.load %arg4[%c0_44, %c0_45, %c0_46] : memref<2x192x192xbf16, #tpu.memory_space<vmem>>, vector<1x192x192xbf16>
    %187 = vector.shape_cast %186 : vector<1x192x192xbf16> to vector<192x192xbf16>
    %cst_47 = arith.constant dense<0.000000e+00> : vector<8x192xf32>
    %188 = tpu.matmul %185, %187, %cst_47 {dimension_numbers = #tpu.dot_dimension_numbers<[1], [0], [0], [1], [0, 0, 1, 1], [], []>} : vector<8x192xbf16>, vector<192x192xbf16>, vector<8x192xf32> -> vector<8x192xf32>
    %189 = vector.shape_cast %8 : vector<192xf32> to vector<1x192xf32>
    %190 = vector.broadcast %189 : vector<1x192xf32> to vector<8x192xf32>
    %191 = arith.addf %188, %190 : vector<8x192xf32>
    %192 = vector.shape_cast %191 : vector<8x192xf32> to vector<1x8x192xf32>
    %193 = arith.addf %0, %192 : vector<1x8x192xf32>
    %cst_48 = arith.constant dense<0.000000e+00> : vector<1x8xf32>
    %194 = vector.multi_reduction <add>, %193, %cst_48 [2] : vector<1x8x192xf32> to vector<1x8xf32>
    %195 = vector.shape_cast %194 : vector<1x8xf32> to vector<1x8x1xf32>
    %cst_49 = arith.constant 1.920000e+02 : f32
    %196 = vector.broadcast %cst_49 : f32 to vector<1x8x1xf32>
    %197 = arith.divf %195, %196 : vector<1x8x1xf32>
    %198 = vector.broadcast %197 : vector<1x8x1xf32> to vector<1x8x192xf32>
    %199 = arith.subf %193, %198 : vector<1x8x192xf32>
    %200 = arith.mulf %199, %199 : vector<1x8x192xf32>
    %cst_50 = arith.constant dense<0.000000e+00> : vector<1x8xf32>
    %201 = vector.multi_reduction <add>, %200, %cst_50 [2] : vector<1x8x192xf32> to vector<1x8xf32>
    %202 = vector.shape_cast %201 : vector<1x8xf32> to vector<1x8x1xf32>
    %cst_51 = arith.constant 1.920000e+02 : f32
    %203 = vector.broadcast %cst_51 : f32 to vector<1x8x1xf32>
    %204 = arith.divf %202, %203 : vector<1x8x1xf32>
    %cst_52 = arith.constant 9.99999974E-6 : f32
    %205 = vector.broadcast %cst_52 : f32 to vector<1x8x1xf32>
    %206 = arith.addf %204, %205 : vector<1x8x1xf32>
    %207 = math.rsqrt %206 : vector<1x8x1xf32>
    %208 = vector.broadcast %207 : vector<1x8x1xf32> to vector<1x8x192xf32>
    %209 = arith.mulf %199, %208 : vector<1x8x192xf32>
    %210 = vector.shape_cast %10 : vector<192xf32> to vector<1x1x192xf32>
    %211 = vector.broadcast %210 : vector<1x1x192xf32> to vector<1x8x192xf32>
    %212 = arith.mulf %209, %211 : vector<1x8x192xf32>
    %213 = vector.shape_cast %12 : vector<192xf32> to vector<1x1x192xf32>
    %214 = vector.broadcast %213 : vector<1x1x192xf32> to vector<1x8x192xf32>
    %215 = arith.addf %212, %214 : vector<1x8x192xf32>
    %216 = vector.shape_cast %215 : vector<1x8x192xf32> to vector<8x192xf32>
    %217 = arith.truncf %216 : vector<8x192xf32> to vector<8x192xbf16>
    %c0_53 = arith.constant 0 : index
    %c0_54 = arith.constant 0 : index
    %c0_55 = arith.constant 0 : index
    %218 = vector.load %arg5[%c0_53, %c0_54, %c0_55] : memref<2x192x768xbf16, #tpu.memory_space<vmem>>, vector<1x192x768xbf16>
    %219 = vector.shape_cast %218 : vector<1x192x768xbf16> to vector<192x768xbf16>
    %cst_56 = arith.constant dense<0.000000e+00> : vector<8x768xf32>
    %220 = tpu.matmul %217, %219, %cst_56 {dimension_numbers = #tpu.dot_dimension_numbers<[1], [0], [0], [1], [0, 0, 1, 1], [], []>} : vector<8x192xbf16>, vector<192x768xbf16>, vector<8x768xf32> -> vector<8x768xf32>
    %221 = vector.shape_cast %14 : vector<768xf32> to vector<1x768xf32>
    %222 = vector.broadcast %221 : vector<1x768xf32> to vector<8x768xf32>
    %223 = arith.addf %220, %222 : vector<8x768xf32>
    %cst_57 = arith.constant 0.000000e+00 : f32
    %224 = vector.broadcast %cst_57 : f32 to vector<8x768xf32>
    %225 = arith.maximumf %223, %224 : vector<8x768xf32>
    %226 = arith.truncf %225 : vector<8x768xf32> to vector<8x768xbf16>
    %c0_58 = arith.constant 0 : index
    %c0_59 = arith.constant 0 : index
    %c0_60 = arith.constant 0 : index
    %227 = vector.load %arg6[%c0_58, %c0_59, %c0_60] : memref<2x768x192xbf16, #tpu.memory_space<vmem>>, vector<1x768x192xbf16>
    %228 = vector.shape_cast %227 : vector<1x768x192xbf16> to vector<768x192xbf16>
    %cst_61 = arith.constant dense<0.000000e+00> : vector<8x192xf32>
    %229 = tpu.matmul %226, %228, %cst_61 {dimension_numbers = #tpu.dot_dimension_numbers<[1], [0], [0], [1], [0, 0, 1, 1], [], []>} : vector<8x768xbf16>, vector<768x192xbf16>, vector<8x192xf32> -> vector<8x192xf32>
    %230 = vector.shape_cast %16 : vector<192xf32> to vector<1x192xf32>
    %231 = vector.broadcast %230 : vector<1x192xf32> to vector<8x192xf32>
    %232 = arith.addf %229, %231 : vector<8x192xf32>
    %233 = vector.shape_cast %232 : vector<8x192xf32> to vector<1x8x192xf32>
    %234 = arith.addf %193, %233 : vector<1x8x192xf32>
    %235 = vector.extract_strided_slice %2 {offsets = [7, 0], sizes = [1, 192], strides = [1, 1]} : vector<17x768xf32> to vector<1x192xf32>
    %236 = vector.shape_cast %235 : vector<1x192xf32> to vector<192xf32>
    %237 = vector.extract_strided_slice %2 {offsets = [8, 0], sizes = [1, 192], strides = [1, 1]} : vector<17x768xf32> to vector<1x192xf32>
    %238 = vector.shape_cast %237 : vector<1x192xf32> to vector<192xf32>
    %239 = vector.extract_strided_slice %2 {offsets = [9, 0], sizes = [1, 192], strides = [1, 1]} : vector<17x768xf32> to vector<1x192xf32>
    %240 = vector.shape_cast %239 : vector<1x192xf32> to vector<192xf32>
    %241 = vector.extract_strided_slice %2 {offsets = [10, 0], sizes = [1, 192], strides = [1, 1]} : vector<17x768xf32> to vector<1x192xf32>
    %242 = vector.shape_cast %241 : vector<1x192xf32> to vector<192xf32>
    %243 = vector.extract_strided_slice %2 {offsets = [11, 0], sizes = [1, 192], strides = [1, 1]} : vector<17x768xf32> to vector<1x192xf32>
    %244 = vector.shape_cast %243 : vector<1x192xf32> to vector<192xf32>
    %245 = vector.extract_strided_slice %2 {offsets = [12, 0], sizes = [1, 768], strides = [1, 1]} : vector<17x768xf32> to vector<1x768xf32>
    %246 = vector.shape_cast %245 : vector<1x768xf32> to vector<768xf32>
    %247 = vector.extract_strided_slice %2 {offsets = [13, 0], sizes = [1, 192], strides = [1, 1]} : vector<17x768xf32> to vector<1x192xf32>
    %248 = vector.shape_cast %247 : vector<1x192xf32> to vector<192xf32>
    %cst_62 = arith.constant dense<0.000000e+00> : vector<1x8xf32>
    %249 = vector.multi_reduction <add>, %234, %cst_62 [2] : vector<1x8x192xf32> to vector<1x8xf32>
    %250 = vector.shape_cast %249 : vector<1x8xf32> to vector<1x8x1xf32>
    %cst_63 = arith.constant 1.920000e+02 : f32
    %251 = vector.broadcast %cst_63 : f32 to vector<1x8x1xf32>
    %252 = arith.divf %250, %251 : vector<1x8x1xf32>
    %253 = vector.broadcast %252 : vector<1x8x1xf32> to vector<1x8x192xf32>
    %254 = arith.subf %234, %253 : vector<1x8x192xf32>
    %255 = arith.mulf %254, %254 : vector<1x8x192xf32>
    %cst_64 = arith.constant dense<0.000000e+00> : vector<1x8xf32>
    %256 = vector.multi_reduction <add>, %255, %cst_64 [2] : vector<1x8x192xf32> to vector<1x8xf32>
    %257 = vector.shape_cast %256 : vector<1x8xf32> to vector<1x8x1xf32>
    %cst_65 = arith.constant 1.920000e+02 : f32
    %258 = vector.broadcast %cst_65 : f32 to vector<1x8x1xf32>
    %259 = arith.divf %257, %258 : vector<1x8x1xf32>
    %cst_66 = arith.constant 9.99999974E-6 : f32
    %260 = vector.broadcast %cst_66 : f32 to vector<1x8x1xf32>
    %261 = arith.addf %259, %260 : vector<1x8x1xf32>
    %262 = math.rsqrt %261 : vector<1x8x1xf32>
    %263 = vector.broadcast %262 : vector<1x8x1xf32> to vector<1x8x192xf32>
    %264 = arith.mulf %254, %263 : vector<1x8x192xf32>
    %265 = vector.shape_cast %236 : vector<192xf32> to vector<1x1x192xf32>
    %266 = vector.broadcast %265 : vector<1x1x192xf32> to vector<1x8x192xf32>
    %267 = arith.mulf %264, %266 : vector<1x8x192xf32>
    %268 = vector.shape_cast %238 : vector<192xf32> to vector<1x1x192xf32>
    %269 = vector.broadcast %268 : vector<1x1x192xf32> to vector<1x8x192xf32>
    %270 = arith.addf %267, %269 : vector<1x8x192xf32>
    %271 = vector.shape_cast %270 : vector<1x8x192xf32> to vector<8x192xf32>
    %272 = arith.truncf %271 : vector<8x192xf32> to vector<8x192xbf16>
    %c1 = arith.constant 1 : index
    %c0_67 = arith.constant 0 : index
    %c0_68 = arith.constant 0 : index
    %273 = vector.load %arg3[%c1, %c0_67, %c0_68] : memref<2x192x576xbf16, #tpu.memory_space<vmem>>, vector<1x192x576xbf16>
    %274 = vector.shape_cast %273 : vector<1x192x576xbf16> to vector<192x576xbf16>
    %cst_69 = arith.constant dense<0.000000e+00> : vector<8x576xf32>
    %275 = tpu.matmul %272, %274, %cst_69 {dimension_numbers = #tpu.dot_dimension_numbers<[1], [0], [0], [1], [0, 0, 1, 1], [], []>} : vector<8x192xbf16>, vector<192x576xbf16>, vector<8x576xf32> -> vector<8x576xf32>
    %276 = vector.shape_cast %275 : vector<8x576xf32> to vector<1x8x576xf32>
    %277 = vector.extract_strided_slice %276 {offsets = [0, 0, 0], sizes = [1, 8, 32], strides = [1, 1, 1]} : vector<1x8x576xf32> to vector<1x8x32xf32>
    %278 = arith.truncf %277 : vector<1x8x32xf32> to vector<1x8x32xbf16>
    %279 = vector.extract_strided_slice %276 {offsets = [0, 0, 192], sizes = [1, 8, 32], strides = [1, 1, 1]} : vector<1x8x576xf32> to vector<1x8x32xf32>
    %280 = arith.truncf %279 : vector<1x8x32xf32> to vector<1x8x32xbf16>
    %281 = vector.extract_strided_slice %276 {offsets = [0, 0, 384], sizes = [1, 8, 32], strides = [1, 1, 1]} : vector<1x8x576xf32> to vector<1x8x32xf32>
    %282 = arith.truncf %281 : vector<1x8x32xf32> to vector<1x8x32xbf16>
    "tpu.trace_start"() <{level = 10 : i32, message = "bqd,bkd->bqk"}> : () -> ()
    %cst_70 = arith.constant dense<0.000000e+00> : vector<1x8x8xf32>
    %283 = tpu.matmul %278, %280, %cst_70 {dimension_numbers = #tpu.dot_dimension_numbers<[2], [2], [1], [1], [0, 0, 0, 1, 1, 1], [0], [0]>} : vector<1x8x32xbf16>, vector<1x8x32xbf16>, vector<1x8x8xf32> -> vector<1x8x8xf32>
    "tpu.trace_stop"() : () -> ()
    %cst_71 = arith.constant 0.0721687824 : f32
    %284 = vector.broadcast %cst_71 : f32 to vector<1x8x8xf32>
    %285 = arith.mulf %283, %284 : vector<1x8x8xf32>
    %286 = vector.shape_cast %1 : vector<8x8xf32> to vector<1x8x8xf32>
    %287 = arith.addf %285, %286 : vector<1x8x8xf32>
    %cst_72 = arith.constant dense<0xFF800000> : vector<1x8xf32>
    %288 = vector.multi_reduction <maximumf>, %287, %cst_72 [2] : vector<1x8x8xf32> to vector<1x8xf32>
    %289 = vector.shape_cast %288 : vector<1x8xf32> to vector<1x8x1xf32>
    %290 = vector.broadcast %289 : vector<1x8x1xf32> to vector<1x8x8xf32>
    %291 = arith.subf %287, %290 : vector<1x8x8xf32>
    %292 = math.exp %291 : vector<1x8x8xf32>
    %cst_73 = arith.constant dense<0.000000e+00> : vector<1x8xf32>
    %293 = vector.multi_reduction <add>, %292, %cst_73 [2] : vector<1x8x8xf32> to vector<1x8xf32>
    %294 = vector.shape_cast %293 : vector<1x8xf32> to vector<1x8x1xf32>
    %295 = arith.truncf %292 : vector<1x8x8xf32> to vector<1x8x8xbf16>
    "tpu.trace_start"() <{level = 10 : i32, message = "bqk,bkd->bqd"}> : () -> ()
    %cst_74 = arith.constant dense<0.000000e+00> : vector<1x8x32xf32>
    %296 = tpu.matmul %295, %282, %cst_74 {dimension_numbers = #tpu.dot_dimension_numbers<[2], [1], [1], [2], [0, 0, 0, 1, 1, 2], [0], [0]>} : vector<1x8x8xbf16>, vector<1x8x32xbf16>, vector<1x8x32xf32> -> vector<1x8x32xf32>
    "tpu.trace_stop"() : () -> ()
    %297 = tpu.reciprocal %294 {approx = true} : vector<1x8x1xf32> -> vector<1x8x1xf32>
    %298 = vector.broadcast %297 : vector<1x8x1xf32> to vector<1x8x32xf32>
    %299 = arith.mulf %296, %298 : vector<1x8x32xf32>
    %300 = vector.extract_strided_slice %276 {offsets = [0, 0, 32], sizes = [1, 8, 32], strides = [1, 1, 1]} : vector<1x8x576xf32> to vector<1x8x32xf32>
    %301 = arith.truncf %300 : vector<1x8x32xf32> to vector<1x8x32xbf16>
    %302 = vector.extract_strided_slice %276 {offsets = [0, 0, 224], sizes = [1, 8, 32], strides = [1, 1, 1]} : vector<1x8x576xf32> to vector<1x8x32xf32>
    %303 = arith.truncf %302 : vector<1x8x32xf32> to vector<1x8x32xbf16>
    %304 = vector.extract_strided_slice %276 {offsets = [0, 0, 416], sizes = [1, 8, 32], strides = [1, 1, 1]} : vector<1x8x576xf32> to vector<1x8x32xf32>
    %305 = arith.truncf %304 : vector<1x8x32xf32> to vector<1x8x32xbf16>
    "tpu.trace_start"() <{level = 10 : i32, message = "bqd,bkd->bqk"}> : () -> ()
    %cst_75 = arith.constant dense<0.000000e+00> : vector<1x8x8xf32>
    %306 = tpu.matmul %301, %303, %cst_75 {dimension_numbers = #tpu.dot_dimension_numbers<[2], [2], [1], [1], [0, 0, 0, 1, 1, 1], [0], [0]>} : vector<1x8x32xbf16>, vector<1x8x32xbf16>, vector<1x8x8xf32> -> vector<1x8x8xf32>
    "tpu.trace_stop"() : () -> ()
    %cst_76 = arith.constant 0.0721687824 : f32
    %307 = vector.broadcast %cst_76 : f32 to vector<1x8x8xf32>
    %308 = arith.mulf %306, %307 : vector<1x8x8xf32>
    %309 = vector.shape_cast %1 : vector<8x8xf32> to vector<1x8x8xf32>
    %310 = arith.addf %308, %309 : vector<1x8x8xf32>
    %cst_77 = arith.constant dense<0xFF800000> : vector<1x8xf32>
    %311 = vector.multi_reduction <maximumf>, %310, %cst_77 [2] : vector<1x8x8xf32> to vector<1x8xf32>
    %312 = vector.shape_cast %311 : vector<1x8xf32> to vector<1x8x1xf32>
    %313 = vector.broadcast %312 : vector<1x8x1xf32> to vector<1x8x8xf32>
    %314 = arith.subf %310, %313 : vector<1x8x8xf32>
    %315 = math.exp %314 : vector<1x8x8xf32>
    %cst_78 = arith.constant dense<0.000000e+00> : vector<1x8xf32>
    %316 = vector.multi_reduction <add>, %315, %cst_78 [2] : vector<1x8x8xf32> to vector<1x8xf32>
    %317 = vector.shape_cast %316 : vector<1x8xf32> to vector<1x8x1xf32>
    %318 = arith.truncf %315 : vector<1x8x8xf32> to vector<1x8x8xbf16>
    "tpu.trace_start"() <{level = 10 : i32, message = "bqk,bkd->bqd"}> : () -> ()
    %cst_79 = arith.constant dense<0.000000e+00> : vector<1x8x32xf32>
    %319 = tpu.matmul %318, %305, %cst_79 {dimension_numbers = #tpu.dot_dimension_numbers<[2], [1], [1], [2], [0, 0, 0, 1, 1, 2], [0], [0]>} : vector<1x8x8xbf16>, vector<1x8x32xbf16>, vector<1x8x32xf32> -> vector<1x8x32xf32>
    "tpu.trace_stop"() : () -> ()
    %320 = tpu.reciprocal %317 {approx = true} : vector<1x8x1xf32> -> vector<1x8x1xf32>
    %321 = vector.broadcast %320 : vector<1x8x1xf32> to vector<1x8x32xf32>
    %322 = arith.mulf %319, %321 : vector<1x8x32xf32>
    %323 = vector.extract_strided_slice %276 {offsets = [0, 0, 64], sizes = [1, 8, 32], strides = [1, 1, 1]} : vector<1x8x576xf32> to vector<1x8x32xf32>
    %324 = arith.truncf %323 : vector<1x8x32xf32> to vector<1x8x32xbf16>
    %325 = vector.extract_strided_slice %276 {offsets = [0, 0, 256], sizes = [1, 8, 32], strides = [1, 1, 1]} : vector<1x8x576xf32> to vector<1x8x32xf32>
    %326 = arith.truncf %325 : vector<1x8x32xf32> to vector<1x8x32xbf16>
    %327 = vector.extract_strided_slice %276 {offsets = [0, 0, 448], sizes = [1, 8, 32], strides = [1, 1, 1]} : vector<1x8x576xf32> to vector<1x8x32xf32>
    %328 = arith.truncf %327 : vector<1x8x32xf32> to vector<1x8x32xbf16>
    "tpu.trace_start"() <{level = 10 : i32, message = "bqd,bkd->bqk"}> : () -> ()
    %cst_80 = arith.constant dense<0.000000e+00> : vector<1x8x8xf32>
    %329 = tpu.matmul %324, %326, %cst_80 {dimension_numbers = #tpu.dot_dimension_numbers<[2], [2], [1], [1], [0, 0, 0, 1, 1, 1], [0], [0]>} : vector<1x8x32xbf16>, vector<1x8x32xbf16>, vector<1x8x8xf32> -> vector<1x8x8xf32>
    "tpu.trace_stop"() : () -> ()
    %cst_81 = arith.constant 0.0721687824 : f32
    %330 = vector.broadcast %cst_81 : f32 to vector<1x8x8xf32>
    %331 = arith.mulf %329, %330 : vector<1x8x8xf32>
    %332 = vector.shape_cast %1 : vector<8x8xf32> to vector<1x8x8xf32>
    %333 = arith.addf %331, %332 : vector<1x8x8xf32>
    %cst_82 = arith.constant dense<0xFF800000> : vector<1x8xf32>
    %334 = vector.multi_reduction <maximumf>, %333, %cst_82 [2] : vector<1x8x8xf32> to vector<1x8xf32>
    %335 = vector.shape_cast %334 : vector<1x8xf32> to vector<1x8x1xf32>
    %336 = vector.broadcast %335 : vector<1x8x1xf32> to vector<1x8x8xf32>
    %337 = arith.subf %333, %336 : vector<1x8x8xf32>
    %338 = math.exp %337 : vector<1x8x8xf32>
    %cst_83 = arith.constant dense<0.000000e+00> : vector<1x8xf32>
    %339 = vector.multi_reduction <add>, %338, %cst_83 [2] : vector<1x8x8xf32> to vector<1x8xf32>
    %340 = vector.shape_cast %339 : vector<1x8xf32> to vector<1x8x1xf32>
    %341 = arith.truncf %338 : vector<1x8x8xf32> to vector<1x8x8xbf16>
    "tpu.trace_start"() <{level = 10 : i32, message = "bqk,bkd->bqd"}> : () -> ()
    %cst_84 = arith.constant dense<0.000000e+00> : vector<1x8x32xf32>
    %342 = tpu.matmul %341, %328, %cst_84 {dimension_numbers = #tpu.dot_dimension_numbers<[2], [1], [1], [2], [0, 0, 0, 1, 1, 2], [0], [0]>} : vector<1x8x8xbf16>, vector<1x8x32xbf16>, vector<1x8x32xf32> -> vector<1x8x32xf32>
    "tpu.trace_stop"() : () -> ()
    %343 = tpu.reciprocal %340 {approx = true} : vector<1x8x1xf32> -> vector<1x8x1xf32>
    %344 = vector.broadcast %343 : vector<1x8x1xf32> to vector<1x8x32xf32>
    %345 = arith.mulf %342, %344 : vector<1x8x32xf32>
    %346 = vector.extract_strided_slice %276 {offsets = [0, 0, 96], sizes = [1, 8, 32], strides = [1, 1, 1]} : vector<1x8x576xf32> to vector<1x8x32xf32>
    %347 = arith.truncf %346 : vector<1x8x32xf32> to vector<1x8x32xbf16>
    %348 = vector.extract_strided_slice %276 {offsets = [0, 0, 288], sizes = [1, 8, 32], strides = [1, 1, 1]} : vector<1x8x576xf32> to vector<1x8x32xf32>
    %349 = arith.truncf %348 : vector<1x8x32xf32> to vector<1x8x32xbf16>
    %350 = vector.extract_strided_slice %276 {offsets = [0, 0, 480], sizes = [1, 8, 32], strides = [1, 1, 1]} : vector<1x8x576xf32> to vector<1x8x32xf32>
    %351 = arith.truncf %350 : vector<1x8x32xf32> to vector<1x8x32xbf16>
    "tpu.trace_start"() <{level = 10 : i32, message = "bqd,bkd->bqk"}> : () -> ()
    %cst_85 = arith.constant dense<0.000000e+00> : vector<1x8x8xf32>
    %352 = tpu.matmul %347, %349, %cst_85 {dimension_numbers = #tpu.dot_dimension_numbers<[2], [2], [1], [1], [0, 0, 0, 1, 1, 1], [0], [0]>} : vector<1x8x32xbf16>, vector<1x8x32xbf16>, vector<1x8x8xf32> -> vector<1x8x8xf32>
    "tpu.trace_stop"() : () -> ()
    %cst_86 = arith.constant 0.0721687824 : f32
    %353 = vector.broadcast %cst_86 : f32 to vector<1x8x8xf32>
    %354 = arith.mulf %352, %353 : vector<1x8x8xf32>
    %355 = vector.shape_cast %1 : vector<8x8xf32> to vector<1x8x8xf32>
    %356 = arith.addf %354, %355 : vector<1x8x8xf32>
    %cst_87 = arith.constant dense<0xFF800000> : vector<1x8xf32>
    %357 = vector.multi_reduction <maximumf>, %356, %cst_87 [2] : vector<1x8x8xf32> to vector<1x8xf32>
    %358 = vector.shape_cast %357 : vector<1x8xf32> to vector<1x8x1xf32>
    %359 = vector.broadcast %358 : vector<1x8x1xf32> to vector<1x8x8xf32>
    %360 = arith.subf %356, %359 : vector<1x8x8xf32>
    %361 = math.exp %360 : vector<1x8x8xf32>
    %cst_88 = arith.constant dense<0.000000e+00> : vector<1x8xf32>
    %362 = vector.multi_reduction <add>, %361, %cst_88 [2] : vector<1x8x8xf32> to vector<1x8xf32>
    %363 = vector.shape_cast %362 : vector<1x8xf32> to vector<1x8x1xf32>
    %364 = arith.truncf %361 : vector<1x8x8xf32> to vector<1x8x8xbf16>
    "tpu.trace_start"() <{level = 10 : i32, message = "bqk,bkd->bqd"}> : () -> ()
    %cst_89 = arith.constant dense<0.000000e+00> : vector<1x8x32xf32>
    %365 = tpu.matmul %364, %351, %cst_89 {dimension_numbers = #tpu.dot_dimension_numbers<[2], [1], [1], [2], [0, 0, 0, 1, 1, 2], [0], [0]>} : vector<1x8x8xbf16>, vector<1x8x32xbf16>, vector<1x8x32xf32> -> vector<1x8x32xf32>
    "tpu.trace_stop"() : () -> ()
    %366 = tpu.reciprocal %363 {approx = true} : vector<1x8x1xf32> -> vector<1x8x1xf32>
    %367 = vector.broadcast %366 : vector<1x8x1xf32> to vector<1x8x32xf32>
    %368 = arith.mulf %365, %367 : vector<1x8x32xf32>
    %369 = vector.extract_strided_slice %276 {offsets = [0, 0, 128], sizes = [1, 8, 32], strides = [1, 1, 1]} : vector<1x8x576xf32> to vector<1x8x32xf32>
    %370 = arith.truncf %369 : vector<1x8x32xf32> to vector<1x8x32xbf16>
    %371 = vector.extract_strided_slice %276 {offsets = [0, 0, 320], sizes = [1, 8, 32], strides = [1, 1, 1]} : vector<1x8x576xf32> to vector<1x8x32xf32>
    %372 = arith.truncf %371 : vector<1x8x32xf32> to vector<1x8x32xbf16>
    %373 = vector.extract_strided_slice %276 {offsets = [0, 0, 512], sizes = [1, 8, 32], strides = [1, 1, 1]} : vector<1x8x576xf32> to vector<1x8x32xf32>
    %374 = arith.truncf %373 : vector<1x8x32xf32> to vector<1x8x32xbf16>
    "tpu.trace_start"() <{level = 10 : i32, message = "bqd,bkd->bqk"}> : () -> ()
    %cst_90 = arith.constant dense<0.000000e+00> : vector<1x8x8xf32>
    %375 = tpu.matmul %370, %372, %cst_90 {dimension_numbers = #tpu.dot_dimension_numbers<[2], [2], [1], [1], [0, 0, 0, 1, 1, 1], [0], [0]>} : vector<1x8x32xbf16>, vector<1x8x32xbf16>, vector<1x8x8xf32> -> vector<1x8x8xf32>
    "tpu.trace_stop"() : () -> ()
    %cst_91 = arith.constant 0.0721687824 : f32
    %376 = vector.broadcast %cst_91 : f32 to vector<1x8x8xf32>
    %377 = arith.mulf %375, %376 : vector<1x8x8xf32>
    %378 = vector.shape_cast %1 : vector<8x8xf32> to vector<1x8x8xf32>
    %379 = arith.addf %377, %378 : vector<1x8x8xf32>
    %cst_92 = arith.constant dense<0xFF800000> : vector<1x8xf32>
    %380 = vector.multi_reduction <maximumf>, %379, %cst_92 [2] : vector<1x8x8xf32> to vector<1x8xf32>
    %381 = vector.shape_cast %380 : vector<1x8xf32> to vector<1x8x1xf32>
    %382 = vector.broadcast %381 : vector<1x8x1xf32> to vector<1x8x8xf32>
    %383 = arith.subf %379, %382 : vector<1x8x8xf32>
    %384 = math.exp %383 : vector<1x8x8xf32>
    %cst_93 = arith.constant dense<0.000000e+00> : vector<1x8xf32>
    %385 = vector.multi_reduction <add>, %384, %cst_93 [2] : vector<1x8x8xf32> to vector<1x8xf32>
    %386 = vector.shape_cast %385 : vector<1x8xf32> to vector<1x8x1xf32>
    %387 = arith.truncf %384 : vector<1x8x8xf32> to vector<1x8x8xbf16>
    "tpu.trace_start"() <{level = 10 : i32, message = "bqk,bkd->bqd"}> : () -> ()
    %cst_94 = arith.constant dense<0.000000e+00> : vector<1x8x32xf32>
    %388 = tpu.matmul %387, %374, %cst_94 {dimension_numbers = #tpu.dot_dimension_numbers<[2], [1], [1], [2], [0, 0, 0, 1, 1, 2], [0], [0]>} : vector<1x8x8xbf16>, vector<1x8x32xbf16>, vector<1x8x32xf32> -> vector<1x8x32xf32>
    "tpu.trace_stop"() : () -> ()
    %389 = tpu.reciprocal %386 {approx = true} : vector<1x8x1xf32> -> vector<1x8x1xf32>
    %390 = vector.broadcast %389 : vector<1x8x1xf32> to vector<1x8x32xf32>
    %391 = arith.mulf %388, %390 : vector<1x8x32xf32>
    %392 = vector.extract_strided_slice %276 {offsets = [0, 0, 160], sizes = [1, 8, 32], strides = [1, 1, 1]} : vector<1x8x576xf32> to vector<1x8x32xf32>
    %393 = arith.truncf %392 : vector<1x8x32xf32> to vector<1x8x32xbf16>
    %394 = vector.extract_strided_slice %276 {offsets = [0, 0, 352], sizes = [1, 8, 32], strides = [1, 1, 1]} : vector<1x8x576xf32> to vector<1x8x32xf32>
    %395 = arith.truncf %394 : vector<1x8x32xf32> to vector<1x8x32xbf16>
    %396 = vector.extract_strided_slice %276 {offsets = [0, 0, 544], sizes = [1, 8, 32], strides = [1, 1, 1]} : vector<1x8x576xf32> to vector<1x8x32xf32>
    %397 = arith.truncf %396 : vector<1x8x32xf32> to vector<1x8x32xbf16>
    "tpu.trace_start"() <{level = 10 : i32, message = "bqd,bkd->bqk"}> : () -> ()
    %cst_95 = arith.constant dense<0.000000e+00> : vector<1x8x8xf32>
    %398 = tpu.matmul %393, %395, %cst_95 {dimension_numbers = #tpu.dot_dimension_numbers<[2], [2], [1], [1], [0, 0, 0, 1, 1, 1], [0], [0]>} : vector<1x8x32xbf16>, vector<1x8x32xbf16>, vector<1x8x8xf32> -> vector<1x8x8xf32>
    "tpu.trace_stop"() : () -> ()
    %cst_96 = arith.constant 0.0721687824 : f32
    %399 = vector.broadcast %cst_96 : f32 to vector<1x8x8xf32>
    %400 = arith.mulf %398, %399 : vector<1x8x8xf32>
    %401 = vector.shape_cast %1 : vector<8x8xf32> to vector<1x8x8xf32>
    %402 = arith.addf %400, %401 : vector<1x8x8xf32>
    %cst_97 = arith.constant dense<0xFF800000> : vector<1x8xf32>
    %403 = vector.multi_reduction <maximumf>, %402, %cst_97 [2] : vector<1x8x8xf32> to vector<1x8xf32>
    %404 = vector.shape_cast %403 : vector<1x8xf32> to vector<1x8x1xf32>
    %405 = vector.broadcast %404 : vector<1x8x1xf32> to vector<1x8x8xf32>
    %406 = arith.subf %402, %405 : vector<1x8x8xf32>
    %407 = math.exp %406 : vector<1x8x8xf32>
    %cst_98 = arith.constant dense<0.000000e+00> : vector<1x8xf32>
    %408 = vector.multi_reduction <add>, %407, %cst_98 [2] : vector<1x8x8xf32> to vector<1x8xf32>
    %409 = vector.shape_cast %408 : vector<1x8xf32> to vector<1x8x1xf32>
    %410 = arith.truncf %407 : vector<1x8x8xf32> to vector<1x8x8xbf16>
    "tpu.trace_start"() <{level = 10 : i32, message = "bqk,bkd->bqd"}> : () -> ()
    %cst_99 = arith.constant dense<0.000000e+00> : vector<1x8x32xf32>
    %411 = tpu.matmul %410, %397, %cst_99 {dimension_numbers = #tpu.dot_dimension_numbers<[2], [1], [1], [2], [0, 0, 0, 1, 1, 2], [0], [0]>} : vector<1x8x8xbf16>, vector<1x8x32xbf16>, vector<1x8x32xf32> -> vector<1x8x32xf32>
    "tpu.trace_stop"() : () -> ()
    %412 = tpu.reciprocal %409 {approx = true} : vector<1x8x1xf32> -> vector<1x8x1xf32>
    %413 = vector.broadcast %412 : vector<1x8x1xf32> to vector<1x8x32xf32>
    %414 = arith.mulf %411, %413 : vector<1x8x32xf32>
    %415 = tpu.concatenate %299, %322, %345, %368, %391, %414 in 2 : vector<1x8x32xf32>, vector<1x8x32xf32>, vector<1x8x32xf32>, vector<1x8x32xf32>, vector<1x8x32xf32>, vector<1x8x32xf32> -> vector<1x8x192xf32>
    %416 = vector.shape_cast %415 : vector<1x8x192xf32> to vector<8x192xf32>
    %417 = arith.truncf %416 : vector<8x192xf32> to vector<8x192xbf16>
    %c1_100 = arith.constant 1 : index
    %c0_101 = arith.constant 0 : index
    %c0_102 = arith.constant 0 : index
    %418 = vector.load %arg4[%c1_100, %c0_101, %c0_102] : memref<2x192x192xbf16, #tpu.memory_space<vmem>>, vector<1x192x192xbf16>
    %419 = vector.shape_cast %418 : vector<1x192x192xbf16> to vector<192x192xbf16>
    %cst_103 = arith.constant dense<0.000000e+00> : vector<8x192xf32>
    %420 = tpu.matmul %417, %419, %cst_103 {dimension_numbers = #tpu.dot_dimension_numbers<[1], [0], [0], [1], [0, 0, 1, 1], [], []>} : vector<8x192xbf16>, vector<192x192xbf16>, vector<8x192xf32> -> vector<8x192xf32>
    %421 = vector.shape_cast %240 : vector<192xf32> to vector<1x192xf32>
    %422 = vector.broadcast %421 : vector<1x192xf32> to vector<8x192xf32>
    %423 = arith.addf %420, %422 : vector<8x192xf32>
    %424 = vector.shape_cast %423 : vector<8x192xf32> to vector<1x8x192xf32>
    %425 = arith.addf %234, %424 : vector<1x8x192xf32>
    %cst_104 = arith.constant dense<0.000000e+00> : vector<1x8xf32>
    %426 = vector.multi_reduction <add>, %425, %cst_104 [2] : vector<1x8x192xf32> to vector<1x8xf32>
    %427 = vector.shape_cast %426 : vector<1x8xf32> to vector<1x8x1xf32>
    %cst_105 = arith.constant 1.920000e+02 : f32
    %428 = vector.broadcast %cst_105 : f32 to vector<1x8x1xf32>
    %429 = arith.divf %427, %428 : vector<1x8x1xf32>
    %430 = vector.broadcast %429 : vector<1x8x1xf32> to vector<1x8x192xf32>
    %431 = arith.subf %425, %430 : vector<1x8x192xf32>
    %432 = arith.mulf %431, %431 : vector<1x8x192xf32>
    %cst_106 = arith.constant dense<0.000000e+00> : vector<1x8xf32>
    %433 = vector.multi_reduction <add>, %432, %cst_106 [2] : vector<1x8x192xf32> to vector<1x8xf32>
    %434 = vector.shape_cast %433 : vector<1x8xf32> to vector<1x8x1xf32>
    %cst_107 = arith.constant 1.920000e+02 : f32
    %435 = vector.broadcast %cst_107 : f32 to vector<1x8x1xf32>
    %436 = arith.divf %434, %435 : vector<1x8x1xf32>
    %cst_108 = arith.constant 9.99999974E-6 : f32
    %437 = vector.broadcast %cst_108 : f32 to vector<1x8x1xf32>
    %438 = arith.addf %436, %437 : vector<1x8x1xf32>
    %439 = math.rsqrt %438 : vector<1x8x1xf32>
    %440 = vector.broadcast %439 : vector<1x8x1xf32> to vector<1x8x192xf32>
    %441 = arith.mulf %431, %440 : vector<1x8x192xf32>
    %442 = vector.shape_cast %242 : vector<192xf32> to vector<1x1x192xf32>
    %443 = vector.broadcast %442 : vector<1x1x192xf32> to vector<1x8x192xf32>
    %444 = arith.mulf %441, %443 : vector<1x8x192xf32>
    %445 = vector.shape_cast %244 : vector<192xf32> to vector<1x1x192xf32>
    %446 = vector.broadcast %445 : vector<1x1x192xf32> to vector<1x8x192xf32>
    %447 = arith.addf %444, %446 : vector<1x8x192xf32>
    %448 = vector.shape_cast %447 : vector<1x8x192xf32> to vector<8x192xf32>
    %449 = arith.truncf %448 : vector<8x192xf32> to vector<8x192xbf16>
    %c1_109 = arith.constant 1 : index
    %c0_110 = arith.constant 0 : index
    %c0_111 = arith.constant 0 : index
    %450 = vector.load %arg5[%c1_109, %c0_110, %c0_111] : memref<2x192x768xbf16, #tpu.memory_space<vmem>>, vector<1x192x768xbf16>
    %451 = vector.shape_cast %450 : vector<1x192x768xbf16> to vector<192x768xbf16>
    %cst_112 = arith.constant dense<0.000000e+00> : vector<8x768xf32>
    %452 = tpu.matmul %449, %451, %cst_112 {dimension_numbers = #tpu.dot_dimension_numbers<[1], [0], [0], [1], [0, 0, 1, 1], [], []>} : vector<8x192xbf16>, vector<192x768xbf16>, vector<8x768xf32> -> vector<8x768xf32>
    %453 = vector.shape_cast %246 : vector<768xf32> to vector<1x768xf32>
    %454 = vector.broadcast %453 : vector<1x768xf32> to vector<8x768xf32>
    %455 = arith.addf %452, %454 : vector<8x768xf32>
    %cst_113 = arith.constant 0.000000e+00 : f32
    %456 = vector.broadcast %cst_113 : f32 to vector<8x768xf32>
    %457 = arith.maximumf %455, %456 : vector<8x768xf32>
    %458 = arith.truncf %457 : vector<8x768xf32> to vector<8x768xbf16>
    %c1_114 = arith.constant 1 : index
    %c0_115 = arith.constant 0 : index
    %c0_116 = arith.constant 0 : index
    %459 = vector.load %arg6[%c1_114, %c0_115, %c0_116] : memref<2x768x192xbf16, #tpu.memory_space<vmem>>, vector<1x768x192xbf16>
    %460 = vector.shape_cast %459 : vector<1x768x192xbf16> to vector<768x192xbf16>
    %cst_117 = arith.constant dense<0.000000e+00> : vector<8x192xf32>
    %461 = tpu.matmul %458, %460, %cst_117 {dimension_numbers = #tpu.dot_dimension_numbers<[1], [0], [0], [1], [0, 0, 1, 1], [], []>} : vector<8x768xbf16>, vector<768x192xbf16>, vector<8x192xf32> -> vector<8x192xf32>
    %462 = vector.shape_cast %248 : vector<192xf32> to vector<1x192xf32>
    %463 = vector.broadcast %462 : vector<1x192xf32> to vector<8x192xf32>
    %464 = arith.addf %461, %463 : vector<8x192xf32>
    %465 = vector.shape_cast %464 : vector<8x192xf32> to vector<1x8x192xf32>
    %466 = arith.addf %425, %465 : vector<1x8x192xf32>
    %467 = vector.extract_strided_slice %2 {offsets = [14, 0], sizes = [1, 192], strides = [1, 1]} : vector<17x768xf32> to vector<1x192xf32>
    %468 = vector.shape_cast %467 : vector<1x192xf32> to vector<192xf32>
    %469 = vector.extract_strided_slice %2 {offsets = [15, 0], sizes = [1, 192], strides = [1, 1]} : vector<17x768xf32> to vector<1x192xf32>
    %470 = vector.shape_cast %469 : vector<1x192xf32> to vector<192xf32>
    %471 = vector.extract_strided_slice %2 {offsets = [16, 0], sizes = [1, 128], strides = [1, 1]} : vector<17x768xf32> to vector<1x128xf32>
    %472 = vector.shape_cast %471 : vector<1x128xf32> to vector<128xf32>
    %cst_118 = arith.constant dense<0.000000e+00> : vector<1x8xf32>
    %473 = vector.multi_reduction <add>, %466, %cst_118 [2] : vector<1x8x192xf32> to vector<1x8xf32>
    %474 = vector.shape_cast %473 : vector<1x8xf32> to vector<1x8x1xf32>
    %cst_119 = arith.constant 1.920000e+02 : f32
    %475 = vector.broadcast %cst_119 : f32 to vector<1x8x1xf32>
    %476 = arith.divf %474, %475 : vector<1x8x1xf32>
    %477 = vector.broadcast %476 : vector<1x8x1xf32> to vector<1x8x192xf32>
    %478 = arith.subf %466, %477 : vector<1x8x192xf32>
    %479 = arith.mulf %478, %478 : vector<1x8x192xf32>
    %cst_120 = arith.constant dense<0.000000e+00> : vector<1x8xf32>
    %480 = vector.multi_reduction <add>, %479, %cst_120 [2] : vector<1x8x192xf32> to vector<1x8xf32>
    %481 = vector.shape_cast %480 : vector<1x8xf32> to vector<1x8x1xf32>
    %cst_121 = arith.constant 1.920000e+02 : f32
    %482 = vector.broadcast %cst_121 : f32 to vector<1x8x1xf32>
    %483 = arith.divf %481, %482 : vector<1x8x1xf32>
    %cst_122 = arith.constant 9.99999974E-6 : f32
    %484 = vector.broadcast %cst_122 : f32 to vector<1x8x1xf32>
    %485 = arith.addf %483, %484 : vector<1x8x1xf32>
    %486 = math.rsqrt %485 : vector<1x8x1xf32>
    %487 = vector.broadcast %486 : vector<1x8x1xf32> to vector<1x8x192xf32>
    %488 = arith.mulf %478, %487 : vector<1x8x192xf32>
    %489 = vector.shape_cast %468 : vector<192xf32> to vector<1x1x192xf32>
    %490 = vector.broadcast %489 : vector<1x1x192xf32> to vector<1x8x192xf32>
    %491 = arith.mulf %488, %490 : vector<1x8x192xf32>
    %492 = vector.shape_cast %470 : vector<192xf32> to vector<1x1x192xf32>
    %493 = vector.broadcast %492 : vector<1x1x192xf32> to vector<1x8x192xf32>
    %494 = arith.addf %491, %493 : vector<1x8x192xf32>
    %495 = vector.shape_cast %494 : vector<1x8x192xf32> to vector<8x192xf32>
    %496 = arith.truncf %495 : vector<8x192xf32> to vector<8x192xbf16>
    %c0_123 = arith.constant 0 : index
    %c0_124 = arith.constant 0 : index
    %497 = vector.load %arg7[%c0_123, %c0_124] : memref<192x128xbf16, #tpu.memory_space<vmem>>, vector<192x128xbf16>
    %cst_125 = arith.constant dense<0.000000e+00> : vector<8x128xf32>
    %498 = tpu.matmul %496, %497, %cst_125 {dimension_numbers = #tpu.dot_dimension_numbers<[1], [0], [0], [1], [0, 0, 1, 1], [], []>} : vector<8x192xbf16>, vector<192x128xbf16>, vector<8x128xf32> -> vector<8x128xf32>
    %499 = vector.shape_cast %472 : vector<128xf32> to vector<1x128xf32>
    %500 = vector.broadcast %499 : vector<1x128xf32> to vector<8x128xf32>
    %501 = arith.addf %498, %500 : vector<8x128xf32>
    %502 = vector.shape_cast %501 : vector<8x128xf32> to vector<1x8x128xf32>
    %503 = arith.truncf %502 : vector<1x8x128xf32> to vector<1x8x128xbf16>
    %c0_126 = arith.constant 0 : index
    %c0_127 = arith.constant 0 : index
    %c0_128 = arith.constant 0 : index
    %504 = vector.load %arg9[%c0_126, %c0_127, %c0_128] : memref<1x8x128xbf16, #tpu.memory_space<vmem>>, vector<1x8x128xbf16>
    tpu.vector_store %arg9[%c0_126, %c0_127, %c0_128], %503 {strides = array<i32>} : memref<1x8x128xbf16, #tpu.memory_space<vmem>>, vector<1x8x128xbf16>,
    return
  }
  func.func @transform_0(%arg0: i32) -> (i32, i32, i32) {
    %c0_i32 = arith.constant 0 : i32
    %c0_i32_0 = arith.constant 0 : i32
    %c0_i32_1 = arith.constant 0 : i32
    return %arg0, %c0_i32, %c0_i32_0 : i32, i32, i32
  }
  func.func @transform_1(%arg0: i32) -> (i32, i32) {
    %c0_i32 = arith.constant 0 : i32
    %c0_i32_0 = arith.constant 0 : i32
    %c0_i32_1 = arith.constant 0 : i32
    return %c0_i32, %c0_i32_0 : i32, i32
  }
  func.func @transform_2(%arg0: i32) -> (i32, i32, i32) {
    %c0_i32 = arith.constant 0 : i32
    %c0_i32_0 = arith.constant 0 : i32
    %c0_i32_1 = arith.constant 0 : i32
    %c0_i32_2 = arith.constant 0 : i32
    return %c0_i32, %c0_i32_0, %c0_i32_1 : i32, i32, i32
  }
  func.func @transform_3(%arg0: i32) -> (i32, i32, i32) {
    %c0_i32 = arith.constant 0 : i32
    %c0_i32_0 = arith.constant 0 : i32
    %c0_i32_1 = arith.constant 0 : i32
    %c0_i32_2 = arith.constant 0 : i32
    return %c0_i32, %c0_i32_0, %c0_i32_1 : i32, i32, i32
  }
  func.func @transform_4(%arg0: i32) -> (i32, i32, i32) {
    %c0_i32 = arith.constant 0 : i32
    %c0_i32_0 = arith.constant 0 : i32
    %c0_i32_1 = arith.constant 0 : i32
    %c0_i32_2 = arith.constant 0 : i32
    return %c0_i32, %c0_i32_0, %c0_i32_1 : i32, i32, i32
  }
  func.func @transform_5(%arg0: i32) -> (i32, i32, i32) {
    %c0_i32 = arith.constant 0 : i32
    %c0_i32_0 = arith.constant 0 : i32
    %c0_i32_1 = arith.constant 0 : i32
    %c0_i32_2 = arith.constant 0 : i32
    return %c0_i32, %c0_i32_0, %c0_i32_1 : i32, i32, i32
  }
  func.func @transform_6(%arg0: i32) -> (i32, i32) {
    %c0_i32 = arith.constant 0 : i32
    %c0_i32_0 = arith.constant 0 : i32
    %c0_i32_1 = arith.constant 0 : i32
    return %c0_i32, %c0_i32_0 : i32, i32
  }
  func.func @transform_7(%arg0: i32) -> (i32, i32) {
    %c0_i32 = arith.constant 0 : i32
    %c0_i32_0 = arith.constant 0 : i32
    %c0_i32_1 = arith.constant 0 : i32
    return %c0_i32, %c0_i32_0 : i32, i32
  }
  func.func @transform_8(%arg0: i32) -> (i32, i32, i32) {
    %c0_i32 = arith.constant 0 : i32
    %c0_i32_0 = arith.constant 0 : i32
    %c0_i32_1 = arith.constant 0 : i32
    return %arg0, %c0_i32, %c0_i32_0 : i32, i32, i32
  }
}

</mosaic_0001>

<bundles_post_ra>
// kernel: tpu_custom_call.1
= control target key start
LH: loop header
LB: loop body
LE: loop exit
PB: predicated region body
PF: predicated region fallthrough
CT: control target
= control target key end

     0   :  { %13 = vsyncpa [#allocation3], 0  ;;  %s12406_s0 = inlined_call_operand.vmem [shape: f32[2,8,192], index: 0, kind: input, shape index: {}]   ;;  %s12407_s1 = inlined_call_operand.vmem [shape: f32[8,8], index: 1, kind: input, shape index: {}]   ;;  %s12408_s2 = inlined_call_operand.vmem [shape: bf16[2,192,576], index: 2, kind: input, shape index: {}]   ;;  %s12409_s3 = inlined_call_operand.vmem [shape: bf16[2,192,192], index: 3, kind: input, shape index: {}]   ;;  %s12410_s4 = inlined_call_operand.vmem [shape: bf16[2,192,768], index: 4, kind: input, shape index: {}]   ;;  %s12411_s5 = inlined_call_operand.vmem [shape: bf16[2,768,192], index: 5, kind: input, shape index: {}]   ;;  %s12412_s6 = inlined_call_operand.hbm [shape: bf16[192,128], index: 6, kind: input, shape index: {}]   ;;  %s12413_s7 = inlined_call_operand.vmem [shape: f32[17,768], index: 7, kind: input, shape index: {}]   ;;  %s12414_s8 = inlined_call_operand.hbm [shape: bf16[2,8,128], index: 8, kind: output, shape index: {}]  }
   0x1   :  { %14 = vsyncpa [#allocation4], 0 }
   0x2   :  { %16 = vsyncpa [#allocation4 + $0x1], 0  ;;  %s8831_s27 = smov 0   ;;  %s8833_s28 = smov 0  }
   0x3   :  { %s8835_s29 = smov 0   ;;  %s8837_s30 = smov 0  }
   0x4 LB: > { %s8852_s9 = sadd.s32 4294967295, %s8777_s30   ;;  %s5644_s10 = sadd.s32 4294967294, %s8777_s30   ;;  %s8777_s30 = sphi %s8837_s30, %s12426_s30   ;;  %s8773_s29 = sphi %s8835_s29, %s12425_s29   ;;  %s8769_s28 = sphi %s8833_s28, %s12424_s28   ;;  %s8765_s27 = sphi %s8831_s27, %s12423_s27  }
   0x5   : > { %s8856_s11 = sadd.s32 1, %s8777_s30   ;;  %s202_s12 = sadd.s32 1, %s8773_s29 }
   0x6   : > { %s199_s13 = ssub.s32 %s8777_s30, %s8856_s11  ;;  %p212_p0 = scmp.ne.s32.totalorder %s8773_s29, %s8769_s28 }
   0x7   : > { %p200_p1 = scmp.eq.s32.totalorder %s199_s13, 0  ;;  %p213_p2 = scmp.eq.s32.totalorder %s8852_s9, 1 }
   0x8   : > { %p218_p3 = scmp.ne.s32.totalorder %s8769_s28, %s8765_s27  ;;  %p219_p4 = scmp.eq.s32.totalorder %s5644_s10, 1 }
   0x9   : > { %s8867_s14 = scalar_select %p200_p1, %s8773_s29, %s202_s12  }
   0xa   : > { %p8869_p5 = por %p213_p2, %p212_p0  ;;  %p8873_p6 = por %p219_p4, %p218_p3 }
   0xb   : > { %p5645_p7 = scmp.ge.s32.totalorder %s8777_s30, 1  ;;  %p226_p8 = scmp.lt.s32.totalorder %s8777_s30, 3 }
   0xc   : > { %p8567_p9 = scmp.eq.s32.totalorder %s8852_s9, 0  ;;  %s252_s19 = sshll.u32 %s12412_s6, 4  ;;  %s253_s19 = int_to_ptr.hbm [resolvable:$true] %s252_s19 }
   0xd   : > { %p227_p10 = pnand %p5645_p7, %p226_p8  ;;  %s8779_s20 = smov [#allocation2]  }
   0xe   : > { %s254_s21 = sshll.u32 %s8779_s20, 4  ;;  %s8780_s22 = smov 64   ;;  %s255_s21 = int_to_ptr.vmem [resolvable:$true] %s254_s21 }
   0xf   : > { %p8559_p11 = pneg %p227_p10  ;;  %s8781_s23 = smov 4  }
  0x10   : > { %281 = sbr.rel (%p227_p10) target bundleno = 4116 (0x1014), region = 52 }
  0x11   : > { %p8560_p12 = pnand %p8567_p9, %p8559_p11 }
  0x13   : > { %8562 = dma.hbm_to_vmem [thread:$0]  (!%p8560_p12), %s253_s19, 1536, %s255_s21, [#allocation3], %s8780_s22, %s8780_s22, %s8781_s23  }
  0x15   : > { %8756 = dma.done.wait (%p8567_p9), [#allocation3], 1536  }
  0x16   : > { %8758 = vsyncadd (%p8567_p9), [#allocation3], 4294965760  ;;  %p316_p13 = scmp.lt.s32.totalorder %s8852_s9, 1  ;;  %vm338_vm0 = vcmask 523264   ;;  %v8782_v4 = vmov 192.0   ;;  %s12415_s20 = smov 32  }
  0x17   : > { %8610 = vrcp.f32 %v8782_v4  ;;  %v5795_v5 = vld [vmem:[%s12408_s2 + $0x118] sm:$0xf]  ;;  %v8074_v6 = vld [vmem:[%s12408_s2 + $0x128] sm:$0xf0]  ;;  %v5775_v7 = vld [vmem:[%s12408_s2 + $0xf0] sm:$0xf] }
  0x18   : > { %s317_s24 = scalar_select %p316_p13, %s8852_s9, 1  ;;  %v5796_v9 = vor.u32 %v8074_v6, %v5795_v5  ;;  %v8069_v10 = vld [vmem:[%s12408_s2 + $0x100] sm:$0xf0]  ;;  %v8072_v11 = vld [vmem:[%s12408_s2 + $0x11c] sm:$0xf]  ;;  %vm908_vm5 = vcmask 261120  }
  0x19   : > { %v5776_v12 = vor.u32 %v8069_v10, %v5775_v7  ;;  %v5797_v13 = vld [vmem:[%s12408_s2 + $0x12c] sm:$0xf0]  ;;  %v5755_v15 = vld [vmem:[%s12408_s2 + $0xc8] sm:$0xf]  ;;  %v8064_v16 = vld [vmem:[%s12408_s2 + $0xd8] sm:$0xf0] }
  0x1a   : > { %s8036_s25 = sshll.u32 %s317_s24, 4  ;;  %770 = vmatpush.bf16.msra.mxu0 %v5796_v9  ;;  %v5800_v17 = vor.u32 %v8072_v11, %v5797_v13  ;;  %v5756_v18 = vor.u32 %v8064_v16, %v5755_v15  ;;  %v5735_v20 = vld [vmem:[%s12408_s2 + $0xa0] sm:$0xf]  ;;  %v8059_v21 = vld [vmem:[%s12408_s2 + $0xb0] sm:$0xf0]  ;;  %s12417_s21 = smov 64  }
  0x1b   : > { %s8894_s12 = scalar_lea.vmem %s12406_s0, %s8036_s25  ;;  %v5736_v22 = vor.u32 %v8059_v21, %v5735_v20  ;;  %v5715_v34 = vld [vmem:[%s12408_s2 + $0x78] sm:$0xf]  ;;  %v8054_v35 = vld [vmem:[%s12408_s2 + $0x88] sm:$0xf0]  ;;  %v8067_v39 = vld [vmem:[%s12408_s2 + $0xf4] sm:$0xf] }
  0x1c   : > { %v322_v0 = vld [vmem:[%s8894_s12] sm:$0xff]  ;;  %v323_v1 = vld [vmem:[%s8894_s12 + $0x8] sm:$0xff]  ;;  %796 = vmatpush.bf16.msra.mxu2 %v5800_v17  ;;  %v5875_v36 = vld [vmem:[%s12408_s2 + $0x1b8] sm:$0xf]  ;;  %v5716_v37 = vor.u32 %v8054_v35, %v5715_v34  ;;  %s8785_s22 = smov 96   ;;  %vm944_vm6 = vcmask 1043456  }
  0x1d   : > { %v339_v2 = vsel %vm338_vm0, %v323_v1, 0.0  ;;  %v8611_v8 = vpop.eup %8610  ;;  %v8094_v38 = vld [vmem:[%s12408_s2 + $0x1c8] sm:$0xf0]  ;;  %v5777_v40 = vld [vmem:[%s12408_s2 + $0x104] sm:$0xf0]  ;;  %vm930_vm7 = vcmask 64512  }
  0x1e   : > { %v340_v3 = vadd.f32 %v339_v2, %v322_v0  ;;  %v344_v14 = vmul.f32 192.0, %v8611_v8  ;;  %771 = vmatpush.bf16.msra.mxu0 %v5776_v12  ;;  %vm348_vm1 = vweird.f32 %v8611_v8  ;;  %v5876_v41 = vor.u32 %v8094_v38, %v5875_v36  ;;  %v8092_v43 = vld [vmem:[%s12408_s2 + $0x1bc] sm:$0xf]  ;;  %v5877_v44 = vld [vmem:[%s12408_s2 + $0x1cc] sm:$0xf0]  ;;  %s12422_s18 = smov 32  }
  0x1f   : > { %v5780_v42 = vor.u32 %v8067_v39, %v5777_v40  ;;  %v5880_v45 = vor.u32 %v8092_v43, %v5877_v44  ;;  %v5695_v46 = vld [vmem:[%s12408_s2 + $0x50] sm:$0xf]  ;;  %v8049_v47 = vld [vmem:[%s12408_s2 + $0x60] sm:$0xf0]  ;;  %v8062_v51 = vld [vmem:[%s12408_s2 + $0xcc] sm:$0xf] }
  0x20   : > { %341 = vadd.xlane.f32.xlu0 %v340_v3  ;;  %v345_v19 = vsub.f32 1.0, %v344_v14  ;;  %787 = vmatpush.bf16.msra.mxu1 %v5876_v41  ;;  %v5855_v48 = vld [vmem:[%s12408_s2 + $0x190] sm:$0xf]  ;;  %v5696_v49 = vor.u32 %v8049_v47, %v5695_v46  ;;  %v8089_v50 = vld [vmem:[%s12408_s2 + $0x1a0] sm:$0xf0]  ;;  %vm1279_vm8 = vcmask 785408  }
  0x21   : > { %797 = vmatpush.bf16.msra.mxu2 %v5780_v42  ;;  %v5757_v52 = vld [vmem:[%s12408_s2 + $0xdc] sm:$0xf0]  ;;  %813 = vmatpush.bf16.msra.mxu3 %v5880_v45  ;;  %v5856_v53 = vor.u32 %v8089_v50, %v5855_v48  ;;  %v8087_v55 = vld [vmem:[%s12408_s2 + $0x194] sm:$0xf]  ;;  %v5857_v56 = vld [vmem:[%s12408_s2 + $0x1a4] sm:$0xf0] }
  0x22   : > { %772 = vmatpush.bf16.msra.mxu0 %v5756_v18  ;;  %v346_v23 = vmul.f32 %v8611_v8, %v345_v19  ;;  %v5760_v54 = vor.u32 %v8062_v51, %v5757_v52  ;;  %v5860_v57 = vor.u32 %v8087_v55, %v5857_v56  ;;  %v5675_v58 = vld [vmem:[%s12408_s2 + $0x28] sm:$0xf]  ;;  %v8044_v59 = vld [vmem:[%s12408_s2 + $0x38] sm:$0xf0]  ;;  %v8057_v63 = vld [vmem:[%s12408_s2 + $0xa4] sm:$0xf] }
  0x23   : > { %v5835_v60 = vld [vmem:[%s12408_s2 + $0x168] sm:$0xf]  ;;  %v5676_v61 = vor.u32 %v8044_v59, %v5675_v58  ;;  %v8084_v62 = vld [vmem:[%s12408_s2 + $0x178] sm:$0xf0]  ;;  %v8082_v3 = vld [vmem:[%s12408_s2 + $0x16c] sm:$0xf] }
  0x24   : > { %v347_v24 = vadd.f32 %v8611_v8, %v346_v23  ;;  %788 = vmatpush.bf16.msra.mxu1 %v5856_v53  ;;  %v5837_v4 = vld [vmem:[%s12408_s2 + $0x17c] sm:$0xf0]  ;;  %v8039_v7 = vld [vmem:[%s12408_s2 + $0x10] sm:$0xf0]  ;;  %v8052_v11 = vld [vmem:[%s12408_s2 + $0x7c] sm:$0xf] }
  0x25   : > { %798 = vmatpush.bf16.msra.mxu2 %v5760_v54  ;;  %814 = vmatpush.bf16.msra.mxu3 %v5860_v57  ;;  %v5840_v5 = vor.u32 %v8082_v3, %v5837_v4  ;;  %v5655_v6 = vld [vmem:[%s12408_s2] sm:$0xf]  ;;  %v8079_v10 = vld [vmem:[%s12408_s2 + $0x150] sm:$0xf0]  ;;  %v5717_v12 = vld [vmem:[%s12408_s2 + $0x8c] sm:$0xf0] }
  0x26   : > { %773 = vmatpush.bf16.msra.mxu0 %v5736_v22  ;;  %v8929_v25 = vsel %vm348_vm1, %v8611_v8, %v347_v24  ;;  %v5815_v8 = vld [vmem:[%s12408_s2 + $0x140] sm:$0xf]  ;;  %v5656_v9 = vor.u32 %v8039_v7, %v5655_v6  ;;  %v5720_v14 = vor.u32 %v8052_v11, %v5717_v12  ;;  %v8075_v16 = vld [vmem:[%s12408_s2 + $0x130] sm:$0xf0]  ;;  %v8073_v17 = vld [vmem:[%s12408_s2 + $0x124] sm:$0xf] }
  0x27   : > { %v5816_v13 = vor.u32 %v8079_v10, %v5815_v8  ;;  %v5803_v15 = vld [vmem:[%s12408_s2 + $0x120] sm:$0xf]  ;;  %v5805_v19 = vld [vmem:[%s12408_s2 + $0x134] sm:$0xf0]  ;;  %v8077_v20 = vld [vmem:[%s12408_s2 + $0x144] sm:$0xf] }
  0x28   : > { %v5804_v18 = vor.u32 %v8075_v16, %v5803_v15  ;;  %v5817_v21 = vld [vmem:[%s12408_s2 + $0x154] sm:$0xf0]  ;;  %v5808_v22 = vor.u32 %v8073_v17, %v5805_v19  ;;  %v5883_v24 = vld [vmem:[%s12408_s2 + $0x1c0] sm:$0xf]  ;;  %v8070_v34 = vld [vmem:[%s12408_s2 + $0x108] sm:$0xf0] }
  0x29   : > { %815 = vmatpush.bf16.msra.mxu3 %v5840_v5  ;;  %v5820_v23 = vor.u32 %v8077_v20, %v5817_v21  ;;  %v8068_v35 = vld [vmem:[%s12408_s2 + $0xfc] sm:$0xf]  ;;  %v5785_v36 = vld [vmem:[%s12408_s2 + $0x10c] sm:$0xf0]  ;;  %v5863_v39 = vld [vmem:[%s12408_s2 + $0x198] sm:$0xf] }
  0x2a   : > { %774 = vmatpush.bf16.msra.mxu0 %v5716_v37  ;;  %v5788_v38 = vor.u32 %v8068_v35, %v5785_v36  ;;  %v8090_v40 = vld [vmem:[%s12408_s2 + $0x1a8] sm:$0xf0]  ;;  %v5677_v43 = vld [vmem:[%s12408_s2 + $0x3c] sm:$0xf0]  ;;  %v5763_v44 = vld [vmem:[%s12408_s2 + $0xd0] sm:$0xf] }
  0x2b   : > { %v5864_v41 = vor.u32 %v8090_v40, %v5863_v39  ;;  %v8042_v42 = vld [vmem:[%s12408_s2 + $0x2c] sm:$0xf]  ;;  %v8065_v46 = vld [vmem:[%s12408_s2 + $0xe0] sm:$0xf0]  ;;  %v8063_v47 = vld [vmem:[%s12408_s2 + $0xd4] sm:$0xf] }
  0x2c   : > { %v5680_v45 = vor.u32 %v8042_v42, %v5677_v43  ;;  %v5765_v48 = vld [vmem:[%s12408_s2 + $0xe4] sm:$0xf0]  ;;  %v5843_v51 = vld [vmem:[%s12408_s2 + $0x170] sm:$0xf]  ;;  %v8085_v52 = vld [vmem:[%s12408_s2 + $0x180] sm:$0xf0] }
  0x2d   : > { %816 = vmatpush.bf16.msra.mxu3 %v5820_v23  ;;  %v5768_v50 = vor.u32 %v8063_v47, %v5765_v48  ;;  %v5844_v53 = vor.u32 %v8085_v52, %v5843_v51  ;;  %v8037_v54 = vld [vmem:[%s12408_s2 + $0x4] sm:$0xf]  ;;  %v5657_v55 = vld [vmem:[%s12408_s2 + $0x14] sm:$0xf0]  ;;  %v5743_v56 = vld [vmem:[%s12408_s2 + $0xa8] sm:$0xf] }
  0x2e   : > { %775 = vmatpush.bf16.msra.mxu0 %v5696_v49  ;;  %v5764_v49 = vor.u32 %v8065_v46, %v5763_v44  ;;  %v5660_v57 = vor.u32 %v8037_v54, %v5657_v55  ;;  %v8060_v58 = vld [vmem:[%s12408_s2 + $0xb8] sm:$0xf0]  ;;  %v8058_v59 = vld [vmem:[%s12408_s2 + $0xac] sm:$0xf]  ;;  %v8055_v3 = vld [vmem:[%s12408_s2 + $0x90] sm:$0xf0] }
  0x2f   : > { %v8053_v4 = vld [vmem:[%s12408_s2 + $0x84] sm:$0xf]  ;;  %v5725_v6 = vld [vmem:[%s12408_s2 + $0x94] sm:$0xf0]  ;;  %v8048_v15 = vld [vmem:[%s12408_s2 + $0x5c] sm:$0xf] }
  0x30   : > { %v8093_v7 = vld [vmem:[%s12408_s2 + $0x1c4] sm:$0xf]  ;;  %v5885_v8 = vld [vmem:[%s12408_s2 + $0x1d4] sm:$0xf0]  ;;  %v5728_v10 = vor.u32 %v8053_v4, %v5725_v6  ;;  %v5705_v17 = vld [vmem:[%s12408_s2 + $0x6c] sm:$0xf0] }
  0x31   : > { %v5888_v11 = vor.u32 %v8093_v7, %v5885_v8  ;;  %v5865_v19 = vld [vmem:[%s12408_s2 + $0x1ac] sm:$0xf0]  ;;  %v5708_v21 = vor.u32 %v8048_v15, %v5705_v17  ;;  %v5663_v35 = vld [vmem:[%s12408_s2 + $0x8] sm:$0xf]  ;;  %v8040_v36 = vld [vmem:[%s12408_s2 + $0x18] sm:$0xf0] }
  0x32   : > { %776 = vmatpush.bf16.msra.mxu0 %v5676_v61  ;;  %v5744_v61 = vor.u32 %v8060_v58, %v5743_v56  ;;  %v5683_v23 = vld [vmem:[%s12408_s2 + $0x30] sm:$0xf]  ;;  %v5665_v39 = vld [vmem:[%s12408_s2 + $0x1c] sm:$0xf0]  ;;  %v8078_v40 = vld [vmem:[%s12408_s2 + $0x14c] sm:$0xf] }
  0x33   : > { %v9203_v48 = vld [vmem:[%s12413_s7] sm:$0xff]  ;;  %v8071_v6 = vld [vmem:[%s12408_s2 + $0x110] sm:$0xf0]  ;;  %s313_s19 = sand.u32 1, %s8769_s28   ;;  %s8033_s24 = sshll.u32 %s8852_s9, 2 }
  0x34   : > { %v373_v52 = vperm.slane %v9203_v48, 0  ;;  %v5791_v4 = vld [vmem:[%s12408_s2 + $0x100] sm:$0xf]  ;;  %v8091_v8 = vld [vmem:[%s12408_s2 + $0x1b0] sm:$0xf0]  ;;  %s5650_s23 = sshll.u32 %s313_s19, 2  ;;  %s5568_s13 = scalar_lea.hbm %s12414_s8, %s8033_s24 }
  0x35   : > { %v5871_v7 = vld [vmem:[%s12408_s2 + $0x1a0] sm:$0xf]  ;;  %s5558_s9 = scalar_lea.sflag [#allocation4], %s313_s19 }
  0x36   : > { %777 = vmatpush.bf16.msra.mxu0 %v5656_v9 }
  0x3a   : > { %848 = vmatpush.bf16.msrb.mxu0 %v5808_v22 }
  0x3e   : > { %849 = vmatpush.bf16.msrb.mxu0 %v5788_v38  ;;  %v5664_v38 = vor.u32 %v8040_v36, %v5663_v35  ;;  %v5671_v35 = vld [vmem:[%s12408_s2 + $0x10] sm:$0xf]  ;;  %v8041_v36 = vld [vmem:[%s12408_s2 + $0x20] sm:$0xf0] }
  0x42   : > { %850 = vmatpush.bf16.msrb.mxu0 %v5768_v50 }
  0x93   : > { %v342_v26 = vpop.xlane.xlu0 %341 }
  0x94   : > { %v350_v27 = vmul.f32 %v8929_v25, %v342_v26  ;;  %v8095_v26 = vld [vmem:[%s12408_s2 + $0x1d0] sm:$0xf0] }
  0x96   : > { %v8932_v28 = vsub.f32 %v322_v0, %v350_v27  ;;  %v8934_v29 = vsub.f32 %v323_v1, %v350_v27  ;;  %v5737_v0 = vld [vmem:[%s12408_s2 + $0xb4] sm:$0xf0]  ;;  %v5836_v1 = vor.u32 %v8084_v62, %v5835_v60  ;;  %v5884_v27 = vor.u32 %v8095_v26, %v5883_v24  ;;  %v5745_v60 = vld [vmem:[%s12408_s2 + $0xbc] sm:$0xf0]  ;;  %v8045_v24 = vld [vmem:[%s12408_s2 + $0x40] sm:$0xf0] }
  0x97   : > { %v5740_v2 = vor.u32 %v8057_v63, %v5737_v0  ;;  %v5748_v62 = vor.u32 %v8058_v59, %v5745_v60  ;;  %v5823_v63 = vld [vmem:[%s12408_s2 + $0x148] sm:$0xf]  ;;  %v8080_v0 = vld [vmem:[%s12408_s2 + $0x158] sm:$0xf0]  ;;  %v8043_v26 = vld [vmem:[%s12408_s2 + $0x34] sm:$0xf] }
  0x98   : > { %v353_v30 = vmul.f32 %v8932_v28, %v8932_v28  ;;  %v354_v31 = vmul.f32 %v8934_v29, %v8934_v29  ;;  %789 = vmatpush.bf16.msra.mxu1 %v5836_v1  ;;  %839 = vmatpush.bf16.msrb.mxu3 %v5884_v27  ;;  %v5824_v1 = vor.u32 %v8080_v0, %v5823_v63 }
  0x99   : > { %799 = vmatpush.bf16.msra.mxu2 %v5740_v2  ;;  %851 = vmatpush.bf16.msrb.mxu0 %v5748_v62  ;;  %v5723_v2 = vld [vmem:[%s12408_s2 + $0x80] sm:$0xf]  ;;  %v5684_v27 = vor.u32 %v8045_v24, %v5683_v23  ;;  %v8076_v62 = vld [vmem:[%s12408_s2 + $0x138] sm:$0xf0]  ;;  %v5731_v23 = vld [vmem:[%s12408_s2 + $0x88] sm:$0xf] }
  0x9a   : > { %v355_v32 = vsel %vm338_vm0, %v354_v31, 0.0  ;;  %v5697_v31 = vld [vmem:[%s12408_s2 + $0x64] sm:$0xf0]  ;;  %v5724_v5 = vor.u32 %v8055_v3, %v5723_v2  ;;  %v8056_v24 = vld [vmem:[%s12408_s2 + $0x98] sm:$0xf0] }
  0x9b   : > { %v356_v33 = vadd.f32 %v355_v32, %v353_v30  ;;  %v8047_v30 = vld [vmem:[%s12408_s2 + $0x54] sm:$0xf]  ;;  %v5783_v32 = vld [vmem:[%s12408_s2 + $0xf8] sm:$0xf] }
  0x9c   : > { %790 = vmatpush.bf16.msra.mxu1 %v5816_v13  ;;  %v5784_v37 = vor.u32 %v8070_v34, %v5783_v32  ;;  %840 = vmatpush.bf16.msrb.mxu3 %v5864_v41  ;;  %v5703_v13 = vld [vmem:[%s12408_s2 + $0x58] sm:$0xf]  ;;  %v5845_v32 = vld [vmem:[%s12408_s2 + $0x184] sm:$0xf0]  ;;  %v5825_v41 = vld [vmem:[%s12408_s2 + $0x15c] sm:$0xf0] }
  0x9d   : > { %357 = vadd.xlane.f32.xlu0 %v356_v33  ;;  %800 = vmatpush.bf16.msra.mxu2 %v5720_v14  ;;  %v5700_v33 = vor.u32 %v8047_v30, %v5697_v31  ;;  %v8050_v14 = vld [vmem:[%s12408_s2 + $0x68] sm:$0xf0]  ;;  %v5685_v30 = vld [vmem:[%s12408_s2 + $0x44] sm:$0xf0]  ;;  %v8083_v31 = vld [vmem:[%s12408_s2 + $0x174] sm:$0xf]  ;;  %v5828_v44 = vor.u32 %v8078_v40, %v5825_v41 }
  0x9e   : > { %852 = vmatpush.bf16.msrb.mxu0 %v5728_v10  ;;  %v5704_v16 = vor.u32 %v8050_v14, %v5703_v13  ;;  %v5848_v34 = vor.u32 %v8083_v31, %v5845_v32  ;;  %v5771_v10 = vld [vmem:[%s12408_s2 + $0xd8] sm:$0xf]  ;;  %v8086_v14 = vld [vmem:[%s12408_s2 + $0x188] sm:$0xf0] }
  0x9f   : > { %v5851_v13 = vld [vmem:[%s12408_s2 + $0x178] sm:$0xf] }
  0xa0   : > { %822 = vmatpush.bf16.msrb.mxu1 %v5804_v18  ;;  %841 = vmatpush.bf16.msrb.mxu3 %v5844_v53  ;;  %v8088_v18 = vld [vmem:[%s12408_s2 + $0x19c] sm:$0xf]  ;;  %v5852_v17 = vor.u32 %v8086_v14, %v5851_v13  ;;  %v5691_v32 = vld [vmem:[%s12408_s2 + $0x38] sm:$0xf] }
  0xa1   : > { %801 = vmatpush.bf16.msra.mxu2 %v5700_v33  ;;  %v5868_v22 = vor.u32 %v8088_v18, %v5865_v19  ;;  %v5688_v33 = vor.u32 %v8043_v26, %v5685_v30  ;;  %v8061_v18 = vld [vmem:[%s12408_s2 + $0xc0] sm:$0xf0]  ;;  %v5831_v19 = vld [vmem:[%s12408_s2 + $0x150] sm:$0xf]  ;;  %v5732_v26 = vor.u32 %v8056_v24, %v5731_v23  ;;  %v8051_v30 = vld [vmem:[%s12408_s2 + $0x70] sm:$0xf0] }
  0xa2   : > { %853 = vmatpush.bf16.msrb.mxu0 %v5708_v21 }
  0xa4   : > { %823 = vmatpush.bf16.msrb.mxu1 %v5784_v37  ;;  %842 = vmatpush.bf16.msrb.mxu3 %v5824_v1  ;;  %v8038_v37 = vld [vmem:[%s12408_s2 + $0xc] sm:$0xf] }
  0xa5   : > { %802 = vmatpush.bf16.msra.mxu2 %v5680_v45  ;;  %v5668_v43 = vor.u32 %v8038_v37, %v5665_v39  ;;  %v5672_v37 = vor.u32 %v8041_v36, %v5671_v35 }
  0xa6   : > { %854 = vmatpush.bf16.msrb.mxu0 %v5688_v33  ;;  %v8046_v33 = vld [vmem:[%s12408_s2 + $0x48] sm:$0xf0] }
  0xa8   : > { %824 = vmatpush.bf16.msrb.mxu1 %v5764_v49  ;;  %v9208_v49 = vld [vmem:[%s12413_s7 + $0x8] sm:$0xff] }
  0xa9   : > { %803 = vmatpush.bf16.msra.mxu2 %v5660_v57  ;;  %v374_v53 = vperm.slane %v9208_v49, 0  ;;  %v377_v57 = vperm.slane %v9203_v48, 1  ;;  %v378_v58 = vperm.slane %v9208_v49, 1 }
  0xaa   : > { %855 = vmatpush.bf16.msrb.mxu0 %v5668_v43 }
  0xac   : > { %825 = vmatpush.bf16.msrb.mxu1 %v5744_v61  ;;  %v5811_v61 = vld [vmem:[%s12408_s2 + $0x128] sm:$0xf] }
  0xad   : > { %865 = vmatpush.bf16.msrb.mxu2 %v5888_v11  ;;  %v5812_v3 = vor.u32 %v8076_v62, %v5811_v61  ;;  %v5872_v11 = vor.u32 %v8091_v8, %v5871_v7 }
  0xb0   : > { %826 = vmatpush.bf16.msrb.mxu1 %v5724_v5 }
  0xb1   : > { %866 = vmatpush.bf16.msrb.mxu2 %v5868_v22 }
  0xb4   : > { %827 = vmatpush.bf16.msrb.mxu1 %v5704_v16  ;;  %v5751_v16 = vld [vmem:[%s12408_s2 + $0xb0] sm:$0xf] }
  0xb5   : > { %867 = vmatpush.bf16.msrb.mxu2 %v5848_v34  ;;  %v5752_v21 = vor.u32 %v8061_v18, %v5751_v16  ;;  %v5692_v34 = vor.u32 %v8046_v33, %v5691_v32 }
  0xb8   : > { %828 = vmatpush.bf16.msrb.mxu1 %v5684_v27  ;;  %v5711_v27 = vld [vmem:[%s12408_s2 + $0x60] sm:$0xf] }
  0xb9   : > { %868 = vmatpush.bf16.msrb.mxu2 %v5828_v44  ;;  %v5712_v31 = vor.u32 %v8051_v30, %v5711_v27 }
  0xbc   : > { %829 = vmatpush.bf16.msrb.mxu1 %v5664_v38 }
 0x110   : > { %v358_v9 = vpop.xlane.xlu0 %357 }
 0x111   : > { %v359_v12 = vmul.f32 %v358_v9, %v8929_v25  ;;  %v5792_v9 = vor.u32 %v8071_v6, %v5791_v4 }
 0x113   : > { %v360_v20 = vadd.f32 1e-05, %v359_v12  ;;  %v8066_v12 = vld [vmem:[%s12408_s2 + $0xe8] sm:$0xf0] }
 0x114   : > { %v5772_v15 = vor.u32 %v8066_v12, %v5771_v10 }
 0x115   : > { %8612 = vrsqrt.f32 %v360_v20  ;;  %vm367_vm3 = vweird.f32 %v360_v20 }
 0x11b   : > { %v8613_v42 = vpop.eup %8612 }
 0x11c   : > { %v362_v45 = vmul.f32 %v8613_v42, %v360_v20  ;;  %vm368_vm2 = vweird.f32 %v8613_v42  ;;  %v8081_v20 = vld [vmem:[%s12408_s2 + $0x160] sm:$0xf0] }
 0x11d   : > { %vm369_vm4 = vmor %vm367_vm3, %vm368_vm2  ;;  %v5832_v22 = vor.u32 %v8081_v20, %v5831_v19 }
 0x11e   : > { %v363_v46 = vmul.f32 %v8613_v42, %v362_v45 }
 0x120   : > { %v364_v47 = vmul.f32 0.5, %v363_v46 }
 0x122   : > { %v365_v50 = vsub.f32 1.5, %v364_v47 }
 0x124   : > { %v366_v51 = vmul.f32 %v8613_v42, %v365_v50 }
 0x126   : > { %v370_v54 = vsel %vm369_vm4, %v8613_v42, %v366_v51 }
 0x127   : > { %v371_v55 = vmul.f32 %v370_v54, %v8932_v28  ;;  %v372_v56 = vmul.f32 %v370_v54, %v8934_v29  ;;  %v5891_v28 = vld [vmem:[%s12408_s2 + $0x1c8] sm:$0xf]  ;;  %v8096_v29 = vld [vmem:[%s12408_s2 + $0x1d8] sm:$0xf0] }
 0x128   : > { %v5892_v5 = vor.u32 %v8096_v29, %v5891_v28 }
 0x129   : > { %v375_v59 = vmul.f32 %v373_v52, %v371_v55  ;;  %v376_v60 = vmul.f32 %v374_v53, %v372_v56 }
 0x12b   : > { %v379_v63 = vadd.f32 %v377_v57, %v375_v59  ;;  %v380_v0 = vadd.f32 %v378_v58, %v376_v60 }
 0x12d   : > { %v381_v1 = vpack.c.bf16 %v379_v63, %v379_v63  ;;  %v382_v2 = vpack.c.bf16 %v380_v0, %v380_v0 }
 0x12f   : > { %778 = vmatmul.bf16.vlgmr.msra.gmra.mxu0 %v381_v1  ;;  %5893 = vmatmul.msk.bf16.vlgmr.msra.gmra.mxu1 %vm338_vm0, %v382_v2 }
 0x130   : > { %804 = vmatmul.bf16.vlgmr.msra.gmra.mxu2 %v381_v1  ;;  %5894 = vmatmul.msk.bf16.vlgmr.msra.gmra.mxu3 %vm338_vm0, %v382_v2 }
 0x131   : > { %874 = vmatpush.bf16.msra.mxu3 %v5812_v3  ;;  %891 = vmatpush.bf16.msra.mxu1 %v5892_v5 }
 0x135   : > { %875 = vmatpush.bf16.msra.mxu3 %v5792_v9  ;;  %892 = vmatpush.bf16.msra.mxu1 %v5872_v11 }
 0x139   : > { %876 = vmatpush.bf16.msra.mxu3 %v5772_v15  ;;  %893 = vmatpush.bf16.msra.mxu1 %v5852_v17 }
 0x13d   : > { %877 = vmatpush.bf16.msra.mxu3 %v5752_v21  ;;  %894 = vmatpush.bf16.msra.mxu1 %v5832_v22 }
 0x13f   : > { %830 = vmatmul.bf16.vlgmr.msrb.gmra.mxu1 %v381_v1  ;;  %856 = vmatmul.bf16.vlgmr.msrb.gmra.mxu0 %v381_v1 }
 0x140   : > { %5895 = vmatmul.msk.bf16.vlgmr.msrb.gmra.mxu3 %vm338_vm0, %v382_v2  ;;  %5896 = vmatmul.msk.bf16.vlgmr.msrb.gmra.mxu2 %vm338_vm0, %v382_v2 }
 0x141   : > { %878 = vmatpush.bf16.msra.mxu3 %v5732_v26 }
 0x145   : > { %879 = vmatpush.bf16.msra.mxu3 %v5712_v31 }
 0x149   : > { %880 = vmatpush.bf16.msra.mxu3 %v5692_v34 }
 0x14d   : > { %881 = vmatpush.bf16.msra.mxu3 %v5672_v37  ;;  %v324_v37 = vld [vmem:[%s12407_s1] sm:$0xff] }
 0x14f   : > { %5897 = vmatmul.msk.bf16.vlgmr.msra.gmra.mxu1 %vm338_vm0, %v382_v2 }
 0x150   : > { %882 = vmatmul.bf16.vlgmr.msra.gmra.mxu3 %v381_v1 }
 0x1ac   : > { %v779_v38 = vpop.f32.mrf.mxu0  ;;  %v792_v39 = vpop.f32.mrf.mxu1 }
 0x1ad   : > { %v793_v40 = vadd.f32 %v792_v39, %v779_v38 }
 0x1af   : > { %v900_v41 = vpack.c.bf16 %v793_v40, %v793_v40 }
 0x1b1   : > { %v964_v42 = vunpack.c.l.b16 %v900_v41 }
 0x1b3   : > { %v965_v43 = vpack.c.b16 %v964_v42, %v964_v42  ;;  %v805_v44 = vpop.f32.mrf.mxu2  ;;  %v818_v45 = vpop.f32.mrf.mxu3 }
 0x1b4   : > { %v819_v46 = vadd.f32 %v818_v45, %v805_v44  ;;  %v781_v47 = vpop.f32.mrf.mxu0  ;;  %v794_v50 = vpop.f32.mrf.mxu1 }
 0x1b5   : > { %1084 = vrot.lane.b32.xlu0 %v965_v43, %s12415_s20 }
 0x1b6   : > { %v9294_v51 = vpack.c.bf16 %v819_v46, %v819_v46 }
 0x1b8   : > { %v904_v52 = vunpack.c.l.b16 %v9294_v51 }
 0x1ba   : > { %v905_v53 = vpack.c.b16 %v904_v52, %v904_v52 }
 0x1bb   : > { %v807_v54 = vpop.f32.mrf.mxu2  ;;  %v820_v55 = vpop.f32.mrf.mxu3 }
 0x1bc   : > { %906 = vrot.lane.b32.xlu2 %v905_v53, %s12417_s21  ;;  %968 = vrot.lane.b32.xlu1 %v905_v53, %s12415_s20  ;;  %v831_v56 = vpop.f32.mrf.mxu1  ;;  %v857_v57 = vpop.f32.mrf.mxu0 }
 0x1c3   : > { %v844_v58 = vpop.f32.mrf.mxu3  ;;  %v870_v59 = vpop.f32.mrf.mxu2 }
 0x1c4   : > { %v845_v60 = vadd.f32 %v844_v58, %v831_v56  ;;  %v871_v61 = vadd.f32 %v870_v59, %v857_v57  ;;  %966 = vrot.lane.b32.xlu1 %v965_v43, %s8785_s22  ;;  %v833_v62 = vpop.f32.mrf.mxu1  ;;  %v859_v28 = vpop.f32.mrf.mxu0 }
 0x1c6   : > { %v1027_v29 = vpack.c.bf16 %v845_v60, %v845_v60  ;;  %v902_v63 = vpack.c.bf16 %v871_v61, %v871_v61 }
 0x1c8   : > { %v1034_v0 = vsel %vm908_vm5, %v1027_v29, 0  ;;  %v1087_v1 = vunpack.c.l.b16 %v1027_v29  ;;  %v946_v2 = vsel %vm944_vm6, %v902_v63, 0  ;;  %v1002_v11 = vunpack.c.l.b16 %v902_v63 }
 0x1c9   : > { %955 = vmatpush.bf16.msra.mxu0 %v946_v2  ;;  %1043 = vmatpush.bf16.xpose.msrb.mxu3 %v1034_v0 }
 0x1ca   : > { %v1088_v3 = vpack.c.b16 %v1087_v1, %v1087_v1  ;;  %v1003_v12 = vpack.c.b16 %v1002_v11, %v1002_v11 }
 0x1cb   : > { %v846_v4 = vpop.f32.mrf.mxu3  ;;  %v872_v5 = vpop.f32.mrf.mxu2 }
 0x1cc   : > { %1089 = vrot.lane.b32.xlu2 %v1088_v3, %s8785_s22  ;;  %1202 = vrot.lane.b32.xlu1 %v1088_v3, %s12415_s20  ;;  %v896_v6 = vpop.f32.mrf.mxu1 }
 0x1d3   : > { %v883_v7 = vpop.f32.mrf.mxu3 }
 0x1d4   : > { %v9304_v8 = vadd.f32 %v896_v6, %v883_v7  ;;  %1028 = vrot.lane.b32.xlu2 %v965_v43, %s12417_s21  ;;  %1200 = vrot.lane.b32.xlu1 %v905_v53, %s8785_s22  ;;  %v898_v9 = vpop.f32.mrf.mxu1 }
 0x1d6   : > { %v1145_v62 = vpack.c.bf16 %v9304_v8, %v9304_v8 }
 0x1d8   : > { %v1236_v28 = vunpack.c.l.b16 %v1145_v62 }
 0x1da   : > { %v1237_v29 = vpack.c.b16 %v1236_v28, %v1236_v28 }
 0x1db   : > { %v885_v10 = vpop.f32.mrf.mxu3 }
 0x1dc   : > { %1146 = vrot.lane.b32.xlu2 %v1088_v3, %s12417_s21 }
 0x1e4   : > { %1004 = vrot.lane.b32.xlu2 %v1003_v12, %s8785_s22 }
 0x216   : > { %v907_v13 = vpop.permute.xlu2 %906 }
 0x217   : > { %v913_v14 = vsel %vm908_vm5, %v907_v13, 0 }
 0x218   : > { %922 = vmatpush.bf16.xpose.msra.mxu2 %v913_v14 }
 0x21f   : > { %5898 = vmatmul.msk.bf16.vlgmr.msra.gmra.mxu2 %vm908_vm5, %v900_v41 }
 0x226   : > { %v1090_v15 = vpop.permute.xlu2 %1089 }
 0x227   : > { %v1095_v19 = vsel %vm908_vm5, %v1090_v15, 0  ;;  %v1085_v30 = vpop.permute.xlu0 %1084 }
 0x22e   : > { %v969_v16 = vpop.permute.xlu1 %968  ;;  %v1029_v17 = vpop.permute.xlu2 %1028 }
 0x22f   : > { %v974_v18 = vsel %vm908_vm5, %v969_v16, 0  ;;  %5902 = vmatmul.msk.bf16.vlgmr.msrb.gmra.mxu3 %vm908_vm5, %v1029_v17 }
 0x230   : > { %983 = vmatpush.bf16.xpose.msrb.mxu1 %v974_v18 }
 0x236   : > { %v1147_v20 = vpop.permute.xlu2 %1146  ;;  %v967_v21 = vpop.permute.xlu1 %966 }
 0x237   : > { %v1152_v22 = vsel %vm908_vm5, %v1147_v20, 0  ;;  %5900 = vmatmul.msk.bf16.vlgmr.msrb.gmra.mxu1 %vm908_vm5, %v967_v21 }
 0x238   : > { %1104 = vmatpush.bf16.xpose.msra.mxu1 %v1095_v19  ;;  %1161 = vmatpush.bf16.xpose.msra.mxu3 %v1152_v22 }
 0x23e   : > { %v1203_v23 = vpop.permute.xlu1 %1202  ;;  %v1005_v24 = vpop.permute.xlu2 %1004 }
 0x23f   : > { %v1208_v26 = vsel %vm908_vm5, %v1203_v23, 0  ;;  %v1010_v27 = vsel %vm944_vm6, %v1005_v24, 0  ;;  %5906 = vmatmul.msk.bf16.vlgmr.msra.gmra.mxu3 %vm908_vm5, %v9294_v51  ;;  %v1183_v23 = vsel %vm944_vm6, %v1145_v62, 0 }
 0x240   : > { %1019 = vmatpush.bf16.msrb.mxu2 %v1010_v27  ;;  %1217 = vmatpush.bf16.xpose.msrb.mxu1 %v1208_v26 }
 0x246   : > { %v1201_v31 = vpop.permute.xlu1 %1200 }
 0x247   : > { %5904 = vmatmul.msk.bf16.vlgmr.msra.gmra.mxu1 %vm908_vm5, %v1085_v30 }
 0x257   : > { %5908 = vmatmul.msk.bf16.vlgmr.msrb.gmra.mxu1 %vm908_vm5, %v1201_v31 }
 0x2a2   : > { %v924_v32 = vpop.f32.mrf.mxu2 }
 0x2a3   : > { %v928_v40 = vmul.f32 0.07216878, %v924_v32 }
 0x2a5   : > { %v929_v45 = vadd.f32 %v928_v40, %v324_v37 }
 0x2a7   : > { %v931_v47 = vsel %vm930_vm7, %v929_v45, -inf }
 0x2aa   : > { %v926_v33 = vpop.f32.mrf.mxu2 }
 0x2b2   : > { %v1045_v34 = vpop.f32.mrf.mxu3 }
 0x2b3   : > { %v1049_v35 = vmul.f32 0.07216878, %v1045_v34 }
 0x2b4   : > { %v985_v36 = vpop.f32.mrf.mxu1 }
 0x2b5   : > { %v989_v38 = vmul.f32 0.07216878, %v985_v36  ;;  %v1050_v39 = vadd.f32 %v1049_v35, %v324_v37 }
 0x2b7   : > { %v1051_v41 = vsel %vm930_vm7, %v1050_v39, -inf  ;;  %v990_v42 = vadd.f32 %v989_v38, %v324_v37 }
 0x2b8   : > { %1052 = vmax.xlane.f32.xlu2 %v1051_v41 }
 0x2b9   : > { %v991_v43 = vsel %vm930_vm7, %v990_v42, -inf }
 0x2ba   : > { %v1047_v44 = vpop.f32.mrf.mxu3  ;;  %992 = vmax.xlane.f32.xlu1 %v991_v43 }
 0x2bc   : > { %v987_v46 = vpop.f32.mrf.mxu1 }
 0x2c0   : > { %932 = vmax.xlane.f32.xlu2 %v931_v47 }
 0x2c2   : > { %v1163_v50 = vpop.f32.mrf.mxu3 }
 0x2c3   : > { %v1167_v63 = vmul.f32 0.07216878, %v1163_v50 }
 0x2c4   : > { %v1106_v51 = vpop.f32.mrf.mxu1 }
 0x2c5   : > { %v1110_v52 = vmul.f32 0.07216878, %v1106_v51  ;;  %v1168_v0 = vadd.f32 %v1167_v63, %v324_v37 }
 0x2c7   : > { %v1111_v53 = vadd.f32 %v1110_v52, %v324_v37  ;;  %v1169_v1 = vsel %vm930_vm7, %v1168_v0, -inf }
 0x2c9   : > { %v1112_v54 = vsel %vm930_vm7, %v1111_v53, -inf }
 0x2ca   : > { %v1165_v55 = vpop.f32.mrf.mxu3  ;;  %1113 = vmax.xlane.f32.xlu0 %v1112_v54 }
 0x2cc   : > { %v1108_v56 = vpop.f32.mrf.mxu1 }
 0x2d3   : > { %1122 = vrot.lane.b32.xlu1 %v1003_v12, %s12415_s20 }
 0x2d4   : > { %v1219_v57 = vpop.f32.mrf.mxu1 }
 0x2d5   : > { %v1223_v58 = vmul.f32 0.07216878, %v1219_v57 }
 0x2d7   : > { %v1224_v59 = vadd.f32 %v1223_v58, %v324_v37 }
 0x2d8   : > { %1061 = vrot.lane.b32.xlu2 %v1003_v12, %s12417_s21 }
 0x2d9   : > { %v1225_v60 = vsel %vm930_vm7, %v1224_v59, -inf }
 0x2da   : > { %1226 = vmax.xlane.f32.xlu0 %v1225_v60 }
 0x2dc   : > { %v1221_v61 = vpop.f32.mrf.mxu1 }
 0x2ee   : > { %1238 = vrot.lane.b32.xlu0 %v1237_v29, %s8785_s22 }
 0x2fd   : > { %1170 = vmax.xlane.f32.xlu1 %v1169_v1 }
 0x32b   : > { %v1053_v2 = vpop.xlane.xlu2 %1052 }
 0x32c   : > { %v1054_v3 = vsub.f32 %v1050_v39, %v1053_v2  ;;  %v5968_v2 = vld [vmem:[%s12409_s3 + $0x70] sm:$0xf] }
 0x32d   : > { %v993_v4 = vpop.xlane.xlu1 %992 }
 0x32e   : > { %v1055_v5 = vmul.f32 1.442695, %v1054_v3  ;;  %v994_v6 = vsub.f32 %v990_v42, %v993_v4  ;;  %v8112_v3 = vld [vmem:[%s12409_s3 + $0x74] sm:$0xf0]  ;;  %v8111_v4 = vld [vmem:[%s12409_s3 + $0x74] sm:$0xf] }
 0x330   : > { %8614 = vpow2.f32 %v1055_v5  ;;  %v995_v7 = vmul.f32 1.442695, %v994_v6  ;;  %v5969_v5 = vor.u32 %v8112_v3, %v5968_v2  ;;  %v5970_v6 = vld [vmem:[%s12409_s3 + $0x78] sm:$0xf0]  ;;  %v8118_v2 = vld [vmem:[%s12409_s3 + $0xa4] sm:$0xf0] }
 0x332   : > { %8616 = vpow2.f32 %v995_v7  ;;  %v5973_v7 = vor.u32 %v8111_v4, %v5970_v6  ;;  %1433 = vmatpush.bf16.msrb.mxu3 %v5969_v5  ;;  %v8117_v4 = vld [vmem:[%s12409_s3 + $0xa4] sm:$0xf]  ;;  %v5994_v5 = vld [vmem:[%s12409_s3 + $0xa8] sm:$0xf0] }
 0x333   : > { %v933_v9 = vpop.xlane.xlu2 %932 }
 0x334   : > { %v934_v10 = vsub.f32 %v929_v45, %v933_v9  ;;  %1459 = vmatpush.bf16.msra.mxu1 %v5973_v7  ;;  %v5997_v7 = vor.u32 %v8117_v4, %v5994_v5  ;;  %v6130_v5 = vld [vmem:[%s12410_s4 + $0xf0] sm:$0xf] }
 0x336   : > { %v8615_v8 = vpop.eup %8614  ;;  %v935_v11 = vmul.f32 1.442695, %v934_v10 }
 0x337   : > { %v1057_v12 = vsel %vm930_vm7, %v8615_v8, 0.0  ;;  %v1060_v34 = vpack.c.bf16 %v8615_v8, %v8615_v8 }
 0x338   : > { %v8617_v13 = vpop.eup %8616  ;;  %8618 = vpow2.f32 %v935_v11  ;;  %1058 = vadd.xlane.f32.xlu2 %v1057_v12 }
 0x339   : > { %v1000_v14 = vpack.c.bf16 %v8617_v13, %v8617_v13  ;;  %v997_v15 = vsel %vm930_vm7, %v8617_v13, 0.0 }
 0x33a   : > { %998 = vadd.xlane.f32.xlu0 %v997_v15  ;;  %v8110_v15 = vld [vmem:[%s12409_s3 + $0x64] sm:$0xf0] }
 0x33b   : > { %5901 = vmatmul.msk.bf16.vlgmr.msrb.gmra.mxu2 %vm930_vm7, %v1000_v14  ;;  %v1062_v16 = vpop.permute.xlu2 %1061  ;;  %v5960_v14 = vld [vmem:[%s12409_s3 + $0x60] sm:$0xf] }
 0x33c   : > { %v1067_v17 = vsel %vm944_vm6, %v1062_v16, 0  ;;  %v8109_v16 = vld [vmem:[%s12409_s3 + $0x64] sm:$0xf] }
 0x33d   : > { %v1114_v18 = vpop.xlane.xlu0 %1113  ;;  %1076 = vmatpush.bf16.msrb.mxu0 %v1067_v17  ;;  %v5961_v17 = vor.u32 %v8110_v15, %v5960_v14 }
 0x33e   : > { %v8619_v19 = vpop.eup %8618  ;;  %v1115_v20 = vsub.f32 %v1111_v53, %v1114_v18  ;;  %v5962_v18 = vld [vmem:[%s12409_s3 + $0x68] sm:$0xf0] }
 0x33f   : > { %v940_v21 = vpack.c.bf16 %v8619_v19, %v8619_v19  ;;  %v937_v36 = vsel %vm930_vm7, %v8619_v19, 0.0  ;;  %v5952_v19 = vld [vmem:[%s12409_s3 + $0x50] sm:$0xf]  ;;  %1434 = vmatpush.bf16.msrb.mxu3 %v5961_v17  ;;  %v5976_v17 = vld [vmem:[%s12409_s3 + $0x80] sm:$0xf] }
 0x340   : > { %v1116_v22 = vmul.f32 1.442695, %v1115_v20  ;;  %v8108_v20 = vld [vmem:[%s12409_s3 + $0x54] sm:$0xf0] }
 0x341   : > { %5899 = vmatmul.msk.bf16.vlgmr.msra.gmra.mxu0 %vm930_vm7, %v940_v21  ;;  %v5965_v21 = vor.u32 %v8109_v16, %v5962_v18  ;;  %v8114_v18 = vld [vmem:[%s12409_s3 + $0x84] sm:$0xf0] }
 0x342   : > { %8620 = vpow2.f32 %v1116_v22  ;;  %1192 = vmatpush.bf16.msra.mxu0 %v1183_v23  ;;  %v8107_v22 = vld [vmem:[%s12409_s3 + $0x54] sm:$0xf]  ;;  %v5954_v23 = vld [vmem:[%s12409_s3 + $0x58] sm:$0xf0] }
 0x343   : > { %1460 = vmatpush.bf16.msra.mxu1 %v5965_v21  ;;  %v5978_v21 = vld [vmem:[%s12409_s3 + $0x88] sm:$0xf0] }
 0x345   : > { %v1123_v24 = vpop.permute.xlu1 %1122 }
 0x346   : > { %v1128_v26 = vsel %vm944_vm6, %v1123_v24, 0  ;;  %v5953_v24 = vor.u32 %v8108_v20, %v5952_v19  ;;  %v8113_v19 = vld [vmem:[%s12409_s3 + $0x84] sm:$0xf]  ;;  %v5977_v20 = vor.u32 %v8114_v18, %v5976_v17 }
 0x347   : > { %1137 = vmatpush.bf16.msra.mxu2 %v1128_v26  ;;  %v5957_v26 = vor.u32 %v8107_v22, %v5954_v23  ;;  %v5981_v23 = vor.u32 %v8113_v19, %v5978_v21  ;;  %v8148_v21 = vld [vmem:[%s12410_s4 + $0xd4] sm:$0xf0] }
 0x348   : > { %v8621_v27 = vpop.eup %8620  ;;  %1435 = vmatpush.bf16.msrb.mxu3 %v5953_v24 }
 0x349   : > { %v1121_v30 = vpack.c.bf16 %v8621_v27, %v8621_v27  ;;  %v1118_v31 = vsel %vm930_vm7, %v8621_v27, 0.0  ;;  %1461 = vmatpush.bf16.msra.mxu1 %v5957_v26  ;;  %v5944_v27 = vld [vmem:[%s12409_s3 + $0x40] sm:$0xf] }
 0x34a   : > { %1119 = vadd.xlane.f32.xlu1 %v1118_v31  ;;  %v8105_v31 = vld [vmem:[%s12409_s3 + $0x44] sm:$0xf] }
 0x34b   : > { %5905 = vmatmul.msk.bf16.vlgmr.msra.gmra.mxu2 %vm930_vm7, %v1121_v30  ;;  %v8106_v30 = vld [vmem:[%s12409_s3 + $0x44] sm:$0xf0] }
 0x34d   : > { %v1227_v32 = vpop.xlane.xlu0 %1226 }
 0x34e   : > { %v1228_v33 = vsub.f32 %v1224_v59, %v1227_v32  ;;  %v5945_v32 = vor.u32 %v8106_v30, %v5944_v27 }
 0x350   : > { %v1229_v35 = vmul.f32 1.442695, %v1228_v33  ;;  %v5946_v33 = vld [vmem:[%s12409_s3 + $0x48] sm:$0xf0]  ;;  %1436 = vmatpush.bf16.msrb.mxu3 %v5945_v32 }
 0x351   : > { %5903 = vmatmul.msk.bf16.vlgmr.msrb.gmra.mxu0 %vm930_vm7, %v1060_v34  ;;  %v5936_v34 = vld [vmem:[%s12409_s3 + $0x30] sm:$0xf] }
 0x352   : > { %8622 = vpow2.f32 %v1229_v35  ;;  %938 = vadd.xlane.f32.xlu1 %v937_v36  ;;  %v8104_v35 = vld [vmem:[%s12409_s3 + $0x34] sm:$0xf0]  ;;  %v5949_v36 = vor.u32 %v8105_v31, %v5946_v33 }
 0x354   : > { %1462 = vmatpush.bf16.msra.mxu1 %v5949_v36 }
 0x358   : > { %v8623_v37 = vpop.eup %8622 }
 0x359   : > { %v1231_v38 = vsel %vm930_vm7, %v8623_v37, 0.0  ;;  %v1234_v41 = vpack.c.bf16 %v8623_v37, %v8623_v37  ;;  %v8103_v37 = vld [vmem:[%s12409_s3 + $0x34] sm:$0xf] }
 0x35a   : > { %1232 = vadd.xlane.f32.xlu0 %v1231_v38  ;;  %v5938_v38 = vld [vmem:[%s12409_s3 + $0x38] sm:$0xf0] }
 0x360   : > { %v1239_v39 = vpop.permute.xlu0 %1238 }
 0x361   : > { %v1244_v40 = vsel %vm944_vm6, %v1239_v39, 0  ;;  %v5937_v39 = vor.u32 %v8104_v35, %v5936_v34 }
 0x362   : > { %1253 = vmatpush.bf16.msrb.mxu2 %v1244_v40  ;;  %v5941_v40 = vor.u32 %v8103_v37, %v5938_v38 }
 0x363   : > { %1437 = vmatpush.bf16.msrb.mxu3 %v5937_v39 }
 0x364   : > { %1463 = vmatpush.bf16.msra.mxu1 %v5941_v40 }
 0x365   : > { %5909 = vmatmul.msk.bf16.vlgmr.msrb.gmra.mxu2 %vm930_vm7, %v1234_v41  ;;  %v5928_v41 = vld [vmem:[%s12409_s3 + $0x20] sm:$0xf] }
 0x370   : > { %v1171_v42 = vpop.xlane.xlu1 %1170 }
 0x371   : > { %v1172_v43 = vsub.f32 %v1168_v0, %v1171_v42  ;;  %v8102_v42 = vld [vmem:[%s12409_s3 + $0x24] sm:$0xf0] }
 0x373   : > { %v1173_v44 = vmul.f32 1.442695, %v1172_v43  ;;  %v8101_v43 = vld [vmem:[%s12409_s3 + $0x24] sm:$0xf] }
 0x375   : > { %8624 = vpow2.f32 %v1173_v44  ;;  %v5930_v44 = vld [vmem:[%s12409_s3 + $0x28] sm:$0xf0] }
 0x37b   : > { %v8625_v45 = vpop.eup %8624 }
 0x37c   : > { %v1178_v46 = vpack.c.bf16 %v8625_v45, %v8625_v45  ;;  %v1175_v47 = vsel %vm930_vm7, %v8625_v45, 0.0  ;;  %v5929_v45 = vor.u32 %v8102_v42, %v5928_v41 }
 0x37d   : > { %1176 = vadd.xlane.f32.xlu2 %v1175_v47  ;;  %v5920_v47 = vld [vmem:[%s12409_s3 + $0x10] sm:$0xf] }
 0x37e   : > { %5907 = vmatmul.msk.bf16.vlgmr.msra.gmra.mxu0 %vm930_vm7, %v1178_v46  ;;  %v5933_v46 = vor.u32 %v8101_v43, %v5930_v44  ;;  %1438 = vmatpush.bf16.msrb.mxu3 %v5929_v45  ;;  %v1308_v43 = vperm.slane %v9203_v48, 2  ;;  %v1309_v45 = vperm.slane %v9208_v49, 2  ;;  %v6178_v49 = vld [vmem:[%s12410_s4 + $0x150] sm:$0xf] }
 0x380   : > { %1464 = vmatpush.bf16.msra.mxu1 %v5933_v46 }
 0x3ab   : > { %v1059_v55 = vpop.xlane.xlu2 %1058 }
 0x3ad   : > { %v999_v50 = vpop.xlane.xlu0 %998 }
 0x3ae   : > { %8626 = vrcp.f32 %v999_v50  ;;  %v8100_v50 = vld [vmem:[%s12409_s3 + $0x14] sm:$0xf0] }
 0x3af   : > { %8628 = vrcp.f32 %v1059_v55 }
 0x3b4   : > { %v8627_v51 = vpop.eup %8626 }
 0x3b5   : > { %v8629_v59 = vpop.eup %8628 }
 0x3bd   : > { %v1120_v56 = vpop.xlane.xlu1 %1119 }
 0x3be   : > { %v9353_v52 = vpop.f32.mrf.mxu0  ;;  %v1021_v53 = vpop.f32.mrf.mxu2  ;;  %8630 = vrcp.f32 %v1120_v56  ;;  %v5912_v56 = vld [vmem:[%s12409_s3] sm:$0xf] }
 0x3bf   : > { %v1026_v54 = vmul.f32 %v8627_v51, %v1021_v53  ;;  %v8099_v51 = vld [vmem:[%s12409_s3 + $0x14] sm:$0xf]  ;;  %v5922_v53 = vld [vmem:[%s12409_s3 + $0x18] sm:$0xf0] }
 0x3c0   : > { %v5925_v55 = vor.u32 %v8099_v51, %v5922_v53 }
 0x3c1   : > { %1262 = vrot.lane.b32.xlu0 %v1026_v54, %s12415_s20  ;;  %v5921_v54 = vor.u32 %v8100_v50, %v5920_v47 }
 0x3c2   : > { %1465 = vmatpush.bf16.msra.mxu1 %v5925_v55 }
 0x3c3   : > { %1439 = vmatpush.bf16.msrb.mxu3 %v5921_v54  ;;  %v8670_v54 = vld [vmem:[%s8894_s12 + $0x8] sm:$0xff] }
 0x3c4   : > { %v8631_v60 = vpop.eup %8630 }
 0x3c5   : > { %v939_v15 = vpop.xlane.xlu1 %938 }
 0x3c6   : > { %v959_v57 = vpop.f32.mrf.mxu0  ;;  %v1023_v58 = vpop.f32.mrf.mxu2 }
 0x3c7   : > { %v8098_v57 = vld [vmem:[%s12409_s3 + $0x4] sm:$0xf0]  ;;  %v8097_v58 = vld [vmem:[%s12409_s3 + $0x4] sm:$0xf] }
 0x3cd   : > { %v1233_v1 = vpop.xlane.xlu0 %1232 }
 0x3ce   : > { %v1078_v61 = vpop.f32.mrf.mxu0  ;;  %v1139_v62 = vpop.f32.mrf.mxu2  ;;  %8632 = vrcp.f32 %v1233_v1  ;;  %v5992_v1 = vld [vmem:[%s12409_s3 + $0xa0] sm:$0xf] }
 0x3cf   : > { %v1083_v28 = vmul.f32 %v8629_v59, %v1078_v61  ;;  %v1144_v29 = vmul.f32 %v8631_v60, %v1139_v62  ;;  %v5913_v59 = vor.u32 %v8098_v57, %v5912_v56  ;;  %v5914_v60 = vld [vmem:[%s12409_s3 + $0x8] sm:$0xf0]  ;;  %v6000_v62 = vld [vmem:[%s12409_s3 + $0xb0] sm:$0xf]  ;;  %v5993_v6 = vor.u32 %v8118_v2, %v5992_v1  ;;  %v8671_v56 = vld [vmem:[%s8894_s12] sm:$0xff] }
 0x3d0   : > { %v5917_v61 = vor.u32 %v8097_v58, %v5914_v60  ;;  %8634 = vrcp.f32 %v939_v15  ;;  %v8166_v60 = vld [vmem:[%s12410_s4 + $0x164] sm:$0xf0]  ;;  %v8157_v1 = vld [vmem:[%s12410_s4 + $0x124] sm:$0xf]  ;;  %v6156_v2 = vld [vmem:[%s12410_s4 + $0x138] sm:$0xf0] }
 0x3d1   : > { %1270 = vrot.lane.b32.xlu2 %v1144_v29, %s8785_s22  ;;  %1266 = vrot.lane.b32.xlu1 %v1083_v28, %s12417_s21  ;;  %v8120_v28 = vld [vmem:[%s12409_s3 + $0xb4] sm:$0xf0]  ;;  %v8119_v29 = vld [vmem:[%s12409_s3 + $0xb4] sm:$0xf]  ;;  %v6159_v4 = vor.u32 %v8157_v1, %v6156_v2  ;;  %s12421_s21 = smov 64  }
 0x3d2   : > { %1440 = vmatpush.bf16.msrb.mxu3 %v5913_v59  ;;  %1466 = vmatpush.bf16.msra.mxu1 %v5917_v61  ;;  %v8163_v61 = vld [vmem:[%s12410_s4 + $0x154] sm:$0xf] }
 0x3d4   : > { %v8633_v9 = vpop.eup %8632 }
 0x3d6   : > { %v1080_v63 = vpop.f32.mrf.mxu0  ;;  %v1141_v0 = vpop.f32.mrf.mxu2 }
 0x3d7   : > { %v6001_v63 = vor.u32 %v8120_v28, %v6000_v62  ;;  %v6002_v0 = vld [vmem:[%s12409_s3 + $0xb8] sm:$0xf0]  ;;  %v8635_v22 = vpop.eup %8634  ;;  %v6179_v62 = vor.u32 %v8166_v60, %v6178_v49  ;;  %v6180_v28 = vld [vmem:[%s12410_s4 + $0x168] sm:$0xf0]  ;;  %v6034_v60 = vld [vmem:[%s12410_s4 + $0x30] sm:$0xf] }
 0x3d8   : > { %v6005_v3 = vor.u32 %v8119_v29, %v6002_v0  ;;  %v962_v26 = vmul.f32 %v8635_v22, %v9353_v52  ;;  %v6154_v29 = vld [vmem:[%s12410_s4 + $0x120] sm:$0xf]  ;;  %v6183_v0 = vor.u32 %v8163_v61, %v6180_v28  ;;  %v8145_v22 = vld [vmem:[%s12410_s4 + $0xc4] sm:$0xf]  ;;  %v8130_v61 = vld [vmem:[%s12410_s4 + $0x44] sm:$0xf0] }
 0x3d9   : > { %1450 = vmatpush.bf16.msrb.mxu0 %v6001_v63  ;;  %v8160_v63 = vld [vmem:[%s12410_s4 + $0x134] sm:$0xf0]  ;;  %v6035_v28 = vor.u32 %v8130_v61, %v6034_v60  ;;  %v6210_v61 = vld [vmem:[%s12410_s4 + $0x188] sm:$0xf] }
 0x3da   : > { %1476 = vmatpush.bf16.msra.mxu2 %v6005_v3  ;;  %v6155_v3 = vor.u32 %v8160_v63, %v6154_v29  ;;  %1991 = vmatpush.bf16.msra.mxu3 %v6183_v0  ;;  %v6036_v29 = vld [vmem:[%s12410_s4 + $0x48] sm:$0xf0]  ;;  %v6202_v63 = vld [vmem:[%s12410_s4 + $0x180] sm:$0xf]  ;;  %v8172_v0 = vld [vmem:[%s12410_s4 + $0x194] sm:$0xf0] }
 0x3db   : > { %v6203_v2 = vor.u32 %v8172_v0, %v6202_v63  ;;  %v6212_v63 = vld [vmem:[%s12410_s4 + $0x1a0] sm:$0xf0]  ;;  %v6090_v0 = vld [vmem:[%s12410_s4 + $0x98] sm:$0xf] }
 0x3dd   : > { %1451 = vmatpush.bf16.msrb.mxu0 %v5993_v6  ;;  %v8154_v6 = vld [vmem:[%s12410_s4 + $0x104] sm:$0xf0] }
 0x3de   : > { %1477 = vmatpush.bf16.msra.mxu2 %v5997_v7  ;;  %v8151_v7 = vld [vmem:[%s12410_s4 + $0xf4] sm:$0xf]  ;;  %1992 = vmatpush.bf16.msra.mxu3 %v6159_v4  ;;  %v6204_v4 = vld [vmem:[%s12410_s4 + $0x198] sm:$0xf0] }
 0x3e8   : > { %v1255_v10 = vpop.f32.mrf.mxu2 }
 0x3e9   : > { %v1260_v8 = vmul.f32 %v8633_v9, %v1255_v10  ;;  %v5984_v9 = vld [vmem:[%s12409_s3 + $0x90] sm:$0xf]  ;;  %v8116_v10 = vld [vmem:[%s12409_s3 + $0x94] sm:$0xf0] }
 0x3eb   : > { %1274 = vrot.lane.b32.xlu0 %v1260_v8, %s12415_s20  ;;  %v8115_v8 = vld [vmem:[%s12409_s3 + $0x94] sm:$0xf]  ;;  %s315_s20 = scalar_lea.vmem [#allocation5], %s5650_s23  ;;  %s8731_s23 = scalar_lea.hbm %s12414_s8, 8 }
 0x3ec   : > { %s5570_s12 = sshll.u32 %s315_s20, 4  ;;  %s5571_s12 = int_to_ptr.vmem [resolvable:$true] %s5570_s12 }
 0x3f0   : > { %v1257_v11 = vpop.f32.mrf.mxu2  ;;  %v1177_v16 = vpop.xlane.xlu2 %1176 }
 0x3f1   : > { %v5986_v11 = vld [vmem:[%s12409_s3 + $0x98] sm:$0xf0]  ;;  %8636 = vrcp.f32 %v1177_v16 }
 0x3f2   : > { %v5989_v14 = vor.u32 %v8115_v8, %v5986_v11 }
 0x3f4   : > { %1478 = vmatpush.bf16.msra.mxu2 %v5989_v14 }
 0x3f7   : > { %v8637_v35 = vpop.eup %8636 }
 0x3f8   : > { %1479 = vmatpush.bf16.msra.mxu2 %v5981_v23 }
 0x3fb   : > { %v9371_v12 = vpop.f32.mrf.mxu0 }
 0x3fc   : > { %v1199_v36 = vmul.f32 %v8637_v35, %v9371_v12  ;;  %v6082_v35 = vld [vmem:[%s12410_s4 + $0x90] sm:$0xf] }
 0x403   : > { %v1196_v13 = vpop.f32.mrf.mxu0 }
 0x404   : > { %v5985_v13 = vor.u32 %v8116_v10, %v5984_v9  ;;  %v6132_v9 = vld [vmem:[%s12410_s4 + $0x108] sm:$0xf0]  ;;  %v6131_v10 = vor.u32 %v8154_v6, %v6130_v5  ;;  %v6186_v5 = vld [vmem:[%s12410_s4 + $0x158] sm:$0xf] }
 0x405   : > { %v6135_v8 = vor.u32 %v8151_v7, %v6132_v9  ;;  %v8167_v7 = vld [vmem:[%s12410_s4 + $0x16c] sm:$0xf0]  ;;  %v8164_v9 = vld [vmem:[%s12410_s4 + $0x15c] sm:$0xf] }
 0x406   : > { %1452 = vmatpush.bf16.msrb.mxu0 %v5985_v13 }
 0x407   : > { %1993 = vmatpush.bf16.msra.mxu3 %v6135_v8  ;;  %v6187_v8 = vor.u32 %v8167_v7, %v6186_v5  ;;  %v6092_v5 = vld [vmem:[%s12410_s4 + $0xb0] sm:$0xf0] }
 0x40a   : > { %1453 = vmatpush.bf16.msrb.mxu0 %v5977_v20  ;;  %v6106_v20 = vld [vmem:[%s12410_s4 + $0xc0] sm:$0xf] }
 0x40b   : > { %v6107_v23 = vor.u32 %v8148_v21, %v6106_v20  ;;  %v6282_v20 = vld [vmem:[%s12410_s4 + $0x218] sm:$0xf]  ;;  %v8191_v21 = vld [vmem:[%s12410_s4 + $0x22c] sm:$0xf0] }
 0x40e   : > { %1965 = vmatpush.bf16.msra.mxu0 %v6179_v62  ;;  %v8127_v62 = vld [vmem:[%s12410_s4 + $0x34] sm:$0xf] }
 0x40f   : > { %v6039_v1 = vor.u32 %v8127_v62, %v6036_v29  ;;  %v8173_v62 = vld [vmem:[%s12410_s4 + $0x19c] sm:$0xf0] }
 0x410   : > { %v6211_v29 = vor.u32 %v8173_v62, %v6210_v61 }
 0x412   : > { %1966 = vmatpush.bf16.msra.mxu0 %v6155_v3  ;;  %v8169_v3 = vld [vmem:[%s12410_s4 + $0x184] sm:$0xf] }
 0x413   : > { %v6207_v6 = vor.u32 %v8169_v3, %v6204_v4  ;;  %v8140_v4 = vld [vmem:[%s12410_s4 + $0x9c] sm:$0xf] }
 0x414   : > { %v6095_v7 = vor.u32 %v8140_v4, %v6092_v5  ;;  %v6266_v4 = vld [vmem:[%s12410_s4 + $0x1f0] sm:$0xf]  ;;  %v8186_v5 = vld [vmem:[%s12410_s4 + $0x204] sm:$0xf0] }
 0x416   : > { %1967 = vmatpush.bf16.msra.mxu0 %v6131_v10  ;;  %v6188_v10 = vld [vmem:[%s12410_s4 + $0x170] sm:$0xf0] }
 0x41a   : > { %1968 = vmatpush.bf16.msra.mxu0 %v6107_v23  ;;  %v6283_v23 = vor.u32 %v8191_v21, %v6282_v20  ;;  %v8131_v20 = vld [vmem:[%s12410_s4 + $0x4c] sm:$0xf0]  ;;  %v8128_v21 = vld [vmem:[%s12410_s4 + $0x3c] sm:$0xf] }
 0x42b   : > { %v1271_v31 = vpop.permute.xlu2 %1270 }
 0x433   : > { %v1263_v24 = vpop.permute.xlu0 %1262 }
 0x434   : > { %v1277_v27 = vsel %vm908_vm5, %v962_v26, %v1263_v24  ;;  %v6108_v24 = vld [vmem:[%s12410_s4 + $0xd8] sm:$0xf0]  ;;  %v6274_v26 = vld [vmem:[%s12410_s4 + $0x210] sm:$0xf] }
 0x443   : > { %v1267_v30 = vpop.permute.xlu1 %1266 }
 0x444   : > { %v1278_v32 = vsel %vm338_vm0, %v1277_v27, %v1267_v30  ;;  %v8190_v27 = vld [vmem:[%s12410_s4 + $0x224] sm:$0xf0]  ;;  %v6111_v30 = vor.u32 %v8145_v22, %v6108_v24  ;;  %v8188_v24 = vld [vmem:[%s12410_s4 + $0x21c] sm:$0xf] }
 0x445   : > { %v1280_v33 = vsel %vm1279_vm8, %v1278_v32, %v1271_v31  ;;  %v6275_v31 = vor.u32 %v8190_v27, %v6274_v26  ;;  %v8187_v32 = vld [vmem:[%s12410_s4 + $0x214] sm:$0xf]  ;;  %v6162_v27 = vld [vmem:[%s12410_s4 + $0x128] sm:$0xf] }
 0x446   : > { %v1282_v34 = vpack.c.bf16 %v1280_v33, %v1280_v33  ;;  %v6276_v33 = vld [vmem:[%s12410_s4 + $0x228] sm:$0xf0]  ;;  %1994 = vmatpush.bf16.msra.mxu3 %v6111_v30  ;;  %v6284_v26 = vld [vmem:[%s12410_s4 + $0x230] sm:$0xf0] }
 0x447   : > { %1982 = vmatpush.bf16.msrb.mxu2 %v6275_v31  ;;  %v6287_v30 = vor.u32 %v8188_v24, %v6284_v26  ;;  %v8161_v31 = vld [vmem:[%s12410_s4 + $0x13c] sm:$0xf0]  ;;  %v6018_v26 = vld [vmem:[%s12410_s4 + $0x8] sm:$0xf] }
 0x448   : > { %1441 = vmatmul.bf16.vlgmr.msrb.gmra.mxu3 %v1282_v34  ;;  %1467 = vmatmul.bf16.vlgmr.msra.gmra.mxu1 %v1282_v34  ;;  %v6279_v34 = vor.u32 %v8187_v32, %v6276_v33  ;;  %v8158_v32 = vld [vmem:[%s12410_s4 + $0x12c] sm:$0xf]  ;;  %v6164_v33 = vld [vmem:[%s12410_s4 + $0x140] sm:$0xf0] }
 0x44a   : > { %2008 = vmatpush.bf16.msrb.mxu1 %v6279_v34  ;;  %v6163_v34 = vor.u32 %v8161_v31, %v6162_v27  ;;  %v8125_v27 = vld [vmem:[%s12410_s4 + $0x1c] sm:$0xf0] }
 0x44b   : > { %v6019_v31 = vor.u32 %v8125_v27, %v6018_v26  ;;  %v6122_v26 = vld [vmem:[%s12410_s4 + $0xd0] sm:$0xf]  ;;  %v8150_v27 = vld [vmem:[%s12410_s4 + $0xe4] sm:$0xf0] }
 0x45d   : > { %v1275_v37 = vpop.permute.xlu0 %1274 }
 0x45e   : > { %v1281_v38 = vsel %vm908_vm5, %v1199_v36, %v1275_v37  ;;  %v8142_v36 = vld [vmem:[%s12410_s4 + $0xa4] sm:$0xf0]  ;;  %v8139_v37 = vld [vmem:[%s12410_s4 + $0x94] sm:$0xf] }
 0x45f   : > { %v1283_v52 = vpack.c.bf16 %v1281_v38, %v1281_v38  ;;  %v6083_v38 = vor.u32 %v8142_v36, %v6082_v35  ;;  %v6167_v35 = vor.u32 %v8158_v32, %v6164_v33  ;;  %v6258_v36 = vld [vmem:[%s12410_s4 + $0x1e8] sm:$0xf]  ;;  %v6020_v32 = vld [vmem:[%s12410_s4 + $0x20] sm:$0xf0] }
 0x461   : > { %6006 = vmatmul.msk.bf16.vlgmr.msrb.gmra.mxu0 %vm338_vm0, %v1283_v52  ;;  %6007 = vmatmul.msk.bf16.vlgmr.msra.gmra.mxu2 %vm338_vm0, %v1283_v52  ;;  %v6084_v52 = vld [vmem:[%s12410_s4 + $0xa8] sm:$0xf0] }
 0x462   : > { %1969 = vmatpush.bf16.msra.mxu0 %v6083_v38  ;;  %v8182_v38 = vld [vmem:[%s12410_s4 + $0x1ec] sm:$0xf] }
 0x4c5   : > { %v1468_v39 = vpop.f32.mrf.mxu1 }
 0x4c6   : > { %v1469_v46 = vadd.f32 %v1468_v39, %v1309_v45  ;;  %v6250_v39 = vld [vmem:[%s12410_s4 + $0x1e0] sm:$0xf] }
 0x4cb   : > { %v1442_v40 = vpop.f32.mrf.mxu3 }
 0x4cc   : > { %v1443_v12 = vadd.f32 %v1442_v40, %v1308_v43  ;;  %v8184_v40 = vld [vmem:[%s12410_s4 + $0x1f4] sm:$0xf0]  ;;  %v8181_v43 = vld [vmem:[%s12410_s4 + $0x1e4] sm:$0xf] }
 0x4cd   : > { %v1470_v41 = vpop.f32.mrf.mxu1 }
 0x4ce   : > { %v6087_v41 = vor.u32 %v8139_v37, %v6084_v52  ;;  %v8185_v37 = vld [vmem:[%s12410_s4 + $0x1fc] sm:$0xf0] }
 0x4cf   : > { %v6259_v52 = vor.u32 %v8185_v37, %v6258_v36 }
 0x4d0   : > { %1995 = vmatpush.bf16.msra.mxu3 %v6087_v41  ;;  %v8155_v41 = vld [vmem:[%s12410_s4 + $0x10c] sm:$0xf0] }
 0x4d3   : > { %v1444_v42 = vpop.f32.mrf.mxu3 }
 0x4d4   : > { %v6251_v42 = vor.u32 %v8184_v40, %v6250_v39  ;;  %v6260_v39 = vld [vmem:[%s12410_s4 + $0x200] sm:$0xf0]  ;;  %v6138_v40 = vld [vmem:[%s12410_s4 + $0xf8] sm:$0xf] }
 0x4d6   : > { %1983 = vmatpush.bf16.msrb.mxu2 %v6251_v42  ;;  %v6263_v42 = vor.u32 %v8182_v38, %v6260_v39  ;;  %v9828_v39 = vld [vmem:[%s12413_s7] sm:$0xff] }
 0x4de   : > { %v1455_v44 = vpop.f32.mrf.mxu0 }
 0x4df   : > { %v1456_v47 = vadd.f32 %v1455_v44, %v1443_v12  ;;  %v6252_v44 = vld [vmem:[%s12410_s4 + $0x1f8] sm:$0xf0]  ;;  %v6058_v12 = vld [vmem:[%s12410_s4 + $0x60] sm:$0xf] }
 0x4e0   : > { %v6255_v45 = vor.u32 %v8181_v43, %v6252_v44  ;;  %v6139_v43 = vor.u32 %v8155_v41, %v6138_v40  ;;  %v8152_v44 = vld [vmem:[%s12410_s4 + $0xfc] sm:$0xf]  ;;  %v1514_v40 = vperm.slane %v9828_v39, 3  ;;  %v9834_v41 = vld [vmem:[%s12413_s7 + $0x8] sm:$0xff] }
 0x4e1   : > { %v9519_v57 = vadd.f32 %v8671_v56, %v1456_v47  ;;  %v8133_v47 = vld [vmem:[%s12410_s4 + $0x64] sm:$0xf] }
 0x4e2   : > { %2009 = vmatpush.bf16.msrb.mxu1 %v6255_v45  ;;  %v6140_v45 = vld [vmem:[%s12410_s4 + $0x110] sm:$0xf0] }
 0x4e4   : > { %v1481_v50 = vpop.f32.mrf.mxu2 }
 0x4e5   : > { %v1482_v51 = vadd.f32 %v1481_v50, %v1469_v46  ;;  %v8136_v46 = vld [vmem:[%s12410_s4 + $0x74] sm:$0xf0] }
 0x4e6   : > { %v1457_v53 = vpop.f32.mrf.mxu0  ;;  %v6059_v50 = vor.u32 %v8136_v46, %v6058_v12  ;;  %v6143_v12 = vor.u32 %v8152_v44, %v6140_v45  ;;  %v6234_v46 = vld [vmem:[%s12410_s4 + $0x1b8] sm:$0xf]  ;;  %v1518_v44 = vperm.slane %v9828_v39, 4  ;;  %v1519_v45 = vperm.slane %v9834_v41, 4 }
 0x4e7   : > { %v9516_v55 = vadd.f32 %v8670_v54, %v1482_v51  ;;  %v6060_v51 = vld [vmem:[%s12410_s4 + $0x78] sm:$0xf0]  ;;  %v6226_v53 = vld [vmem:[%s12410_s4 + $0x1b0] sm:$0xf]  ;;  %v8178_v54 = vld [vmem:[%s12410_s4 + $0x1c4] sm:$0xf0] }
 0x4e8   : > { %v6063_v56 = vor.u32 %v8133_v47, %v6060_v51  ;;  %1970 = vmatpush.bf16.msra.mxu0 %v6059_v50  ;;  %v8179_v47 = vld [vmem:[%s12410_s4 + $0x1cc] sm:$0xf0]  ;;  %v8176_v50 = vld [vmem:[%s12410_s4 + $0x1bc] sm:$0xf] }
 0x4e9   : > { %v1487_v58 = vsel %vm338_vm0, %v9516_v55, 0.0  ;;  %v6235_v51 = vor.u32 %v8179_v47, %v6234_v46 }
 0x4ea   : > { %v1488_v48 = vadd.f32 %v1487_v58, %v9519_v57  ;;  %v6227_v58 = vor.u32 %v8178_v54, %v6226_v53  ;;  %1996 = vmatpush.bf16.msra.mxu3 %v6063_v56  ;;  %v6236_v53 = vld [vmem:[%s12410_s4 + $0x1d0] sm:$0xf0]  ;;  %v6114_v54 = vld [vmem:[%s12410_s4 + $0xc8] sm:$0xf]  ;;  %v8149_v56 = vld [vmem:[%s12410_s4 + $0xdc] sm:$0xf0] }
 0x4ec   : > { %v1483_v59 = vpop.f32.mrf.mxu2  ;;  %1489 = vadd.xlane.f32.xlu1 %v1488_v48  ;;  %v8175_v48 = vld [vmem:[%s12410_s4 + $0x1b4] sm:$0xf]  ;;  %1984 = vmatpush.bf16.msrb.mxu2 %v6227_v58  ;;  %v6239_v58 = vor.u32 %v8176_v50, %v6236_v53  ;;  %v8168_v53 = vld [vmem:[%s12410_s4 + $0x174] sm:$0xf0] }
 0x4ed   : > { %v6228_v59 = vld [vmem:[%s12410_s4 + $0x1c8] sm:$0xf0]  ;;  %1971 = vmatpush.bf16.msra.mxu0 %v6035_v28 }
 0x4ee   : > { %v6231_v49 = vor.u32 %v8175_v48, %v6228_v59  ;;  %1997 = vmatpush.bf16.msra.mxu3 %v6039_v1  ;;  %v6115_v48 = vor.u32 %v8149_v56, %v6114_v54  ;;  %v8146_v59 = vld [vmem:[%s12410_s4 + $0xcc] sm:$0xf]  ;;  %v8143_v1 = vld [vmem:[%s12410_s4 + $0xac] sm:$0xf0]  ;;  %v8165_v54 = vld [vmem:[%s12410_s4 + $0x164] sm:$0xf] }
 0x4ef   : > { %v8170_v28 = vld [vmem:[%s12410_s4 + $0x18c] sm:$0xf]  ;;  %v6091_v3 = vor.u32 %v8143_v1, %v6090_v0  ;;  %v8159_v0 = vld [vmem:[%s12410_s4 + $0x134] sm:$0xf] }
 0x4f0   : > { %2010 = vmatpush.bf16.msrb.mxu1 %v6231_v49  ;;  %1985 = vmatpush.bf16.msrb.mxu2 %v6203_v2  ;;  %v6116_v49 = vld [vmem:[%s12410_s4 + $0xe0] sm:$0xf0]  ;;  %v6215_v2 = vor.u32 %v8170_v28, %v6212_v63  ;;  %v8162_v63 = vld [vmem:[%s12410_s4 + $0x144] sm:$0xf0]  ;;  %v6172_v1 = vld [vmem:[%s12410_s4 + $0x148] sm:$0xf0] }
 0x4f1   : > { %v6119_v60 = vor.u32 %v8146_v59, %v6116_v49  ;;  %v8189_v59 = vld [vmem:[%s12410_s4 + $0x224] sm:$0xf]  ;;  %v6292_v49 = vld [vmem:[%s12410_s4 + $0x238] sm:$0xf0] }
 0x4f4   : > { %2011 = vmatpush.bf16.msrb.mxu1 %v6207_v6  ;;  %2017 = vmatpush.bf16.msra.mxu2 %v6187_v8  ;;  %v8137_v8 = vld [vmem:[%s12410_s4 + $0x7c] sm:$0xf0] }
 0x4f8   : > { %2018 = vmatpush.bf16.msra.mxu2 %v6163_v34 }
 0x4fc   : > { %2019 = vmatpush.bf16.msra.mxu2 %v6139_v43 }
 0x500   : > { %2020 = vmatpush.bf16.msra.mxu2 %v6115_v48  ;;  %v8192_v48 = vld [vmem:[%s12410_s4 + $0x234] sm:$0xf0] }
 0x504   : > { %2021 = vmatpush.bf16.msra.mxu2 %v6091_v3  ;;  %v6295_v3 = vor.u32 %v8189_v59, %v6292_v49  ;;  %v6352_v49 = vld [vmem:[%s12411_s5 + $0x60] sm:$0xf] }
 0x55f   : > { %v1490_v11 = vpop.xlane.xlu1 %1489 }
 0x560   : > { %v1491_v13 = vmul.f32 %v1490_v11, %v8929_v25  ;;  %v6191_v11 = vor.u32 %v8164_v9, %v6188_v10  ;;  %v6066_v10 = vld [vmem:[%s12410_s4 + $0x68] sm:$0xf] }
 0x562   : > { %v9562_v14 = vsub.f32 %v9519_v57, %v1491_v13  ;;  %v9565_v15 = vsub.f32 %v9516_v55, %v1491_v13  ;;  %v6010_v13 = vld [vmem:[%s12410_s4] sm:$0xf]  ;;  %2043 = vmatpush.bf16.msra.mxu1 %v6191_v11  ;;  %v8134_v11 = vld [vmem:[%s12410_s4 + $0x6c] sm:$0xf] }
 0x564   : > { %v1494_v16 = vmul.f32 %v9562_v14, %v9562_v14  ;;  %v1495_v17 = vmul.f32 %v9565_v15, %v9565_v15 }
 0x566   : > { %v1496_v18 = vsel %vm338_vm0, %v1495_v17, 0.0  ;;  %v8121_v17 = vld [vmem:[%s12410_s4 + $0x4] sm:$0xf]  ;;  %2044 = vmatpush.bf16.msra.mxu1 %v6167_v35 }
 0x567   : > { %v1497_v19 = vadd.f32 %v1496_v18, %v1494_v16  ;;  %v8124_v16 = vld [vmem:[%s12410_s4 + $0x14] sm:$0xf0] }
 0x568   : > { %v6011_v18 = vor.u32 %v8124_v16, %v6010_v13  ;;  %v6067_v13 = vor.u32 %v8137_v8, %v6066_v10  ;;  %v6068_v16 = vld [vmem:[%s12410_s4 + $0x80] sm:$0xf0]  ;;  %v6175_v10 = vor.u32 %v8159_v0, %v6172_v1  ;;  %v6146_v8 = vld [vmem:[%s12410_s4 + $0x100] sm:$0xf] }
 0x569   : > { %1498 = vadd.xlane.f32.xlu0 %v1497_v19  ;;  %v6012_v19 = vld [vmem:[%s12410_s4 + $0x18] sm:$0xf0]  ;;  %v6050_v1 = vld [vmem:[%s12410_s4 + $0x40] sm:$0xf] }
 0x56a   : > { %v6015_v22 = vor.u32 %v8121_v17, %v6012_v19  ;;  %1972 = vmatpush.bf16.msra.mxu0 %v6011_v18  ;;  %2045 = vmatpush.bf16.msra.mxu1 %v6143_v12  ;;  %v6071_v18 = vor.u32 %v8134_v11, %v6068_v16  ;;  %v6042_v19 = vld [vmem:[%s12410_s4 + $0x38] sm:$0xf]  ;;  %v6148_v16 = vld [vmem:[%s12410_s4 + $0x118] sm:$0xf0] }
 0x56b   : > { %2022 = vmatpush.bf16.msra.mxu2 %v6067_v13  ;;  %v8156_v11 = vld [vmem:[%s12410_s4 + $0x114] sm:$0xf0]  ;;  %v8153_v13 = vld [vmem:[%s12410_s4 + $0x104] sm:$0xf] }
 0x56c   : > { %1998 = vmatpush.bf16.msra.mxu3 %v6015_v22  ;;  %v6043_v22 = vor.u32 %v8131_v20, %v6042_v19  ;;  %v6242_v19 = vld [vmem:[%s12410_s4 + $0x1c0] sm:$0xf]  ;;  %v8180_v20 = vld [vmem:[%s12410_s4 + $0x1d4] sm:$0xf0] }
 0x56e   : > { %2034 = vmatpush.bf16.msrb.mxu0 %v6283_v23  ;;  %2046 = vmatpush.bf16.msra.mxu1 %v6119_v60  ;;  %v6044_v23 = vld [vmem:[%s12410_s4 + $0x50] sm:$0xf0] }
 0x56f   : > { %v6047_v24 = vor.u32 %v8128_v21, %v6044_v23  ;;  %2023 = vmatpush.bf16.msra.mxu2 %v6043_v22  ;;  %v8177_v21 = vld [vmem:[%s12410_s4 + $0x1c4] sm:$0xf]  ;;  %v6244_v22 = vld [vmem:[%s12410_s4 + $0x1d8] sm:$0xf0]  ;;  %v6147_v23 = vor.u32 %v8156_v11, %v6146_v8  ;;  %v8236_v8 = vld [vmem:[%s12411_s5 + $0x154] sm:$0xf0] }
 0x570   : > { %2060 = vmatpush.bf16.msrb.mxu3 %v6287_v30  ;;  %v8122_v30 = vld [vmem:[%s12410_s4 + $0xc] sm:$0xf] }
 0x571   : > { %v6023_v34 = vor.u32 %v8122_v30, %v6020_v32  ;;  %v8147_v30 = vld [vmem:[%s12410_s4 + $0xd4] sm:$0xf]  ;;  %v6243_v32 = vor.u32 %v8180_v20, %v6242_v19  ;;  %v6028_v19 = vld [vmem:[%s12410_s4 + $0x28] sm:$0xf0]  ;;  %v6552_v20 = vld [vmem:[%s12411_s5 + $0x1f0] sm:$0xf] }
 0x572   : > { %2035 = vmatpush.bf16.msrb.mxu0 %v6259_v52  ;;  %2047 = vmatpush.bf16.msra.mxu1 %v6095_v7  ;;  %v6268_v7 = vld [vmem:[%s12410_s4 + $0x208] sm:$0xf0] }
 0x573   : > { %2024 = vmatpush.bf16.msra.mxu2 %v6019_v31  ;;  %v6124_v31 = vld [vmem:[%s12410_s4 + $0xe8] sm:$0xf0] }
 0x574   : > { %2061 = vmatpush.bf16.msrb.mxu3 %v6263_v42  ;;  %v1515_v42 = vperm.slane %v9834_v41, 3 }
 0x576   : > { %2036 = vmatpush.bf16.msrb.mxu0 %v6235_v51  ;;  %2048 = vmatpush.bf16.msra.mxu1 %v6071_v18  ;;  %v6194_v51 = vld [vmem:[%s12410_s4 + $0x160] sm:$0xf] }
 0x577   : > { %v6195_v62 = vor.u32 %v8168_v53, %v6194_v51  ;;  %v8240_v51 = vld [vmem:[%s12411_s5 + $0x174] sm:$0xf0] }
 0x578   : > { %2062 = vmatpush.bf16.msrb.mxu3 %v6239_v58 }
 0x57a   : > { %2037 = vmatpush.bf16.msrb.mxu0 %v6211_v29  ;;  %2049 = vmatpush.bf16.msra.mxu1 %v6047_v24  ;;  %v6170_v29 = vld [vmem:[%s12410_s4 + $0x130] sm:$0xf]  ;;  %v6151_v24 = vor.u32 %v8153_v13, %v6148_v16 }
 0x57b   : > { %v6026_v16 = vld [vmem:[%s12410_s4 + $0x10] sm:$0xf] }
 0x57c   : > { %2063 = vmatpush.bf16.msrb.mxu3 %v6215_v2 }
 0x57e   : > { %2050 = vmatpush.bf16.msra.mxu1 %v6023_v34  ;;  %v6218_v34 = vld [vmem:[%s12410_s4 + $0x190] sm:$0xf] }
 0x5dc   : > { %v1499_v6 = vpop.xlane.xlu0 %1498 }
 0x5dd   : > { %v1500_v9 = vmul.f32 %v1499_v6, %v8929_v25  ;;  %v8183_v6 = vld [vmem:[%s12410_s4 + $0x1f4] sm:$0xf] }
 0x5de   : > { %v6271_v18 = vor.u32 %v8183_v6, %v6268_v7  ;;  %v6344_v7 = vld [vmem:[%s12411_s5 + $0x50] sm:$0xf] }
 0x5df   : > { %v1501_v17 = vadd.f32 1e-05, %v1500_v9  ;;  %v6171_v9 = vor.u32 %v8162_v63, %v6170_v29  ;;  %v8238_v29 = vld [vmem:[%s12411_s5 + $0x164] sm:$0xf0] }
 0x5e1   : > { %8638 = vrsqrt.f32 %v1501_v17  ;;  %vm1508_vm10 = vweird.f32 %v1501_v17 }
 0x5e7   : > { %v8639_v33 = vpop.eup %8638 }
 0x5e8   : > { %v1503_v35 = vmul.f32 %v8639_v33, %v1501_v17  ;;  %vm1509_vm9 = vweird.f32 %v8639_v33  ;;  %v6267_v17 = vor.u32 %v8186_v5, %v6266_v4  ;;  %v6052_v4 = vld [vmem:[%s12410_s4 + $0x58] sm:$0xf0] }
 0x5e9   : > { %vm1510_vm11 = vmor %vm1508_vm10, %vm1509_vm9 }
 0x5ea   : > { %v1504_v36 = vmul.f32 %v8639_v33, %v1503_v35  ;;  %v8174_v35 = vld [vmem:[%s12410_s4 + $0x1a4] sm:$0xf0] }
 0x5ec   : > { %v1505_v37 = vmul.f32 0.5, %v1504_v36  ;;  %v8171_v36 = vld [vmem:[%s12410_s4 + $0x194] sm:$0xf] }
 0x5ee   : > { %v1506_v38 = vsub.f32 1.5, %v1505_v37  ;;  %v6220_v37 = vld [vmem:[%s12410_s4 + $0x1a8] sm:$0xf0] }
 0x5f0   : > { %v1507_v52 = vmul.f32 %v8639_v33, %v1506_v38  ;;  %v6123_v38 = vor.u32 %v8150_v27, %v6122_v26  ;;  %v8224_v26 = vld [vmem:[%s12411_s5 + $0xf4] sm:$0xf0]  ;;  %v6464_v27 = vld [vmem:[%s12411_s5 + $0x140] sm:$0xf] }
 0x5f2   : > { %v1511_v43 = vsel %vm1510_vm11, %v8639_v33, %v1507_v52  ;;  %v6247_v33 = vor.u32 %v8177_v21, %v6244_v22  ;;  %v6127_v52 = vor.u32 %v8147_v30, %v6124_v31  ;;  %v8234_v30 = vld [vmem:[%s12411_s5 + $0x144] sm:$0xf0] }
 0x5f3   : > { %v1512_v12 = vmul.f32 %v1511_v43, %v9562_v14  ;;  %v1513_v46 = vmul.f32 %v1511_v43, %v9565_v15  ;;  %v6196_v14 = vld [vmem:[%s12410_s4 + $0x178] sm:$0xf0]  ;;  %v6290_v15 = vld [vmem:[%s12410_s4 + $0x220] sm:$0xf]  ;;  %v8141_v43 = vld [vmem:[%s12410_s4 + $0xa4] sm:$0xf] }
 0x5f4   : > { %v6199_v28 = vor.u32 %v8165_v54, %v6196_v14  ;;  %v6291_v2 = vor.u32 %v8192_v48, %v6290_v15  ;;  %v6074_v14 = vld [vmem:[%s12410_s4 + $0x70] sm:$0xf]  ;;  %v8138_v15 = vld [vmem:[%s12410_s4 + $0x84] sm:$0xf0] }
 0x5f5   : > { %v1516_v47 = vmul.f32 %v1514_v40, %v1512_v12  ;;  %v1517_v50 = vmul.f32 %v1515_v42, %v1513_v46  ;;  %v6098_v40 = vld [vmem:[%s12410_s4 + $0xa0] sm:$0xf]  ;;  %v8144_v42 = vld [vmem:[%s12410_s4 + $0xb4] sm:$0xf0]  ;;  %v6223_v12 = vor.u32 %v8171_v36, %v6220_v37  ;;  %v6360_v46 = vld [vmem:[%s12411_s5 + $0x70] sm:$0xf]  ;;  %v6075_v63 = vor.u32 %v8138_v15, %v6074_v14 }
 0x5f6   : > { %v6099_v53 = vor.u32 %v8144_v42, %v6098_v40  ;;  %v6336_v36 = vld [vmem:[%s12411_s5 + $0x40] sm:$0xf]  ;;  %v8202_v37 = vld [vmem:[%s12411_s5 + $0x44] sm:$0xf0]  ;;  %v6465_v42 = vor.u32 %v8234_v30, %v6464_v27  ;;  %v8220_v14 = vld [vmem:[%s12411_s5 + $0xd4] sm:$0xf0] }
 0x5f7   : > { %v1520_v56 = vadd.f32 %v1518_v44, %v1516_v47  ;;  %v1521_v58 = vadd.f32 %v1519_v45, %v1517_v50  ;;  %v6100_v44 = vld [vmem:[%s12410_s4 + $0xb8] sm:$0xf0]  ;;  %v6219_v45 = vor.u32 %v8174_v35, %v6218_v34  ;;  %v8208_v47 = vld [vmem:[%s12411_s5 + $0x74] sm:$0xf0]  ;;  %v6488_v50 = vld [vmem:[%s12411_s5 + $0x170] sm:$0xf] }
 0x5f8   : > { %v6103_v54 = vor.u32 %v8141_v43, %v6100_v44  ;;  %v6361_v48 = vor.u32 %v8208_v47, %v6360_v46  ;;  %v6489_v59 = vor.u32 %v8240_v51, %v6488_v50  ;;  %v6544_v35 = vld [vmem:[%s12411_s5 + $0x1e0] sm:$0xf]  ;;  %v8222_v40 = vld [vmem:[%s12411_s5 + $0xe4] sm:$0xf0]  ;;  %v6456_v43 = vld [vmem:[%s12411_s5 + $0x130] sm:$0xf] }
 0x5f9   : > { %v9865_v60 = vpack.c.bf16 %v1520_v56, %v1520_v56  ;;  %v9867_v61 = vpack.c.bf16 %v1521_v58, %v1521_v58  ;;  %v8135_v56 = vld [vmem:[%s12410_s4 + $0x74] sm:$0xf]  ;;  %v6076_v58 = vld [vmem:[%s12410_s4 + $0x88] sm:$0xf0]  ;;  %v8232_v44 = vld [vmem:[%s12411_s5 + $0x134] sm:$0xf0] }
 0x5fa   : > { %v6079_v0 = vor.u32 %v8135_v56, %v6076_v58  ;;  %v6536_v47 = vld [vmem:[%s12411_s5 + $0x1d0] sm:$0xf]  ;;  %v8200_v51 = vld [vmem:[%s12411_s5 + $0x34] sm:$0xf0]  ;;  %v6457_v15 = vor.u32 %v8232_v44, %v6456_v43  ;;  %v6448_v56 = vld [vmem:[%s12411_s5 + $0x120] sm:$0xf] }
 0x5fb   : > { %1973 = vmatmul.bf16.vlgmr.msra.gmra.mxu0 %v9865_v60  ;;  %6296 = vmatmul.msk.bf16.vlgmr.msrb.gmra.mxu2 %vm338_vm0, %v9867_v61  ;;  %v6328_v50 = vld [vmem:[%s12411_s5 + $0x30] sm:$0xf]  ;;  %v8230_v58 = vld [vmem:[%s12411_s5 + $0x124] sm:$0xf0]  ;;  %v8244_v27 = vld [vmem:[%s12411_s5 + $0x194] sm:$0xf0] }
 0x5fc   : > { %1999 = vmatmul.bf16.vlgmr.msra.gmra.mxu3 %v9865_v60  ;;  %6297 = vmatmul.msk.bf16.vlgmr.msrb.gmra.mxu1 %vm338_vm0, %v9867_v61  ;;  %v6376_v30 = vld [vmem:[%s12411_s5 + $0x90] sm:$0xf]  ;;  %v8223_v44 = vld [vmem:[%s12411_s5 + $0xf4] sm:$0xf] }
 0x5fd   : > { %2069 = vmatpush.bf16.msra.mxu0 %v6195_v62  ;;  %2095 = vmatpush.bf16.msra.mxu3 %v6199_v28  ;;  %v8206_v62 = vld [vmem:[%s12411_s5 + $0x64] sm:$0xf0]  ;;  %v6480_v28 = vld [vmem:[%s12411_s5 + $0x160] sm:$0xf] }
 0x5fe   : > { %2086 = vmatpush.bf16.msrb.mxu2 %v6291_v2  ;;  %2112 = vmatpush.bf16.msrb.mxu1 %v6295_v3  ;;  %v8132_v2 = vld [vmem:[%s12410_s4 + $0x54] sm:$0xf0]  ;;  %v8129_v3 = vld [vmem:[%s12410_s4 + $0x44] sm:$0xf]  ;;  %v6353_v5 = vor.u32 %v8206_v62, %v6352_v49  ;;  %v6481_v6 = vor.u32 %v8238_v29, %v6480_v28  ;;  %v6320_v62 = vld [vmem:[%s12411_s5 + $0x20] sm:$0xf] }
 0x5ff   : > { %v6051_v11 = vor.u32 %v8132_v2, %v6050_v1  ;;  %v6055_v13 = vor.u32 %v8129_v3, %v6052_v4  ;;  %v8198_v28 = vld [vmem:[%s12411_s5 + $0x24] sm:$0xf0]  ;;  %v6400_v29 = vld [vmem:[%s12411_s5 + $0xc0] sm:$0xf]  ;;  %v6440_v1 = vld [vmem:[%s12411_s5 + $0x110] sm:$0xf] }
 0x600   : > { %v8228_v2 = vld [vmem:[%s12411_s5 + $0x114] sm:$0xf0]  ;;  %v6321_v3 = vor.u32 %v8198_v28, %v6320_v62  ;;  %v8221_v28 = vld [vmem:[%s12411_s5 + $0xe4] sm:$0xf] }
 0x601   : > { %2070 = vmatpush.bf16.msra.mxu0 %v6171_v9  ;;  %2096 = vmatpush.bf16.msra.mxu3 %v6175_v10  ;;  %v8204_v9 = vld [vmem:[%s12411_s5 + $0x54] sm:$0xf0]  ;;  %v6472_v10 = vld [vmem:[%s12411_s5 + $0x150] sm:$0xf] }
 0x602   : > { %2087 = vmatpush.bf16.msrb.mxu2 %v6267_v17  ;;  %2113 = vmatpush.bf16.msrb.mxu1 %v6271_v18  ;;  %v8126_v17 = vld [vmem:[%s12410_s4 + $0x24] sm:$0xf0]  ;;  %v8123_v18 = vld [vmem:[%s12410_s4 + $0x14] sm:$0xf]  ;;  %v6345_v21 = vor.u32 %v8204_v9, %v6344_v7  ;;  %v6473_v22 = vor.u32 %v8236_v8, %v6472_v10  ;;  %v6312_v7 = vld [vmem:[%s12411_s5 + $0x10] sm:$0xf] }
 0x603   : > { %v6027_v31 = vor.u32 %v8126_v17, %v6026_v16  ;;  %v8196_v9 = vld [vmem:[%s12411_s5 + $0x14] sm:$0xf0]  ;;  %v6392_v8 = vld [vmem:[%s12411_s5 + $0xb0] sm:$0xf] }
 0x604   : > { %v8248_v10 = vld [vmem:[%s12411_s5 + $0x1b4] sm:$0xf0]  ;;  %v6313_v16 = vor.u32 %v8196_v9, %v6312_v7  ;;  %v8219_v7 = vld [vmem:[%s12411_s5 + $0xd4] sm:$0xf] }
 0x605   : > { %2071 = vmatpush.bf16.msra.mxu0 %v6147_v23  ;;  %2097 = vmatpush.bf16.msra.mxu3 %v6151_v24  ;;  %v8256_v23 = vld [vmem:[%s12411_s5 + $0x1f4] sm:$0xf0]  ;;  %v6424_v24 = vld [vmem:[%s12411_s5 + $0xf0] sm:$0xf] }
 0x606   : > { %2088 = vmatpush.bf16.msrb.mxu2 %v6243_v32  ;;  %2114 = vmatpush.bf16.msrb.mxu1 %v6247_v33  ;;  %v6031_v32 = vor.u32 %v8123_v18, %v6028_v19  ;;  %v6553_v33 = vor.u32 %v8256_v23, %v6552_v20  ;;  %v6425_v34 = vor.u32 %v8224_v26, %v6424_v24  ;;  %v6512_v19 = vld [vmem:[%s12411_s5 + $0x1a0] sm:$0xf]  ;;  %v8246_v20 = vld [vmem:[%s12411_s5 + $0x1a4] sm:$0xf0]  ;;  %v6504_v26 = vld [vmem:[%s12411_s5 + $0x190] sm:$0xf] }
 0x607   : > { %v6513_v23 = vor.u32 %v8246_v20, %v6512_v19  ;;  %v6592_v20 = vld [vmem:[%s12411_s5 + $0x240] sm:$0xf] }
 0x609   : > { %2072 = vmatpush.bf16.msra.mxu0 %v6123_v38  ;;  %2098 = vmatpush.bf16.msra.mxu3 %v6127_v52  ;;  %v8254_v38 = vld [vmem:[%s12411_s5 + $0x1e4] sm:$0xf0]  ;;  %v6416_v52 = vld [vmem:[%s12411_s5 + $0xe0] sm:$0xf] }
 0x60a   : > { %2089 = vmatpush.bf16.msrb.mxu2 %v6219_v45  ;;  %2115 = vmatpush.bf16.msrb.mxu1 %v6223_v12  ;;  %v6337_v45 = vor.u32 %v8202_v37, %v6336_v36  ;;  %v6545_v12 = vor.u32 %v8254_v38, %v6544_v35  ;;  %v6417_v46 = vor.u32 %v8222_v40, %v6416_v52  ;;  %v8194_v35 = vld [vmem:[%s12411_s5 + $0x4] sm:$0xf0]  ;;  %v6496_v36 = vld [vmem:[%s12411_s5 + $0x180] sm:$0xf]  ;;  %v6616_v52 = vld [vmem:[%s12411_s5 + $0x270] sm:$0xf] }
 0x60b   : > { %2025 = vmatmul.bf16.vlgmr.msra.gmra.mxu2 %v9865_v60  ;;  %6298 = vmatmul.msk.bf16.vlgmr.msrb.gmra.mxu0 %vm338_vm0, %v9867_v61  ;;  %v8242_v38 = vld [vmem:[%s12411_s5 + $0x184] sm:$0xf0]  ;;  %v8272_v40 = vld [vmem:[%s12411_s5 + $0x274] sm:$0xf0] }
 0x60c   : > { %2051 = vmatmul.bf16.vlgmr.msra.gmra.mxu1 %v9865_v60  ;;  %6299 = vmatmul.msk.bf16.vlgmr.msrb.gmra.mxu3 %vm338_vm0, %v9867_v61  ;;  %v6617_v43 = vor.u32 %v8272_v40, %v6616_v52  ;;  %v6394_v52 = vld [vmem:[%s12411_s5 + $0xb8] sm:$0xf0] }
 0x60d   : > { %2073 = vmatpush.bf16.msra.mxu0 %v6099_v53  ;;  %2099 = vmatpush.bf16.msra.mxu3 %v6103_v54  ;;  %v8252_v53 = vld [vmem:[%s12411_s5 + $0x1d4] sm:$0xf0]  ;;  %v6408_v54 = vld [vmem:[%s12411_s5 + $0xd0] sm:$0xf] }
 0x60e   : > { %2711 = vmatpush.bf16.msra.mxu2 %v6361_v48  ;;  %2737 = vmatpush.bf16.msra.mxu1 %v6489_v59  ;;  %v6329_v48 = vor.u32 %v8200_v51, %v6328_v50  ;;  %v6537_v59 = vor.u32 %v8252_v53, %v6536_v47  ;;  %v6409_v49 = vor.u32 %v8220_v14, %v6408_v54  ;;  %v8210_v47 = vld [vmem:[%s12411_s5 + $0x84] sm:$0xf0]  ;;  %v6432_v50 = vld [vmem:[%s12411_s5 + $0x100] sm:$0xf]  ;;  %v6680_v14 = vld [vmem:[%s12411_s5 + $0x2f0] sm:$0xf] }
 0x60f   : > { %v8226_v51 = vld [vmem:[%s12411_s5 + $0x104] sm:$0xf0] }
 0x610   : > { %v6433_v54 = vor.u32 %v8226_v51, %v6432_v50 }
 0x611   : > { %2074 = vmatpush.bf16.msra.mxu0 %v6075_v63  ;;  %2100 = vmatpush.bf16.msra.mxu3 %v6079_v0  ;;  %v8218_v63 = vld [vmem:[%s12411_s5 + $0xc4] sm:$0xf0]  ;;  %v6449_v0 = vor.u32 %v8230_v58, %v6448_v56  ;;  %v8207_v56 = vld [vmem:[%s12411_s5 + $0x74] sm:$0xf] }
 0x612   : > { %2712 = vmatpush.bf16.msra.mxu2 %v6353_v5  ;;  %2738 = vmatpush.bf16.msra.mxu1 %v6481_v6  ;;  %v6401_v5 = vor.u32 %v8218_v63, %v6400_v29  ;;  %v6520_v6 = vld [vmem:[%s12411_s5 + $0x1b0] sm:$0xf]  ;;  %v6672_v63 = vld [vmem:[%s12411_s5 + $0x2e0] sm:$0xf] }
 0x613   : > { %v6521_v17 = vor.u32 %v8248_v10, %v6520_v6  ;;  %v8268_v6 = vld [vmem:[%s12411_s5 + $0x254] sm:$0xf0]  ;;  %v6410_v10 = vld [vmem:[%s12411_s5 + $0xd8] sm:$0xf0] }
 0x615   : > { %2075 = vmatpush.bf16.msra.mxu0 %v6051_v11  ;;  %2101 = vmatpush.bf16.msra.mxu3 %v6055_v13  ;;  %v8216_v11 = vld [vmem:[%s12411_s5 + $0xb4] sm:$0xf0]  ;;  %v6441_v13 = vor.u32 %v8228_v2, %v6440_v1  ;;  %v8205_v1 = vld [vmem:[%s12411_s5 + $0x64] sm:$0xf] }
 0x616   : > { %2713 = vmatpush.bf16.msra.mxu2 %v6345_v21  ;;  %2739 = vmatpush.bf16.msra.mxu1 %v6473_v22  ;;  %v6393_v18 = vor.u32 %v8216_v11, %v6392_v8  ;;  %v6384_v21 = vld [vmem:[%s12411_s5 + $0xa0] sm:$0xf]  ;;  %v8214_v22 = vld [vmem:[%s12411_s5 + $0xa4] sm:$0xf0]  ;;  %v6413_v8 = vor.u32 %v8219_v7, %v6410_v10  ;;  %v6664_v11 = vld [vmem:[%s12411_s5 + $0x2d0] sm:$0xf] }
 0x617   : > { %v6385_v24 = vor.u32 %v8214_v22, %v6384_v21  ;;  %v8266_v21 = vld [vmem:[%s12411_s5 + $0x244] sm:$0xf0]  ;;  %v8217_v22 = vld [vmem:[%s12411_s5 + $0xc4] sm:$0xf] }
 0x618   : > { %v8258_v7 = vld [vmem:[%s12411_s5 + $0x204] sm:$0xf0] }
 0x619   : > { %2076 = vmatpush.bf16.msra.mxu0 %v6027_v31  ;;  %2102 = vmatpush.bf16.msra.mxu3 %v6031_v32  ;;  %v8212_v31 = vld [vmem:[%s12411_s5 + $0x94] sm:$0xf0]  ;;  %v6505_v32 = vor.u32 %v8244_v27, %v6504_v26  ;;  %v6656_v27 = vld [vmem:[%s12411_s5 + $0x2c0] sm:$0xf] }
 0x61a   : > { %2740 = vmatpush.bf16.msra.mxu1 %v6465_v42  ;;  %2714 = vmatpush.bf16.msra.mxu2 %v6337_v45  ;;  %v6497_v42 = vor.u32 %v8242_v38, %v6496_v36  ;;  %v6426_v45 = vld [vmem:[%s12411_s5 + $0xf8] sm:$0xf0]  ;;  %v8264_v36 = vld [vmem:[%s12411_s5 + $0x234] sm:$0xf0]  ;;  %v8215_v38 = vld [vmem:[%s12411_s5 + $0xb4] sm:$0xf] }
 0x61b   : > { %6300 = vmatmul.msk.bf16.vlgmr.msrb.gmra.mxu2 %vm338_vm0, %v9867_v61  ;;  %v6397_v40 = vor.u32 %v8215_v38, %v6394_v52  ;;  %v6554_v52 = vld [vmem:[%s12411_s5 + $0x1f8] sm:$0xf0] }
 0x61c   : > { %2077 = vmatmul.bf16.vlgmr.msra.gmra.mxu0 %v9865_v60  ;;  %2103 = vmatmul.bf16.vlgmr.msra.gmra.mxu3 %v9865_v60  ;;  %v6528_v60 = vld [vmem:[%s12411_s5 + $0x1c0] sm:$0xf] }
 0x61d   : > { %2750 = vmatpush.bf16.msrb.mxu3 %v6553_v33  ;;  %2724 = vmatpush.bf16.msrb.mxu0 %v6425_v34  ;;  %v6377_v33 = vor.u32 %v8212_v31, %v6376_v30  ;;  %v6304_v34 = vld [vmem:[%s12411_s5] sm:$0xf]  ;;  %v8282_v30 = vld [vmem:[%s12411_s5 + $0x2c4] sm:$0xf0]  ;;  %v8201_v31 = vld [vmem:[%s12411_s5 + $0x44] sm:$0xf] }
 0x61e   : > { %6301 = vmatmul.msk.bf16.vlgmr.msrb.gmra.mxu1 %vm338_vm0, %v9867_v61  ;;  %v8250_v61 = vld [vmem:[%s12411_s5 + $0x1c4] sm:$0xf0]  ;;  %2715 = vmatpush.bf16.msra.mxu2 %v6329_v48  ;;  %v6305_v37 = vor.u32 %v8194_v35, %v6304_v34  ;;  %v6362_v48 = vld [vmem:[%s12411_s5 + $0x78] sm:$0xf0]  ;;  %v6584_v35 = vld [vmem:[%s12411_s5 + $0x230] sm:$0xf] }
 0x61f   : > { %2741 = vmatpush.bf16.msra.mxu1 %v6457_v15  ;;  %v6529_v4 = vor.u32 %v8250_v61, %v6528_v60  ;;  %v8288_v15 = vld [vmem:[%s12411_s5 + $0x2f4] sm:$0xf0]  ;;  %v6365_v60 = vor.u32 %v8207_v56, %v6362_v48  ;;  %v6418_v61 = vld [vmem:[%s12411_s5 + $0xe8] sm:$0xf0]  ;;  %v8278_v56 = vld [vmem:[%s12411_s5 + $0x2a4] sm:$0xf0] }
 0x620   : > { %v6681_v58 = vor.u32 %v8288_v15, %v6680_v14  ;;  %v6421_v29 = vor.u32 %v8221_v28, %v6418_v61  ;;  %v6640_v15 = vld [vmem:[%s12411_s5 + $0x2a0] sm:$0xf]  ;;  %v8211_v28 = vld [vmem:[%s12411_s5 + $0x94] sm:$0xf] }
 0x621   : > { %2751 = vmatpush.bf16.msrb.mxu3 %v6545_v12  ;;  %2725 = vmatpush.bf16.msrb.mxu0 %v6417_v46  ;;  %v6368_v12 = vld [vmem:[%s12411_s5 + $0x80] sm:$0xf]  ;;  %v6429_v46 = vor.u32 %v8223_v44, %v6426_v45  ;;  %v8199_v44 = vld [vmem:[%s12411_s5 + $0x34] sm:$0xf]  ;;  %v6641_v48 = vor.u32 %v8278_v56, %v6640_v15  ;;  %v6474_v15 = vld [vmem:[%s12411_s5 + $0x158] sm:$0xf0] }
 0x622   : > { %2716 = vmatpush.bf16.msra.mxu2 %v6321_v3  ;;  %v6369_v53 = vor.u32 %v8210_v47, %v6368_v12  ;;  %v6354_v3 = vld [vmem:[%s12411_s5 + $0x68] sm:$0xf0]  ;;  %v6330_v12 = vld [vmem:[%s12411_s5 + $0x38] sm:$0xf0]  ;;  %v8262_v47 = vld [vmem:[%s12411_s5 + $0x224] sm:$0xf0] }
 0x623   : > { %2742 = vmatpush.bf16.msra.mxu1 %v6449_v0  ;;  %v8286_v0 = vld [vmem:[%s12411_s5 + $0x2e4] sm:$0xf0]  ;;  %v6333_v50 = vor.u32 %v8199_v44, %v6330_v12 }
 0x624   : > { %v6673_v2 = vor.u32 %v8286_v0, %v6672_v63  ;;  %v6632_v0 = vld [vmem:[%s12411_s5 + $0x290] sm:$0xf] }
 0x625   : > { %2752 = vmatpush.bf16.msrb.mxu3 %v6537_v59  ;;  %2726 = vmatpush.bf16.msrb.mxu0 %v6409_v49  ;;  %v6608_v59 = vld [vmem:[%s12411_s5 + $0x260] sm:$0xf]  ;;  %v8270_v49 = vld [vmem:[%s12411_s5 + $0x264] sm:$0xf0] }
 0x626   : > { %2717 = vmatpush.bf16.msra.mxu2 %v6313_v16  ;;  %v6609_v62 = vor.u32 %v8270_v49, %v6608_v59  ;;  %v8203_v16 = vld [vmem:[%s12411_s5 + $0x54] sm:$0xf]  ;;  %v6322_v59 = vld [vmem:[%s12411_s5 + $0x28] sm:$0xf0] }
 0x627   : > { %2743 = vmatpush.bf16.msra.mxu1 %v6441_v13  ;;  %v8284_v13 = vld [vmem:[%s12411_s5 + $0x2d4] sm:$0xf0] }
 0x629   : > { %2753 = vmatpush.bf16.msrb.mxu3 %v6529_v4  ;;  %2727 = vmatpush.bf16.msrb.mxu0 %v6401_v5  ;;  %v6357_v4 = vor.u32 %v8205_v1, %v6354_v3  ;;  %v6600_v5 = vld [vmem:[%s12411_s5 + $0x250] sm:$0xf]  ;;  %v8276_v1 = vld [vmem:[%s12411_s5 + $0x294] sm:$0xf0] }
 0x62a   : > { %2718 = vmatpush.bf16.msra.mxu2 %v6305_v37  ;;  %v6601_v9 = vor.u32 %v8268_v6, %v6600_v5  ;;  %v6585_v37 = vor.u32 %v8264_v36, %v6584_v35  ;;  %v6633_v3 = vor.u32 %v8276_v1, %v6632_v0  ;;  %v6560_v6 = vld [vmem:[%s12411_s5 + $0x200] sm:$0xf] }
 0x62b   : > { %2744 = vmatpush.bf16.msra.mxu1 %v6433_v54  ;;  %v6386_v54 = vld [vmem:[%s12411_s5 + $0xa8] sm:$0xf0]  ;;  %v6561_v10 = vor.u32 %v8258_v7, %v6560_v6 }
 0x62d   : > { %2754 = vmatpush.bf16.msrb.mxu3 %v6521_v17  ;;  %2728 = vmatpush.bf16.msrb.mxu0 %v6393_v18  ;;  %v6665_v17 = vor.u32 %v8284_v13, %v6664_v11  ;;  %v6346_v18 = vld [vmem:[%s12411_s5 + $0x58] sm:$0xf0]  ;;  %v6624_v13 = vld [vmem:[%s12411_s5 + $0x280] sm:$0xf] }
 0x62e   : > { %2763 = vmatpush.bf16.msrb.mxu2 %v6617_v43  ;;  %v6349_v19 = vor.u32 %v8203_v16, %v6346_v18  ;;  %v8280_v43 = vld [vmem:[%s12411_s5 + $0x2b4] sm:$0xf0]  ;;  %v8274_v16 = vld [vmem:[%s12411_s5 + $0x284] sm:$0xf0]  ;;  %v6306_v18 = vld [vmem:[%s12411_s5 + $0x8] sm:$0xf0] }
 0x62f   : > { %2789 = vmatpush.bf16.msrb.mxu1 %v6365_v60  ;;  %v6568_v60 = vld [vmem:[%s12411_s5 + $0x210] sm:$0xf] }
 0x631   : > { %2755 = vmatpush.bf16.msrb.mxu3 %v6513_v23  ;;  %2729 = vmatpush.bf16.msrb.mxu0 %v6385_v24  ;;  %v6593_v23 = vor.u32 %v8266_v21, %v6592_v20  ;;  %v6402_v24 = vld [vmem:[%s12411_s5 + $0xc8] sm:$0xf0]  ;;  %v6625_v20 = vor.u32 %v8274_v16, %v6624_v13  ;;  %v8287_v13 = vld [vmem:[%s12411_s5 + $0x2f4] sm:$0xf]  ;;  %v6682_v16 = vld [vmem:[%s12411_s5 + $0x2f8] sm:$0xf0] }
 0x632   : > { %2764 = vmatpush.bf16.msrb.mxu2 %v6609_v62  ;;  %v6405_v26 = vor.u32 %v8217_v22, %v6402_v24  ;;  %v8260_v62 = vld [vmem:[%s12411_s5 + $0x214] sm:$0xf0]  ;;  %v1596_v22 = vperm.slane %v9828_v39, 5  ;;  %v1597_v24 = vperm.slane %v9834_v41, 5  ;;  %v8255_v41 = vld [vmem:[%s12411_s5 + $0x1f4] sm:$0xf] }
 0x633   : > { %2790 = vmatpush.bf16.msrb.mxu1 %v6357_v4  ;;  %v6569_v61 = vor.u32 %v8260_v62, %v6568_v60  ;;  %v6314_v4 = vld [vmem:[%s12411_s5 + $0x18] sm:$0xf0]  ;;  %v8251_v62 = vld [vmem:[%s12411_s5 + $0x1d4] sm:$0xf] }
 0x635   : > { %2756 = vmatpush.bf16.msrb.mxu3 %v6505_v32  ;;  %2730 = vmatpush.bf16.msrb.mxu0 %v6377_v33  ;;  %v6657_v32 = vor.u32 %v8282_v30, %v6656_v27  ;;  %v6338_v33 = vld [vmem:[%s12411_s5 + $0x48] sm:$0xf0] }
 0x636   : > { %2765 = vmatpush.bf16.msrb.mxu2 %v6601_v9  ;;  %v6341_v34 = vor.u32 %v8201_v31, %v6338_v33  ;;  %v8209_v9 = vld [vmem:[%s12411_s5 + $0x84] sm:$0xf]  ;;  %v6490_v33 = vld [vmem:[%s12411_s5 + $0x178] sm:$0xf0] }
 0x637   : > { %2791 = vmatpush.bf16.msrb.mxu1 %v6349_v19 }
 0x639   : > { %2757 = vmatpush.bf16.msrb.mxu3 %v6497_v42  ;;  %2731 = vmatpush.bf16.msrb.mxu0 %v6369_v53  ;;  %v6648_v42 = vld [vmem:[%s12411_s5 + $0x2b0] sm:$0xf]  ;;  %v8213_v53 = vld [vmem:[%s12411_s5 + $0xa4] sm:$0xf] }
 0x63a   : > { %2766 = vmatpush.bf16.msrb.mxu2 %v6593_v23  ;;  %v6649_v45 = vor.u32 %v8280_v43, %v6648_v42  ;;  %v6389_v14 = vor.u32 %v8213_v53, %v6386_v54  ;;  %v8237_v42 = vld [vmem:[%s12411_s5 + $0x164] sm:$0xf]  ;;  %v6482_v43 = vld [vmem:[%s12411_s5 + $0x168] sm:$0xf0]  ;;  %v328_v54 = vld [vmem:[%s12413_s7 + $0x18] sm:$0xff] }
 0x63b   : > { %2792 = vmatpush.bf16.msrb.mxu1 %v6341_v34 }
 0x63d   : > { %2802 = vmatpush.bf16.msra.mxu3 %v6429_v46  ;;  %2776 = vmatpush.bf16.msra.mxu0 %v6681_v58  ;;  %v6576_v46 = vld [vmem:[%s12411_s5 + $0x220] sm:$0xf]  ;;  %v8197_v58 = vld [vmem:[%s12411_s5 + $0x24] sm:$0xf] }
 0x63e   : > { %2767 = vmatpush.bf16.msrb.mxu2 %v6585_v37  ;;  %v6577_v51 = vor.u32 %v8262_v47, %v6576_v46  ;;  %v6325_v49 = vor.u32 %v8197_v58, %v6322_v59  ;;  %v6485_v47 = vor.u32 %v8237_v42, %v6482_v43  ;;  %v327_v58 = vld [vmem:[%s12413_s7 + $0x10] sm:$0xff]  ;;  %v329_v42 = vld [vmem:[%s12413_s7 + $0x20] sm:$0xff] }
 0x63f   : > { %2793 = vmatpush.bf16.msrb.mxu1 %v6333_v50  ;;  %v8253_v50 = vld [vmem:[%s12411_s5 + $0x1e4] sm:$0xf] }
 0x641   : > { %2803 = vmatpush.bf16.msra.mxu3 %v6421_v29  ;;  %2777 = vmatpush.bf16.msra.mxu0 %v6673_v2  ;;  %v6378_v29 = vld [vmem:[%s12411_s5 + $0x98] sm:$0xf0]  ;;  %v8195_v2 = vld [vmem:[%s12411_s5 + $0x14] sm:$0xf] }
 0x642   : > { %2768 = vmatpush.bf16.msrb.mxu2 %v6577_v51  ;;  %v6381_v63 = vor.u32 %v8211_v28, %v6378_v29  ;;  %v6317_v5 = vor.u32 %v8195_v2, %v6314_v4  ;;  %v6546_v51 = vld [vmem:[%s12411_s5 + $0x1e8] sm:$0xf0]  ;;  %v6538_v28 = vld [vmem:[%s12411_s5 + $0x1d8] sm:$0xf0]  ;;  %v8233_v29 = vld [vmem:[%s12411_s5 + $0x144] sm:$0xf] }
 0x643   : > { %2794 = vmatpush.bf16.msrb.mxu1 %v6325_v49  ;;  %v6549_v59 = vor.u32 %v8253_v50, %v6546_v51  ;;  %v1599_v49 = vperm.slane %v328_v54, 5  ;;  %v6541_v0 = vor.u32 %v8251_v62, %v6538_v28  ;;  %v8249_v4 = vld [vmem:[%s12411_s5 + $0x1c4] sm:$0xf]  ;;  %v8227_v50 = vld [vmem:[%s12411_s5 + $0x114] sm:$0xf] }
 0x644   : > { %v6442_v51 = vld [vmem:[%s12411_s5 + $0x118] sm:$0xf0]  ;;  %v8283_v54 = vld [vmem:[%s12411_s5 + $0x2d4] sm:$0xf] }
 0x645   : > { %2804 = vmatpush.bf16.msra.mxu3 %v6413_v8  ;;  %2778 = vmatpush.bf16.msra.mxu0 %v6665_v17  ;;  %v6370_v8 = vld [vmem:[%s12411_s5 + $0x88] sm:$0xf0]  ;;  %v8193_v17 = vld [vmem:[%s12411_s5 + $0x4] sm:$0xf]  ;;  %v6445_v62 = vor.u32 %v8227_v50, %v6442_v51  ;;  %v8243_v28 = vld [vmem:[%s12411_s5 + $0x194] sm:$0xf] }
 0x646   : > { %2769 = vmatpush.bf16.msrb.mxu2 %v6569_v61  ;;  %v6373_v11 = vor.u32 %v8209_v9, %v6370_v8  ;;  %v6309_v21 = vor.u32 %v8193_v17, %v6306_v18  ;;  %v1598_v61 = vperm.slane %v327_v58, 5  ;;  %v8231_v9 = vld [vmem:[%s12411_s5 + $0x134] sm:$0xf]  ;;  %v330_v58 = vld [vmem:[%s12413_s7 + $0x28] sm:$0xff]  ;;  %v6634_v51 = vld [vmem:[%s12411_s5 + $0x298] sm:$0xf0] }
 0x647   : > { %2795 = vmatpush.bf16.msrb.mxu1 %v6317_v5  ;;  %v6530_v5 = vld [vmem:[%s12411_s5 + $0x1c8] sm:$0xf0]  ;;  %v8275_v50 = vld [vmem:[%s12411_s5 + $0x294] sm:$0xf] }
 0x649   : > { %2805 = vmatpush.bf16.msra.mxu3 %v6405_v26  ;;  %2779 = vmatpush.bf16.msra.mxu0 %v6657_v32  ;;  %v8239_v32 = vld [vmem:[%s12411_s5 + $0x174] sm:$0xf] }
 0x64a   : > { %2770 = vmatpush.bf16.msrb.mxu2 %v6561_v10  ;;  %v6493_v38 = vor.u32 %v8239_v32, %v6490_v33  ;;  %v6458_v10 = vld [vmem:[%s12411_s5 + $0x138] sm:$0xf0]  ;;  %v6450_v32 = vld [vmem:[%s12411_s5 + $0x128] sm:$0xf0] }
 0x64b   : > { %2796 = vmatpush.bf16.msrb.mxu1 %v6309_v21  ;;  %v6533_v21 = vor.u32 %v8249_v4, %v6530_v5  ;;  %v6658_v4 = vld [vmem:[%s12411_s5 + $0x2c8] sm:$0xf0] }
 0x64d   : > { %2806 = vmatpush.bf16.msra.mxu3 %v6397_v40  ;;  %2780 = vmatpush.bf16.msra.mxu0 %v6649_v45  ;;  %v6557_v45 = vor.u32 %v8255_v41, %v6554_v52 }
 0x651   : > { %2807 = vmatpush.bf16.msra.mxu3 %v6389_v14  ;;  %2781 = vmatpush.bf16.msra.mxu0 %v6641_v48  ;;  %v8235_v14 = vld [vmem:[%s12411_s5 + $0x154] sm:$0xf] }
 0x652   : > { %v6477_v60 = vor.u32 %v8235_v14, %v6474_v15  ;;  %v6666_v14 = vld [vmem:[%s12411_s5 + $0x2d8] sm:$0xf0]  ;;  %v1600_v15 = vperm.slane %v329_v42, 5  ;;  %v6578_v42 = vld [vmem:[%s12411_s5 + $0x228] sm:$0xf0] }
 0x655   : > { %2808 = vmatpush.bf16.msra.mxu3 %v6381_v63  ;;  %2782 = vmatpush.bf16.msra.mxu0 %v6633_v3  ;;  %v6466_v63 = vld [vmem:[%s12411_s5 + $0x148] sm:$0xf0] }
 0x656   : > { %v6469_v3 = vor.u32 %v8233_v29, %v6466_v63  ;;  %v6669_v29 = vor.u32 %v8283_v54, %v6666_v14  ;;  %v8225_v63 = vld [vmem:[%s12411_s5 + $0x104] sm:$0xf] }
 0x657   : > { %v8273_v14 = vld [vmem:[%s12411_s5 + $0x284] sm:$0xf] }
 0x659   : > { %2809 = vmatpush.bf16.msra.mxu3 %v6373_v11  ;;  %2783 = vmatpush.bf16.msra.mxu0 %v6625_v20  ;;  %v6618_v20 = vld [vmem:[%s12411_s5 + $0x278] sm:$0xf0] }
 0x678   : > { %v1974_v19 = vpop.f32.mrf.mxu0 }
 0x679   : > { %v2013_v23 = vpop.f32.mrf.mxu1  ;;  %v1975_v26 = vadd.f32 %v1974_v19, %v1596_v22  ;;  %v8271_v19 = vld [vmem:[%s12411_s5 + $0x274] sm:$0xf] }
 0x67e   : > { %v1987_v27 = vpop.f32.mrf.mxu2 }
 0x67f   : > { %v1988_v30 = vadd.f32 %v1987_v27, %v1975_v26  ;;  %v2000_v31 = vpop.f32.mrf.mxu3  ;;  %v6522_v26 = vld [vmem:[%s12411_s5 + $0x1b8] sm:$0xf0] }
 0x680   : > { %v2001_v34 = vadd.f32 %v2000_v31, %v1597_v24  ;;  %v1976_v35 = vpop.f32.mrf.mxu0  ;;  %v8247_v24 = vld [vmem:[%s12411_s5 + $0x1b4] sm:$0xf]  ;;  %v8229_v31 = vld [vmem:[%s12411_s5 + $0x124] sm:$0xf] }
 0x681   : > { %v2121_v39 = vmax.f32 %v1988_v30, 0.0  ;;  %v2015_v36 = vpop.f32.mrf.mxu1  ;;  %v6685_v30 = vor.u32 %v8287_v13, %v6682_v16  ;;  %v8285_v35 = vld [vmem:[%s12411_s5 + $0x2e4] sm:$0xf]  ;;  %v6525_v41 = vor.u32 %v8247_v24, %v6522_v26  ;;  %v6453_v43 = vor.u32 %v8229_v31, %v6450_v32  ;;  %v6498_v13 = vld [vmem:[%s12411_s5 + $0x188] sm:$0xf0] }
 0x682   : > { %v2014_v37 = vadd.f32 %v2013_v23, %v2001_v34  ;;  %v6461_v23 = vor.u32 %v8231_v9, %v6458_v10  ;;  %v6621_v34 = vor.u32 %v8271_v19, %v6618_v20  ;;  %v8263_v26 = vld [vmem:[%s12411_s5 + $0x234] sm:$0xf] }
 0x683   : > { %v10405_v40 = vpack.c.bf16 %v2121_v39, %v2121_v39  ;;  %v6674_v39 = vld [vmem:[%s12411_s5 + $0x2e8] sm:$0xf0] }
 0x684   : > { %v2122_v44 = vmax.f32 %v2014_v37, 0.0  ;;  %v8269_v37 = vld [vmem:[%s12411_s5 + $0x264] sm:$0xf] }
 0x685   : > { %2719 = vmatmul.bf16.vlgmr.msra.gmra.mxu2 %v10405_v40 }
 0x686   : > { %v10414_v12 = vpack.c.bf16 %v2122_v44, %v2122_v44  ;;  %v1989_v46 = vpop.f32.mrf.mxu2  ;;  %2815 = vmatpush.bf16.msra.mxu2 %v6493_v38  ;;  %v6610_v38 = vld [vmem:[%s12411_s5 + $0x268] sm:$0xf0]  ;;  %v8245_v44 = vld [vmem:[%s12411_s5 + $0x1a4] sm:$0xf] }
 0x687   : > { %v2002_v53 = vpop.f32.mrf.mxu3 }
 0x688   : > { %2732 = vmatmul.bf16.vlgmr.msrb.gmra.mxu0 %v10414_v12  ;;  %v2039_v56 = vpop.f32.mrf.mxu0  ;;  %v6613_v53 = vor.u32 %v8269_v37, %v6610_v38  ;;  %v8277_v38 = vld [vmem:[%s12411_s5 + $0x2a4] sm:$0xf] }
 0x689   : > { %v2052_v48 = vpop.f32.mrf.mxu1  ;;  %2828 = vmatpush.bf16.msrb.mxu0 %v6557_v45  ;;  %v6514_v45 = vld [vmem:[%s12411_s5 + $0x1a8] sm:$0xf0] }
 0x68a   : > { %2816 = vmatpush.bf16.msra.mxu2 %v6485_v47  ;;  %v2053_v1 = vadd.f32 %v2052_v48, %v1599_v49  ;;  %v6677_v47 = vor.u32 %v8285_v35, %v6674_v39  ;;  %v8267_v48 = vld [vmem:[%s12411_s5 + $0x254] sm:$0xf]  ;;  %v6517_v49 = vor.u32 %v8245_v44, %v6514_v45 }
 0x68d   : > { %2829 = vmatpush.bf16.msrb.mxu0 %v6549_v59  ;;  %v6602_v59 = vld [vmem:[%s12411_s5 + $0x258] sm:$0xf0] }
 0x68e   : > { %v2026_v2 = vpop.f32.mrf.mxu2  ;;  %2817 = vmatpush.bf16.msra.mxu2 %v6477_v60 }
 0x68f   : > { %v2027_v6 = vadd.f32 %v2026_v2, %v1598_v61  ;;  %v2065_v7 = vpop.f32.mrf.mxu3  ;;  %v6506_v61 = vld [vmem:[%s12411_s5 + $0x198] sm:$0xf0]  ;;  %v6605_v2 = vor.u32 %v8267_v48, %v6602_v59 }
 0x690   : > { %v2066_v8 = vadd.f32 %v2065_v7, %v2053_v1  ;;  %v2041_v11 = vpop.f32.mrf.mxu0  ;;  %v1601_v1 = vperm.slane %v330_v58, 5  ;;  %v6594_v7 = vld [vmem:[%s12411_s5 + $0x248] sm:$0xf0]  ;;  %v6509_v9 = vor.u32 %v8243_v28, %v6506_v61 }
 0x691   : > { %v2040_v17 = vadd.f32 %v2039_v56, %v2027_v6  ;;  %v2054_v18 = vpop.f32.mrf.mxu1  ;;  %2830 = vmatpush.bf16.msrb.mxu0 %v6541_v0  ;;  %v6434_v0 = vld [vmem:[%s12411_s5 + $0x108] sm:$0xf0]  ;;  %v8265_v6 = vld [vmem:[%s12411_s5 + $0x244] sm:$0xf] }
 0x692   : > { %v2124_v22 = vmax.f32 %v2066_v8, 0.0  ;;  %2818 = vmatpush.bf16.msra.mxu2 %v6469_v3  ;;  %v8281_v3 = vld [vmem:[%s12411_s5 + $0x2c4] sm:$0xf]  ;;  %v6437_v8 = vor.u32 %v8225_v63, %v6434_v0  ;;  %v6597_v20 = vor.u32 %v8265_v6, %v6594_v7  ;;  %v6562_v58 = vld [vmem:[%s12411_s5 + $0x208] sm:$0xf0] }
 0x693   : > { %v2123_v27 = vmax.f32 %v2040_v17, 0.0  ;;  %v8241_v11 = vld [vmem:[%s12411_s5 + $0x184] sm:$0xf]  ;;  %v6661_v18 = vor.u32 %v8281_v3, %v6658_v4 }
 0x694   : > { %v10483_v33 = vpack.c.bf16 %v2124_v22, %v2124_v22  ;;  %v6650_v22 = vld [vmem:[%s12411_s5 + $0x2b8] sm:$0xf0] }
 0x695   : > { %v10491_v36 = vpack.c.bf16 %v2123_v27, %v2123_v27  ;;  %2831 = vmatpush.bf16.msrb.mxu0 %v6533_v21  ;;  %v8279_v21 = vld [vmem:[%s12411_s5 + $0x2b4] sm:$0xf]  ;;  %v6586_v27 = vld [vmem:[%s12411_s5 + $0x238] sm:$0xf0] }
 0x696   : > { %2758 = vmatmul.bf16.vlgmr.msrb.gmra.mxu3 %v10483_v33  ;;  %v2028_v52 = vpop.f32.mrf.mxu2  ;;  %2819 = vmatpush.bf16.msra.mxu2 %v6461_v23  ;;  %v6653_v35 = vor.u32 %v8279_v21, %v6650_v22  ;;  %v6589_v37 = vor.u32 %v8263_v26, %v6586_v27 }
 0x697   : > { %v2067_v46 = vpop.f32.mrf.mxu3  ;;  %2854 = vmatpush.bf16.msrb.mxu3 %v6685_v30  ;;  %2745 = vmatmul.bf16.vlgmr.msra.gmra.mxu1 %v10491_v36  ;;  %v6501_v30 = vor.u32 %v8241_v11, %v6498_v13  ;;  %v8261_v52 = vld [vmem:[%s12411_s5 + $0x224] sm:$0xf] }
 0x698   : > { %2841 = vmatpush.bf16.msra.mxu1 %v6621_v34 }
 0x699   : > { %v2078_v56 = vpop.f32.mrf.mxu0  ;;  %2832 = vmatpush.bf16.msrb.mxu0 %v6525_v41  ;;  %v6642_v41 = vld [vmem:[%s12411_s5 + $0x2a8] sm:$0xf0] }
 0x69a   : > { %2820 = vmatpush.bf16.msra.mxu2 %v6453_v43  ;;  %v2079_v5 = vadd.f32 %v2078_v56, %v1600_v15  ;;  %v6645_v46 = vor.u32 %v8277_v38, %v6642_v41  ;;  %v6626_v15 = vld [vmem:[%s12411_s5 + $0x288] sm:$0xf0]  ;;  %v8257_v56 = vld [vmem:[%s12411_s5 + $0x204] sm:$0xf] }
 0x69b   : > { %v2117_v60 = vpop.f32.mrf.mxu1  ;;  %2855 = vmatpush.bf16.msrb.mxu3 %v6677_v47  ;;  %v6581_v47 = vor.u32 %v8261_v52, %v6578_v42  ;;  %v6629_v48 = vor.u32 %v8273_v14, %v6626_v15  ;;  %v6565_v59 = vor.u32 %v8257_v56, %v6562_v58 }
 0x69c   : > { %2842 = vmatpush.bf16.msra.mxu1 %v6613_v53  ;;  %v6637_v53 = vor.u32 %v8275_v50, %v6634_v51 }
 0x69d   : > { %2833 = vmatpush.bf16.msrb.mxu0 %v6517_v49 }
 0x69e   : > { %v2091_v10 = vpop.f32.mrf.mxu2  ;;  %2821 = vmatpush.bf16.msra.mxu2 %v6445_v62 }
 0x69f   : > { %v2092_v16 = vadd.f32 %v2091_v10, %v2079_v5  ;;  %v2104_v17 = vpop.f32.mrf.mxu3  ;;  %2856 = vmatpush.bf16.msrb.mxu3 %v6669_v29  ;;  %v10622_v10 = vld [vmem:[%s12413_s7 + $0x8] sm:$0xff] }
 0x6a0   : > { %v2105_v19 = vadd.f32 %v2104_v17, %v1601_v1  ;;  %2843 = vmatpush.bf16.msra.mxu1 %v6605_v2 }
 0x6a1   : > { %v2125_v23 = vmax.f32 %v2092_v16, 0.0  ;;  %v2080_v24 = vpop.f32.mrf.mxu0  ;;  %2834 = vmatpush.bf16.msrb.mxu0 %v6509_v9 }
 0x6a2   : > { %v2118_v31 = vadd.f32 %v2117_v60, %v2105_v19  ;;  %2822 = vmatpush.bf16.msra.mxu2 %v6437_v8  ;;  %v2230_v8 = vperm.slane %v10622_v10, 6 }
 0x6a3   : > { %v2119_v32 = vpop.f32.mrf.mxu1  ;;  %v2131_v34 = vpack.c.bf16 %v2125_v23, %v2125_v23  ;;  %2857 = vmatpush.bf16.msrb.mxu3 %v6661_v18 }
 0x6a4   : > { %v2126_v39 = vmax.f32 %v2118_v31, 0.0  ;;  %2844 = vmatpush.bf16.msra.mxu1 %v6597_v20 }
 0x6a5   : > { %2771 = vmatmul.bf16.vlgmr.msrb.gmra.mxu2 %v2131_v34  ;;  %2835 = vmatpush.bf16.msrb.mxu0 %v6501_v30 }
 0x6a6   : > { %v2132_v43 = vpack.c.bf16 %v2126_v39, %v2126_v39  ;;  %2810 = vmatmul.bf16.vlgmr.msra.gmra.mxu3 %v10414_v12  ;;  %v2093_v44 = vpop.f32.mrf.mxu2  ;;  %v8259_v12 = vld [vmem:[%s12411_s5 + $0x214] sm:$0xf] }
 0x6a7   : > { %v2106_v45 = vpop.f32.mrf.mxu3  ;;  %2858 = vmatpush.bf16.msrb.mxu3 %v6653_v35  ;;  %2797 = vmatmul.bf16.vlgmr.msrb.gmra.mxu1 %v10405_v40  ;;  %v6570_v40 = vld [vmem:[%s12411_s5 + $0x218] sm:$0xf0]  ;;  %v8326_v44 = vld [vmem:[%s12408_s2 + $0x308] sm:$0xf0] }
 0x6a8   : > { %2784 = vmatmul.bf16.vlgmr.msra.gmra.mxu0 %v2132_v43  ;;  %2845 = vmatpush.bf16.msra.mxu1 %v6589_v37  ;;  %v6573_v54 = vor.u32 %v8259_v12, %v6570_v40  ;;  %v8321_v45 = vld [vmem:[%s12408_s2 + $0x2e0] sm:$0xf0]  ;;  %v6860_v12 = vld [vmem:[%s12408_s2 + $0x2a8] sm:$0xf]  ;;  %v8316_v40 = vld [vmem:[%s12408_s2 + $0x2b8] sm:$0xf0] }
 0x6ab   : > { %2859 = vmatpush.bf16.msrb.mxu3 %v6645_v46  ;;  %v8324_v46 = vld [vmem:[%s12408_s2 + $0x2fc] sm:$0xf] }
 0x6ac   : > { %2846 = vmatpush.bf16.msra.mxu1 %v6581_v47  ;;  %v6902_v47 = vld [vmem:[%s12408_s2 + $0x30c] sm:$0xf0] }
 0x6ad   : > { %v6905_v51 = vor.u32 %v8324_v46, %v6902_v47  ;;  %v8304_v46 = vld [vmem:[%s12408_s2 + $0x25c] sm:$0xf]  ;;  %v6822_v47 = vld [vmem:[%s12408_s2 + $0x26c] sm:$0xf0] }
 0x6af   : > { %2860 = vmatpush.bf16.msrb.mxu3 %v6637_v53  ;;  %v6861_v53 = vor.u32 %v8316_v40, %v6860_v12  ;;  %v6908_v12 = vld [vmem:[%s12408_s2 + $0x300] sm:$0xf]  ;;  %v8327_v40 = vld [vmem:[%s12408_s2 + $0x310] sm:$0xf0] }
 0x6b0   : > { %2847 = vmatpush.bf16.msra.mxu1 %v6573_v54 }
 0x6b3   : > { %2861 = vmatpush.bf16.msrb.mxu3 %v6629_v48 }
 0x6b4   : > { %2848 = vmatpush.bf16.msra.mxu1 %v6565_v59 }
 0x6b5   : > { %2823 = vmatmul.bf16.vlgmr.msra.gmra.mxu2 %v10491_v36  ;;  %v10616_v36 = vld [vmem:[%s12413_s7] sm:$0xff] }
 0x6b6   : > { %2862 = vmatmul.bf16.vlgmr.msrb.gmra.mxu3 %v2132_v43  ;;  %v2229_v5 = vperm.slane %v10616_v36, 6  ;;  %v6900_v43 = vld [vmem:[%s12408_s2 + $0x2f8] sm:$0xf] }
 0x6b7   : > { %2849 = vmatmul.bf16.vlgmr.msra.gmra.mxu1 %v2131_v34 }
 0x6b8   : > { %2836 = vmatmul.bf16.vlgmr.msrb.gmra.mxu0 %v10483_v33  ;;  %3320 = vmatpush.bf16.msrb.mxu1 %v6905_v51  ;;  %v6825_v51 = vor.u32 %v8304_v46, %v6822_v47  ;;  %v6830_v46 = vld [vmem:[%s12408_s2 + $0x274] sm:$0xf0]  ;;  %v8345_v47 = vld [vmem:[%s12408_s2 + $0x3a4] sm:$0xf] }
 0x705   : > { %v2733_v49 = vpop.f32.mrf.mxu0 }
 0x708   : > { %v2720_v60 = vpop.f32.mrf.mxu2 }
 0x709   : > { %v2721_v7 = vadd.f32 %v2720_v60, %v2229_v5  ;;  %v6840_v60 = vld [vmem:[%s12408_s2 + $0x280] sm:$0xf] }
 0x70b   : > { %v2734_v13 = vadd.f32 %v2733_v49, %v2721_v7 }
 0x70d   : > { %v2735_v62 = vpop.f32.mrf.mxu0 }
 0x70e   : > { %v8311_v62 = vld [vmem:[%s12408_s2 + $0x290] sm:$0xf0] }
 0x710   : > { %v2722_v28 = vpop.f32.mrf.mxu2 }
 0x711   : > { %v6841_v28 = vor.u32 %v8311_v62, %v6840_v60  ;;  %v6988_v60 = vld [vmem:[%s12408_s2 + $0x3a0] sm:$0xf]  ;;  %v8347_v62 = vld [vmem:[%s12408_s2 + $0x3b0] sm:$0xf0] }
 0x714   : > { %v2746_v61 = vpop.f32.mrf.mxu1 }
 0x715   : > { %v2747_v19 = vadd.f32 %v2746_v61, %v2734_v13  ;;  %v6980_v61 = vld [vmem:[%s12408_s2 + $0x398] sm:$0xf] }
 0x719   : > { %v2759_v29 = vpop.f32.mrf.mxu3 }
 0x71a   : > { %v2760_v21 = vadd.f32 %v2759_v29, %v2747_v19  ;;  %v8346_v29 = vld [vmem:[%s12408_s2 + $0x3a8] sm:$0xf0] }
 0x71c   : > { %v2748_v63 = vpop.f32.mrf.mxu1 }
 0x71d   : > { %v8344_v63 = vld [vmem:[%s12408_s2 + $0x39c] sm:$0xf] }
 0x721   : > { %v2761_v0 = vpop.f32.mrf.mxu3 }
 0x722   : > { %v6981_v0 = vor.u32 %v8346_v29, %v6980_v61  ;;  %v8299_v61 = vld [vmem:[%s12408_s2 + $0x234] sm:$0xf]  ;;  %v6802_v29 = vld [vmem:[%s12408_s2 + $0x244] sm:$0xf0] }
 0x724   : > { %v2798_v1 = vpop.f32.mrf.mxu1  ;;  %3311 = vmatpush.bf16.msra.mxu0 %v6981_v0  ;;  %v6805_v0 = vor.u32 %v8299_v61, %v6802_v29  ;;  %v6788_v61 = vld [vmem:[%s12408_s2 + $0x210] sm:$0xf]  ;;  %v8297_v29 = vld [vmem:[%s12408_s2 + $0x220] sm:$0xf0] }
 0x725   : > { %v2785_v2 = vpop.f32.mrf.mxu0  ;;  %v2799_v17 = vadd.f32 %v2798_v1, %v2230_v8  ;;  %v6982_v1 = vld [vmem:[%s12408_s2 + $0x3ac] sm:$0xf0]  ;;  %v8341_v8 = vld [vmem:[%s12408_s2 + $0x380] sm:$0xf0] }
 0x728   : > { %v2772_v3 = vpop.f32.mrf.mxu2 }
 0x729   : > { %v2811_v4 = vpop.f32.mrf.mxu3  ;;  %v2773_v26 = vadd.f32 %v2772_v3, %v2760_v21  ;;  %v6882_v3 = vld [vmem:[%s12408_s2 + $0x2e4] sm:$0xf0]  ;;  %v6800_v21 = vld [vmem:[%s12408_s2 + $0x230] sm:$0xf] }
 0x72a   : > { %v2812_v20 = vadd.f32 %v2811_v4, %v2799_v17  ;;  %v6985_v4 = vor.u32 %v8344_v63, %v6982_v1  ;;  %v8314_v17 = vld [vmem:[%s12408_s2 + $0x2ac] sm:$0xf]  ;;  %v6888_v63 = vld [vmem:[%s12408_s2 + $0x2d8] sm:$0xf] }
 0x72b   : > { %v2786_v34 = vadd.f32 %v2785_v2, %v2773_v26  ;;  %v8319_v2 = vld [vmem:[%s12408_s2 + $0x2d4] sm:$0xf]  ;;  %v8336_v26 = vld [vmem:[%s12408_s2 + $0x358] sm:$0xf0]  ;;  %v8322_v1 = vld [vmem:[%s12408_s2 + $0x2e8] sm:$0xf0] }
 0x72c   : > { %v2800_v33 = vpop.f32.mrf.mxu1  ;;  %v6885_v5 = vor.u32 %v8319_v2, %v6882_v3  ;;  %3337 = vmatpush.bf16.msra.mxu3 %v6985_v4  ;;  %v8320_v2 = vld [vmem:[%s12408_s2 + $0x2dc] sm:$0xf]  ;;  %v6890_v3 = vld [vmem:[%s12408_s2 + $0x2ec] sm:$0xf0]  ;;  %v6889_v4 = vor.u32 %v8322_v1, %v6888_v63  ;;  %v8295_v63 = vld [vmem:[%s12408_s2 + $0x214] sm:$0xf] }
 0x72d   : > { %v2787_v6 = vpop.f32.mrf.mxu0  ;;  %v10629_v41 = vadd.f32 %v2786_v34, %v9519_v57  ;;  %v6901_v57 = vor.u32 %v8326_v44, %v6900_v43  ;;  %v6820_v33 = vld [vmem:[%s12408_s2 + $0x258] sm:$0xf]  ;;  %v6920_v43 = vld [vmem:[%s12408_s2 + $0x320] sm:$0xf]  ;;  %v8331_v44 = vld [vmem:[%s12408_s2 + $0x330] sm:$0xf0] }
 0x72e   : > { %v8306_v6 = vld [vmem:[%s12408_s2 + $0x268] sm:$0xf0]  ;;  %3321 = vmatpush.bf16.msrb.mxu1 %v6885_v5  ;;  %v6842_v34 = vld [vmem:[%s12408_s2 + $0x294] sm:$0xf0]  ;;  %v6893_v5 = vor.u32 %v8320_v2, %v6890_v3  ;;  %v8335_v1 = vld [vmem:[%s12408_s2 + $0x354] sm:$0xf]  ;;  %v6789_v3 = vor.u32 %v8297_v29, %v6788_v61 }
 0x72f   : > { %3294 = vmatpush.bf16.msrb.mxu2 %v6901_v57  ;;  %v6821_v7 = vor.u32 %v8306_v6, %v6820_v33  ;;  %v6921_v57 = vor.u32 %v8331_v44, %v6920_v43  ;;  %v6968_v33 = vld [vmem:[%s12408_s2 + $0x378] sm:$0xf]  ;;  %v8342_v6 = vld [vmem:[%s12408_s2 + $0x388] sm:$0xf0]  ;;  %v6828_v43 = vld [vmem:[%s12408_s2 + $0x260] sm:$0xf] }
 0x730   : > { %v2774_v9 = vpop.f32.mrf.mxu2  ;;  %v8307_v44 = vld [vmem:[%s12408_s2 + $0x270] sm:$0xf0]  ;;  %v6950_v2 = vld [vmem:[%s12408_s2 + $0x364] sm:$0xf0] }
 0x731   : > { %v2813_v11 = vpop.f32.mrf.mxu3  ;;  %v6960_v9 = vld [vmem:[%s12408_s2 + $0x370] sm:$0xf] }
 0x732   : > { %v8339_v11 = vld [vmem:[%s12408_s2 + $0x374] sm:$0xf]  ;;  %v6961_v13 = vor.u32 %v8341_v8, %v6960_v9  ;;  %v8294_v9 = vld [vmem:[%s12408_s2 + $0x20c] sm:$0xf]  ;;  %v6782_v8 = vld [vmem:[%s12408_s2 + $0x21c] sm:$0xf0] }
 0x734   : > { %v2850_v16 = vpop.f32.mrf.mxu1  ;;  %3312 = vmatpush.bf16.msra.mxu0 %v6961_v13  ;;  %v6785_v13 = vor.u32 %v8294_v9, %v6782_v8  ;;  %v6770_v9 = vld [vmem:[%s12408_s2 + $0x1fc] sm:$0xf0]  ;;  %v8330_v8 = vld [vmem:[%s12408_s2 + $0x32c] sm:$0xf] }
 0x735   : > { %v2837_v18 = vpop.f32.mrf.mxu0 }
 0x738   : > { %v2824_v22 = vpop.f32.mrf.mxu2 }
 0x739   : > { %v2825_v23 = vadd.f32 %v2824_v22, %v2812_v20  ;;  %v2863_v24 = vpop.f32.mrf.mxu3  ;;  %v8301_v22 = vld [vmem:[%s12408_s2 + $0x240] sm:$0xf0] }
 0x73b   : > { %v2838_v27 = vadd.f32 %v2837_v18, %v2825_v23  ;;  %v6862_v18 = vld [vmem:[%s12408_s2 + $0x2bc] sm:$0xf0]  ;;  %v6801_v23 = vor.u32 %v8301_v22, %v6800_v21  ;;  %v6948_v21 = vld [vmem:[%s12408_s2 + $0x350] sm:$0xf]  ;;  %v8337_v22 = vld [vmem:[%s12408_s2 + $0x360] sm:$0xf0] }
 0x73c   : > { %v2852_v30 = vpop.f32.mrf.mxu1  ;;  %v6865_v20 = vor.u32 %v8314_v17, %v6862_v18  ;;  %v8315_v17 = vld [vmem:[%s12408_s2 + $0x2b4] sm:$0xf]  ;;  %v6870_v18 = vld [vmem:[%s12408_s2 + $0x2c4] sm:$0xf0] }
 0x73d   : > { %v2851_v31 = vadd.f32 %v2850_v16, %v2838_v27  ;;  %v2839_v32 = vpop.f32.mrf.mxu0  ;;  %v6962_v16 = vld [vmem:[%s12408_s2 + $0x384] sm:$0xf0]  ;;  %v8334_v27 = vld [vmem:[%s12408_s2 + $0x34c] sm:$0xf] }
 0x73e   : > { %v6965_v19 = vor.u32 %v8339_v11, %v6962_v16  ;;  %3322 = vmatpush.bf16.msrb.mxu1 %v6865_v20  ;;  %v8309_v32 = vld [vmem:[%s12408_s2 + $0x284] sm:$0xf]  ;;  %v6868_v11 = vld [vmem:[%s12408_s2 + $0x2b0] sm:$0xf]  ;;  %v6873_v20 = vor.u32 %v8315_v17, %v6870_v18 }
 0x73f   : > { %v2864_v35 = vadd.f32 %v2863_v24, %v2851_v31  ;;  %v6940_v24 = vld [vmem:[%s12408_s2 + $0x348] sm:$0xf]  ;;  %v6942_v31 = vld [vmem:[%s12408_s2 + $0x35c] sm:$0xf0]  ;;  %v8317_v16 = vld [vmem:[%s12408_s2 + $0x2c0] sm:$0xf0] }
 0x740   : > { %v2826_v39 = vpop.f32.mrf.mxu2  ;;  %3338 = vmatpush.bf16.msra.mxu3 %v6965_v19  ;;  %v6941_v30 = vor.u32 %v8336_v26, %v6940_v24  ;;  %v6869_v19 = vor.u32 %v8317_v16, %v6868_v11  ;;  %v8289_v24 = vld [vmem:[%s12408_s2 + $0x1e4] sm:$0xf]  ;;  %v6762_v26 = vld [vmem:[%s12408_s2 + $0x1f4] sm:$0xf0]  ;;  %v6930_v11 = vld [vmem:[%s12408_s2 + $0x33c] sm:$0xf0] }
 0x741   : > { %v10626_v37 = vadd.f32 %v2864_v35, %v9516_v55  ;;  %v2865_v38 = vpop.f32.mrf.mxu3  ;;  %v6880_v55 = vld [vmem:[%s12408_s2 + $0x2d0] sm:$0xf]  ;;  %v6945_v35 = vor.u32 %v8334_v27, %v6942_v31  ;;  %v6845_v39 = vor.u32 %v8309_v32, %v6842_v34  ;;  %v6848_v27 = vld [vmem:[%s12408_s2 + $0x288] sm:$0xf]  ;;  %v8312_v31 = vld [vmem:[%s12408_s2 + $0x298] sm:$0xf0]  ;;  %v6933_v17 = vor.u32 %v8330_v8, %v6930_v11 }
 0x742   : > { %v6881_v50 = vor.u32 %v8321_v45, %v6880_v55  ;;  %3313 = vmatpush.bf16.msra.mxu0 %v6941_v30  ;;  %v6780_v38 = vld [vmem:[%s12408_s2 + $0x208] sm:$0xf]  ;;  %v8329_v55 = vld [vmem:[%s12408_s2 + $0x324] sm:$0xf]  ;;  %v6922_v45 = vld [vmem:[%s12408_s2 + $0x334] sm:$0xf0]  ;;  %v6765_v30 = vor.u32 %v8289_v24, %v6762_v26 }
 0x743   : > { %v2869_v52 = vsel %vm338_vm0, %v10626_v37, 0.0  ;;  %3323 = vmatpush.bf16.msrb.mxu1 %v6845_v39  ;;  %v8310_v32 = vld [vmem:[%s12408_s2 + $0x28c] sm:$0xf]  ;;  %v6850_v34 = vld [vmem:[%s12408_s2 + $0x29c] sm:$0xf0]  ;;  %v10943_v26 = vld [vmem:[%s12413_s7 + $0x30] sm:$0xff] }
 0x744   : > { %v2870_v42 = vadd.f32 %v2869_v52, %v10629_v41  ;;  %3295 = vmatpush.bf16.msrb.mxu2 %v6881_v50  ;;  %v8296_v52 = vld [vmem:[%s12408_s2 + $0x218] sm:$0xf0]  ;;  %3339 = vmatpush.bf16.msra.mxu3 %v6945_v35  ;;  %v6925_v50 = vor.u32 %v8329_v55, %v6922_v45  ;;  %v6849_v35 = vor.u32 %v8312_v31, %v6848_v27  ;;  %v8305_v55 = vld [vmem:[%s12408_s2 + $0x264] sm:$0xf]  ;;  %v2896_v27 = vperm.slane %v10616_v36, 7 }
 0x745   : > { %v6853_v39 = vor.u32 %v8310_v32, %v6850_v34  ;;  %v6829_v45 = vor.u32 %v8307_v44, %v6828_v43  ;;  %v8328_v36 = vld [vmem:[%s12408_s2 + $0x318] sm:$0xf0] }
 0x746   : > { %2871 = vadd.xlane.f32.xlu2 %v2870_v42  ;;  %v6781_v42 = vor.u32 %v8296_v52, %v6780_v38  ;;  %3314 = vmatpush.bf16.msra.mxu0 %v6921_v57  ;;  %v6928_v38 = vld [vmem:[%s12408_s2 + $0x328] sm:$0xf]  ;;  %v8332_v52 = vld [vmem:[%s12408_s2 + $0x338] sm:$0xf0] }
 0x747   : > { %3324 = vmatpush.bf16.msrb.mxu1 %v6825_v51 }
 0x748   : > { %3296 = vmatpush.bf16.msrb.mxu2 %v6861_v53  ;;  %v8325_v53 = vld [vmem:[%s12408_s2 + $0x304] sm:$0xf]  ;;  %3340 = vmatpush.bf16.msra.mxu3 %v6925_v50  ;;  %v6990_v50 = vld [vmem:[%s12408_s2 + $0x3b4] sm:$0xf0] }
 0x74b   : > { %3325 = vmatpush.bf16.msrb.mxu1 %v6805_v0  ;;  %v6790_v0 = vld [vmem:[%s12408_s2 + $0x224] sm:$0xf0] }
 0x74c   : > { %3297 = vmatpush.bf16.msrb.mxu2 %v6841_v28  ;;  %v6989_v28 = vor.u32 %v8347_v62, %v6988_v60  ;;  %v6970_v60 = vld [vmem:[%s12408_s2 + $0x38c] sm:$0xf0] }
 0x74f   : > { %3326 = vmatpush.bf16.msrb.mxu1 %v6785_v13 }
 0x750   : > { %3298 = vmatpush.bf16.msrb.mxu2 %v6821_v7  ;;  %v6969_v7 = vor.u32 %v8342_v6, %v6968_v33  ;;  %v6768_v33 = vld [vmem:[%s12408_s2 + $0x1e8] sm:$0xf]  ;;  %v8292_v6 = vld [vmem:[%s12408_s2 + $0x1f8] sm:$0xf0] }
 0x751   : > { %v6769_v16 = vor.u32 %v8292_v6, %v6768_v33  ;;  %v8298_v33 = vld [vmem:[%s12408_s2 + $0x228] sm:$0xf0] }
 0x753   : > { %3327 = vmatpush.bf16.msrb.mxu1 %v6765_v30  ;;  %v2897_v30 = vperm.slane %v10622_v10, 7  ;;  %v6996_v10 = vld [vmem:[%s12408_s2 + $0x3a8] sm:$0xf] }
 0x754   : > { %3299 = vmatpush.bf16.msrb.mxu2 %v6801_v23  ;;  %v6949_v23 = vor.u32 %v8337_v22, %v6948_v21 }
 0x758   : > { %3300 = vmatpush.bf16.msrb.mxu2 %v6781_v42  ;;  %v6929_v42 = vor.u32 %v8332_v52, %v6928_v38 }
 0x7b9   : > { %v2872_v54 = vpop.xlane.xlu2 %2871 }
 0x7ba   : > { %v2873_v14 = vmul.f32 %v2872_v54, %v8929_v25  ;;  %v6909_v54 = vor.u32 %v8327_v40, %v6908_v12  ;;  %v6833_v12 = vor.u32 %v8305_v55, %v6830_v46  ;;  %v6993_v40 = vor.u32 %v8345_v47, %v6990_v50  ;;  %v8323_v47 = vld [vmem:[%s12408_s2 + $0x2f0] sm:$0xf0]  ;;  %v6976_v50 = vld [vmem:[%s12408_s2 + $0x380] sm:$0xf] }
 0x7bc   : > { %v10660_v15 = vsub.f32 %v10629_v41, %v2873_v14  ;;  %v10663_v56 = vsub.f32 %v10626_v37, %v2873_v14  ;;  %v6910_v14 = vld [vmem:[%s12408_s2 + $0x314] sm:$0xf0]  ;;  %3346 = vmatpush.bf16.msrb.mxu0 %v6909_v54  ;;  %v8302_v54 = vld [vmem:[%s12408_s2 + $0x248] sm:$0xf0]  ;;  %3389 = vmatpush.bf16.msra.mxu1 %v6993_v40 }
 0x7bd   : > { %v6876_v40 = vld [vmem:[%s12408_s2 + $0x2b8] sm:$0xf] }
 0x7be   : > { %v2876_v58 = vmul.f32 %v10660_v15, %v10660_v15  ;;  %v2877_v48 = vmul.f32 %v10663_v56, %v10663_v56 }
 0x7c0   : > { %v2878_v59 = vsel %vm338_vm0, %v2877_v48, 0.0  ;;  %v8291_v48 = vld [vmem:[%s12408_s2 + $0x1f0] sm:$0xf0]  ;;  %3347 = vmatpush.bf16.msrb.mxu0 %v6889_v4  ;;  %v6953_v4 = vor.u32 %v8335_v1, %v6950_v2  ;;  %v6816_v2 = vld [vmem:[%s12408_s2 + $0x240] sm:$0xf] }
 0x7c1   : > { %v2879_v49 = vadd.f32 %v2878_v59, %v2876_v58  ;;  %v6760_v58 = vld [vmem:[%s12408_s2 + $0x1e0] sm:$0xf]  ;;  %v6913_v59 = vor.u32 %v8325_v53, %v6910_v14  ;;  %v6808_v53 = vld [vmem:[%s12408_s2 + $0x238] sm:$0xf]  ;;  %v8300_v14 = vld [vmem:[%s12408_s2 + $0x23c] sm:$0xf] }
 0x7c3   : > { %2880 = vadd.xlane.f32.xlu1 %v2879_v49  ;;  %v6761_v49 = vor.u32 %v8291_v48, %v6760_v58  ;;  %3372 = vmatpush.bf16.msrb.mxu3 %v6913_v59  ;;  %v6810_v58 = vld [vmem:[%s12408_s2 + $0x24c] sm:$0xf0]  ;;  %v6809_v59 = vor.u32 %v8302_v54, %v6808_v53  ;;  %v8318_v54 = vld [vmem:[%s12408_s2 + $0x2c8] sm:$0xf0] }
 0x7c4   : > { %3348 = vmatpush.bf16.msrb.mxu0 %v6869_v19  ;;  %v6813_v62 = vor.u32 %v8300_v14, %v6810_v58  ;;  %v6956_v14 = vld [vmem:[%s12408_s2 + $0x358] sm:$0xf]  ;;  %v8338_v58 = vld [vmem:[%s12408_s2 + $0x368] sm:$0xf0] }
 0x7c5   : > { %3301 = vmatpush.bf16.msrb.mxu2 %v6761_v49  ;;  %v8340_v49 = vld [vmem:[%s12408_s2 + $0x37c] sm:$0xf] }
 0x7c7   : > { %3373 = vmatpush.bf16.msrb.mxu3 %v6893_v5  ;;  %v6793_v5 = vor.u32 %v8295_v63, %v6790_v0  ;;  %v6836_v63 = vld [vmem:[%s12408_s2 + $0x268] sm:$0xf]  ;;  %v8308_v0 = vld [vmem:[%s12408_s2 + $0x278] sm:$0xf0] }
 0x7c8   : > { %3349 = vmatpush.bf16.msrb.mxu0 %v6849_v35  ;;  %v6837_v1 = vor.u32 %v8308_v0, %v6836_v63 }
 0x7c9   : > { %3363 = vmatpush.bf16.msra.mxu2 %v6989_v28  ;;  %v6973_v28 = vor.u32 %v8340_v49, %v6970_v60  ;;  %v6957_v49 = vor.u32 %v8338_v58, %v6956_v14  ;;  %v8313_v60 = vld [vmem:[%s12408_s2 + $0x2a0] sm:$0xf0] }
 0x7cb   : > { %3374 = vmatpush.bf16.msrb.mxu3 %v6873_v20  ;;  %3390 = vmatpush.bf16.msra.mxu1 %v6973_v28  ;;  %v8333_v28 = vld [vmem:[%s12408_s2 + $0x340] sm:$0xf0] }
 0x7cc   : > { %3350 = vmatpush.bf16.msrb.mxu0 %v6829_v45  ;;  %v6896_v45 = vld [vmem:[%s12408_s2 + $0x2e0] sm:$0xf] }
 0x7cd   : > { %3364 = vmatpush.bf16.msra.mxu2 %v6969_v7  ;;  %v8290_v7 = vld [vmem:[%s12408_s2 + $0x1ec] sm:$0xf] }
 0x7ce   : > { %v6773_v19 = vor.u32 %v8290_v7, %v6770_v9  ;;  %v6776_v7 = vld [vmem:[%s12408_s2 + $0x1f0] sm:$0xf]  ;;  %v8293_v9 = vld [vmem:[%s12408_s2 + $0x200] sm:$0xf0] }
 0x7cf   : > { %3375 = vmatpush.bf16.msrb.mxu3 %v6853_v39  ;;  %3391 = vmatpush.bf16.msra.mxu1 %v6953_v4  ;;  %v2900_v39 = vperm.slane %v10943_v26, 0  ;;  %v6777_v8 = vor.u32 %v8293_v9, %v6776_v7  ;;  %v8676_v9 = vld [vmem:[%s12407_s1] sm:$0xff] }
 0x7d0   : > { %3351 = vmatpush.bf16.msrb.mxu0 %v6809_v59  ;;  %v6856_v59 = vld [vmem:[%s12408_s2 + $0x290] sm:$0xf] }
 0x7d1   : > { %3365 = vmatpush.bf16.msra.mxu2 %v6949_v23  ;;  %v10938_v23 = vld [vmem:[%s12413_s7 + $0x38] sm:$0xff]  ;;  %v6857_v61 = vor.u32 %v8313_v60, %v6856_v59 }
 0x7d2   : > { %v2901_v32 = vperm.slane %v10938_v23, 0 }
 0x7d3   : > { %3376 = vmatpush.bf16.msrb.mxu3 %v6833_v12  ;;  %3392 = vmatpush.bf16.msra.mxu1 %v6933_v17  ;;  %v6897_v12 = vor.u32 %v8323_v47, %v6896_v45 }
 0x7d4   : > { %3352 = vmatpush.bf16.msrb.mxu0 %v6789_v3  ;;  %v8303_v3 = vld [vmem:[%s12408_s2 + $0x250] sm:$0xf0] }
 0x7d5   : > { %3366 = vmatpush.bf16.msra.mxu2 %v6929_v42  ;;  %v6916_v42 = vld [vmem:[%s12408_s2 + $0x308] sm:$0xf]  ;;  %v6817_v4 = vor.u32 %v8303_v3, %v6816_v2 }
 0x7d7   : > { %3377 = vmatpush.bf16.msrb.mxu3 %v6813_v62  ;;  %v6936_v62 = vld [vmem:[%s12408_s2 + $0x330] sm:$0xf] }
 0x7d8   : > { %3353 = vmatpush.bf16.msrb.mxu0 %v6769_v16  ;;  %v6937_v29 = vor.u32 %v8333_v28, %v6936_v62 }
 0x7db   : > { %3378 = vmatpush.bf16.msrb.mxu3 %v6793_v5  ;;  %v6796_v5 = vld [vmem:[%s12408_s2 + $0x218] sm:$0xf] }
 0x7dc   : > { %v6797_v6 = vor.u32 %v8298_v33, %v6796_v5 }
 0x7df   : > { %3379 = vmatpush.bf16.msrb.mxu3 %v6773_v19 }
 0x836   : > { %v2881_v57 = vpop.xlane.xlu1 %2880 }
 0x837   : > { %v2882_v51 = vmul.f32 %v2881_v57, %v8929_v25  ;;  %v6917_v57 = vor.u32 %v8328_v36, %v6916_v42 }
 0x839   : > { %v2883_v48 = vadd.f32 1e-05, %v2882_v51  ;;  %v8343_v51 = vld [vmem:[%s12408_s2 + $0x390] sm:$0xf0] }
 0x83a   : > { %v6977_v53 = vor.u32 %v8343_v51, %v6976_v50 }
 0x83b   : > { %8640 = vrsqrt.f32 %v2883_v48  ;;  %vm2890_vm13 = vweird.f32 %v2883_v48 }
 0x841   : > { %v8641_v13 = vpop.eup %8640 }
 0x842   : > { %v2885_v18 = vmul.f32 %v8641_v13, %v2883_v48  ;;  %vm2891_vm12 = vweird.f32 %v8641_v13  ;;  %v6877_v48 = vor.u32 %v8318_v54, %v6876_v40 }
 0x843   : > { %vm2892_vm14 = vmor %vm2890_vm13, %vm2891_vm12 }
 0x844   : > { %v2886_v20 = vmul.f32 %v8641_v13, %v2885_v18 }
 0x846   : > { %v2887_v21 = vmul.f32 0.5, %v2886_v20 }
 0x848   : > { %v2888_v22 = vsub.f32 1.5, %v2887_v21 }
 0x84a   : > { %v2889_v24 = vmul.f32 %v8641_v13, %v2888_v22 }
 0x84c   : > { %v2893_v31 = vsel %vm2892_vm14, %v8641_v13, %v2889_v24 }
 0x84d   : > { %v2894_v34 = vmul.f32 %v2893_v31, %v10660_v15  ;;  %v2895_v35 = vmul.f32 %v2893_v31, %v10663_v56  ;;  %v8348_v15 = vld [vmem:[%s12408_s2 + $0x3b8] sm:$0xf0] }
 0x84e   : > { %v6997_v46 = vor.u32 %v8348_v15, %v6996_v10 }
 0x84f   : > { %v2898_v38 = vmul.f32 %v2896_v27, %v2894_v34  ;;  %v2899_v52 = vmul.f32 %v2897_v30, %v2895_v35 }
 0x851   : > { %v2903_v56 = vadd.f32 %v2901_v32, %v2899_v52  ;;  %v2902_v43 = vadd.f32 %v2900_v39, %v2898_v38 }
 0x853   : > { %v2905_v44 = vpack.c.bf16 %v2903_v56, %v2903_v56  ;;  %v2904_v55 = vpack.c.bf16 %v2902_v43, %v2902_v43 }
 0x855   : > { %3302 = vmatmul.bf16.vlgmr.msrb.gmra.mxu2 %v2904_v55  ;;  %6998 = vmatmul.msk.bf16.vlgmr.msra.gmra.mxu0 %vm338_vm0, %v2905_v44 }
 0x856   : > { %3328 = vmatmul.bf16.vlgmr.msrb.gmra.mxu1 %v2904_v55  ;;  %6999 = vmatmul.msk.bf16.vlgmr.msra.gmra.mxu3 %vm338_vm0, %v2905_v44 }
 0x857   : > { %3398 = vmatpush.bf16.msrb.mxu2 %v6917_v57  ;;  %3415 = vmatpush.bf16.msra.mxu0 %v6997_v46 }
 0x85b   : > { %3399 = vmatpush.bf16.msrb.mxu2 %v6897_v12  ;;  %3416 = vmatpush.bf16.msra.mxu0 %v6977_v53 }
 0x85f   : > { %3400 = vmatpush.bf16.msrb.mxu2 %v6877_v48  ;;  %3417 = vmatpush.bf16.msra.mxu0 %v6957_v49 }
 0x863   : > { %3401 = vmatpush.bf16.msrb.mxu2 %v6857_v61  ;;  %3418 = vmatpush.bf16.msra.mxu0 %v6937_v29 }
 0x865   : > { %3354 = vmatmul.bf16.vlgmr.msrb.gmra.mxu0 %v2904_v55  ;;  %7000 = vmatmul.msk.bf16.vlgmr.msra.gmra.mxu2 %vm338_vm0, %v2905_v44 }
 0x866   : > { %3380 = vmatmul.bf16.vlgmr.msrb.gmra.mxu3 %v2904_v55  ;;  %7001 = vmatmul.msk.bf16.vlgmr.msra.gmra.mxu1 %vm338_vm0, %v2905_v44 }
 0x867   : > { %3402 = vmatpush.bf16.msrb.mxu2 %v6837_v1 }
 0x86b   : > { %3403 = vmatpush.bf16.msrb.mxu2 %v6817_v4 }
 0x86f   : > { %3404 = vmatpush.bf16.msrb.mxu2 %v6797_v6 }
 0x873   : > { %3405 = vmatpush.bf16.msrb.mxu2 %v6777_v8 }
 0x875   : > { %7002 = vmatmul.msk.bf16.vlgmr.msra.gmra.mxu0 %vm338_vm0, %v2905_v44 }
 0x876   : > { %3406 = vmatmul.bf16.vlgmr.msrb.gmra.mxu2 %v2904_v55 }
 0x8d2   : > { %v3316_v11 = vpop.f32.mrf.mxu0 }
 0x8d3   : > { %v3329_v13 = vpop.f32.mrf.mxu1 }
 0x8d8   : > { %v3303_v16 = vpop.f32.mrf.mxu2 }
 0x8d9   : > { %v3317_v17 = vadd.f32 %v3316_v11, %v3303_v16  ;;  %v3342_v18 = vpop.f32.mrf.mxu3 }
 0x8da   : > { %v3343_v19 = vadd.f32 %v3342_v18, %v3329_v13  ;;  %v3318_v20 = vpop.f32.mrf.mxu0 }
 0x8db   : > { %v3424_v21 = vpack.c.bf16 %v3317_v17, %v3317_v17  ;;  %v3331_v22 = vpop.f32.mrf.mxu1 }
 0x8dc   : > { %v11028_v24 = vpack.c.bf16 %v3343_v19, %v3343_v19 }
 0x8dd   : > { %v3485_v27 = vunpack.c.l.b16 %v3424_v21 }
 0x8de   : > { %v3428_v30 = vunpack.c.l.b16 %v11028_v24 }
 0x8df   : > { %v3486_v31 = vpack.c.b16 %v3485_v27, %v3485_v27 }
 0x8e0   : > { %v3429_v32 = vpack.c.b16 %v3428_v30, %v3428_v30  ;;  %v3305_v34 = vpop.f32.mrf.mxu2 }
 0x8e1   : > { %v3344_v35 = vpop.f32.mrf.mxu3  ;;  %3487 = vrot.lane.b32.xlu1 %v3486_v31, %s8785_s22 }
 0x8e2   : > { %3430 = vrot.lane.b32.xlu2 %v3429_v32, %s12421_s21  ;;  %3489 = vrot.lane.b32.xlu0 %v3429_v32, %s12422_s18  ;;  %v3355_v39 = vpop.f32.mrf.mxu0 }
 0x8e3   : > { %v3394_v38 = vpop.f32.mrf.mxu1 }
 0x8e8   : > { %v3368_v52 = vpop.f32.mrf.mxu2 }
 0x8e9   : > { %v3369_v42 = vadd.f32 %v3368_v52, %v3355_v39  ;;  %v3381_v36 = vpop.f32.mrf.mxu3 }
 0x8ea   : > { %v3395_v10 = vadd.f32 %v3394_v38, %v3381_v36  ;;  %3605 = vrot.lane.b32.xlu2 %v3486_v31, %s12422_s18  ;;  %v3357_v15 = vpop.f32.mrf.mxu0 }
 0x8eb   : > { %v3548_v56 = vpack.c.bf16 %v3369_v42, %v3369_v42  ;;  %v3396_v43 = vpop.f32.mrf.mxu1 }
 0x8ec   : > { %v3426_v44 = vpack.c.bf16 %v3395_v10, %v3395_v10 }
 0x8ed   : > { %v3555_v55 = vsel %vm908_vm5, %v3548_v56, 0  ;;  %v3608_v57 = vunpack.c.l.b16 %v3548_v56 }
 0x8ee   : > { %v3467_v45 = vsel %vm944_vm6, %v3426_v44, 0  ;;  %3564 = vmatpush.bf16.xpose.msra.mxu2 %v3555_v55  ;;  %v3523_v14 = vunpack.c.l.b16 %v3426_v44 }
 0x8ef   : > { %v3609_v46 = vpack.c.b16 %v3608_v57, %v3608_v57  ;;  %3476 = vmatpush.bf16.msra.mxu3 %v3467_v45 }
 0x8f0   : > { %v3370_v47 = vpop.f32.mrf.mxu2  ;;  %v3524_v58 = vpack.c.b16 %v3523_v14, %v3523_v14 }
 0x8f1   : > { %v3383_v50 = vpop.f32.mrf.mxu3  ;;  %3723 = vrot.lane.b32.xlu1 %v3609_v46, %s12422_s18  ;;  %3610 = vrot.lane.b32.xlu0 %v3609_v46, %s8785_s22 }
 0x8f2   : > { %3721 = vrot.lane.b32.xlu2 %v3429_v32, %s8785_s22  ;;  %v3420_v51 = vpop.f32.mrf.mxu0 }
 0x8f9   : > { %v3407_v12 = vpop.f32.mrf.mxu2  ;;  %3549 = vrot.lane.b32.xlu0 %v3486_v31, %s12421_s21 }
 0x8fa   : > { %v11041_v40 = vadd.f32 %v3420_v51, %v3407_v12  ;;  %v3422_v53 = vpop.f32.mrf.mxu0 }
 0x8fc   : > { %v3666_v57 = vpack.c.bf16 %v11041_v40, %v11041_v40 }
 0x8fe   : > { %v3757_v45 = vunpack.c.l.b16 %v3666_v57 }
 0x901   : > { %v3409_v54 = vpop.f32.mrf.mxu2  ;;  %3667 = vrot.lane.b32.xlu0 %v3609_v46, %s12421_s21  ;;  %v3758_v46 = vpack.c.b16 %v3757_v45, %v3757_v45  ;;  %v8363_v45 = vld [vmem:[%s12409_s3 + $0x134] sm:$0xf] }
 0x909   : > { %3525 = vrot.lane.b32.xlu0 %v3524_v58, %s8785_s22 }
 0x93c   : > { %v3431_v48 = vpop.permute.xlu2 %3430 }
 0x93d   : > { %v3436_v59 = vsel %vm908_vm5, %v3431_v48, 0 }
 0x93e   : > { %3445 = vmatpush.bf16.xpose.msrb.mxu1 %v3436_v59 }
 0x944   : > { %v3606_v1 = vpop.permute.xlu2 %3605 }
 0x945   : > { %7003 = vmatmul.msk.bf16.vlgmr.msrb.gmra.mxu1 %vm908_vm5, %v3424_v21 }
 0x94c   : > { %v3722_v5 = vpop.permute.xlu2 %3721 }
 0x953   : > { %v3488_v62 = vpop.permute.xlu1 %3487 }
 0x954   : > { %v3490_v49 = vpop.permute.xlu0 %3489 }
 0x955   : > { %v3495_v60 = vsel %vm908_vm5, %v3490_v49, 0 }
 0x956   : > { %3504 = vmatpush.bf16.xpose.msrb.mxu0 %v3495_v60 }
 0x95d   : > { %7005 = vmatmul.msk.bf16.vlgmr.msrb.gmra.mxu0 %vm908_vm5, %v3488_v62 }
 0x963   : > { %v3724_v28 = vpop.permute.xlu1 %3723  ;;  %v3611_v61 = vpop.permute.xlu0 %3610 }
 0x964   : > { %v3729_v29 = vsel %vm908_vm5, %v3724_v28, 0  ;;  %v3616_v63 = vsel %vm908_vm5, %v3611_v61, 0 }
 0x965   : > { %3625 = vmatpush.bf16.xpose.msra.mxu0 %v3616_v63 }
 0x96b   : > { %v3550_v0 = vpop.permute.xlu0 %3549 }
 0x96c   : > { %7007 = vmatmul.msk.bf16.vlgmr.msra.gmra.mxu2 %vm908_vm5, %v3550_v0 }
 0x96d   : > { %3738 = vmatpush.bf16.xpose.msrb.mxu0 %v3729_v29 }
 0x96e   : > { %7009 = vmatmul.msk.bf16.vlgmr.msra.gmra.mxu0 %vm908_vm5, %v3606_v1 }
 0x973   : > { %v3668_v2 = vpop.permute.xlu0 %3667 }
 0x974   : > { %v3673_v3 = vsel %vm908_vm5, %v3668_v2, 0 }
 0x975   : > { %3682 = vmatpush.bf16.xpose.msrb.mxu2 %v3673_v3 }
 0x97b   : > { %v3526_v4 = vpop.permute.xlu0 %3525 }
 0x97c   : > { %v3531_v33 = vsel %vm944_vm6, %v3526_v4, 0  ;;  %7011 = vmatmul.msk.bf16.vlgmr.msrb.gmra.mxu2 %vm908_vm5, %v11028_v24  ;;  %v3704_v4 = vsel %vm944_vm6, %v3666_v57, 0  ;;  %v8364_v57 = vld [vmem:[%s12409_s3 + $0x134] sm:$0xf0] }
 0x97d   : > { %3540 = vmatpush.bf16.msra.mxu1 %v3531_v33 }
 0x97e   : > { %7013 = vmatmul.msk.bf16.vlgmr.msrb.gmra.mxu0 %vm908_vm5, %v3722_v5 }
 0x9c2   : > { %v3447_v6 = vpop.f32.mrf.mxu1 }
 0x9c3   : > { %v3451_v7 = vmul.f32 0.07216878, %v3447_v6 }
 0x9c5   : > { %v3452_v8 = vadd.f32 %v8676_v9, %v3451_v7 }
 0x9c7   : > { %v3453_v11 = vsel %vm930_vm7, %v3452_v8, -inf }
 0x9c8   : > { %3454 = vmax.xlane.f32.xlu2 %v3453_v11 }
 0x9ca   : > { %v3449_v13 = vpop.f32.mrf.mxu1 }
 0x9da   : > { %v3506_v16 = vpop.f32.mrf.mxu0 }
 0x9db   : > { %v3510_v31 = vmul.f32 0.07216878, %v3506_v16 }
 0x9dd   : > { %v3511_v35 = vadd.f32 %v8676_v9, %v3510_v31 }
 0x9df   : > { %v3512_v52 = vsel %vm930_vm7, %v3511_v35, -inf }
 0x9e0   : > { %3643 = vrot.lane.b32.xlu2 %v3524_v58, %s12422_s18 }
 0x9e2   : > { %v3508_v17 = vpop.f32.mrf.mxu0 }
 0x9eb   : > { %v3627_v18 = vpop.f32.mrf.mxu0 }
 0x9ec   : > { %v3631_v19 = vmul.f32 0.07216878, %v3627_v18 }
 0x9ee   : > { %v3632_v20 = vadd.f32 %v8676_v9, %v3631_v19 }
 0x9ef   : > { %v3566_v22 = vpop.f32.mrf.mxu2 }
 0x9f0   : > { %v3633_v21 = vsel %vm930_vm7, %v3632_v20, -inf  ;;  %v3570_v24 = vmul.f32 0.07216878, %v3566_v22 }
 0x9f1   : > { %3634 = vmax.xlane.f32.xlu0 %v3633_v21 }
 0x9f2   : > { %v3571_v30 = vadd.f32 %v8676_v9, %v3570_v24 }
 0x9f3   : > { %v3629_v27 = vpop.f32.mrf.mxu0 }
 0x9f4   : > { %v3572_v32 = vsel %vm930_vm7, %v3571_v30, -inf }
 0x9f5   : > { %3573 = vmax.xlane.f32.xlu1 %v3572_v32 }
 0x9f7   : > { %v3568_v34 = vpop.f32.mrf.mxu2 }
 0x9fb   : > { %v3740_v39 = vpop.f32.mrf.mxu0 }
 0x9fc   : > { %v3744_v38 = vmul.f32 0.07216878, %v3740_v39 }
 0x9fd   : > { %3513 = vmax.xlane.f32.xlu1 %v3512_v52 }
 0x9fe   : > { %v3745_v10 = vadd.f32 %v8676_v9, %v3744_v38 }
 0x9ff   : > { %v3684_v42 = vpop.f32.mrf.mxu2 }
 0xa00   : > { %v3688_v36 = vmul.f32 0.07216878, %v3684_v42  ;;  %v3746_v56 = vsel %vm930_vm7, %v3745_v10, -inf }
 0xa02   : > { %v3689_v43 = vadd.f32 %v8676_v9, %v3688_v36 }
 0xa03   : > { %v3742_v15 = vpop.f32.mrf.mxu0 }
 0xa04   : > { %v3690_v55 = vsel %vm930_vm7, %v3689_v43, -inf }
 0xa05   : > { %3582 = vrot.lane.b32.xlu0 %v3524_v58, %s12421_s21  ;;  %3747 = vmax.xlane.f32.xlu1 %v3746_v56 }
 0xa07   : > { %v3686_v44 = vpop.f32.mrf.mxu2 }
 0xa09   : > { %3691 = vmax.xlane.f32.xlu2 %v3690_v55  ;;  %v7097_v55 = vld [vmem:[%s12409_s3 + $0x130] sm:$0xf] }
 0xa1e   : > { %3759 = vrot.lane.b32.xlu1 %v3758_v46, %s8785_s22  ;;  %v7098_v46 = vor.u32 %v8364_v57, %v7097_v55  ;;  %v7043_v55 = vld [vmem:[%s12409_s3 + $0xc8] sm:$0xf0] }
 0xa20   : > { %3954 = vmatpush.bf16.msra.mxu2 %v7098_v46  ;;  %v8372_v46 = vld [vmem:[%s12409_s3 + $0x174] sm:$0xf0] }
 0xa3b   : > { %v3455_v47 = vpop.xlane.xlu2 %3454 }
 0xa3c   : > { %v3456_v50 = vsub.f32 %v3452_v8, %v3455_v47  ;;  %v7099_v47 = vld [vmem:[%s12409_s3 + $0x138] sm:$0xf0] }
 0xa3e   : > { %v3457_v51 = vmul.f32 1.442695, %v3456_v50  ;;  %v7089_v50 = vld [vmem:[%s12409_s3 + $0x120] sm:$0xf] }
 0xa40   : > { %8642 = vpow2.f32 %v3457_v51  ;;  %v8362_v51 = vld [vmem:[%s12409_s3 + $0x124] sm:$0xf0] }
 0xa43   : > { %v3644_v12 = vpop.permute.xlu2 %3643 }
 0xa44   : > { %v3649_v53 = vsel %vm944_vm6, %v3644_v12, 0  ;;  %v7102_v12 = vor.u32 %v8363_v45, %v7099_v47  ;;  %v7129_v45 = vld [vmem:[%s12409_s3 + $0x170] sm:$0xf]  ;;  %v8371_v47 = vld [vmem:[%s12409_s3 + $0x174] sm:$0xf] }
 0xa45   : > { %3658 = vmatpush.bf16.msrb.mxu1 %v3649_v53  ;;  %v8361_v53 = vld [vmem:[%s12409_s3 + $0x124] sm:$0xf] }
 0xa46   : > { %v8643_v54 = vpop.eup %8642  ;;  %3980 = vmatpush.bf16.msra.mxu0 %v7102_v12  ;;  %v7121_v12 = vld [vmem:[%s12409_s3 + $0x160] sm:$0xf] }
 0xa47   : > { %v3462_v14 = vpack.c.bf16 %v8643_v54, %v8643_v54  ;;  %v3459_v19 = vsel %vm930_vm7, %v8643_v54, 0.0  ;;  %v7091_v54 = vld [vmem:[%s12409_s3 + $0x128] sm:$0xf0] }
 0xa49   : > { %7004 = vmatmul.msk.bf16.vlgmr.msra.gmra.mxu3 %vm930_vm7, %v3462_v14 }
 0xa64   : > { %v3635_v58 = vpop.xlane.xlu0 %3634 }
 0xa65   : > { %v3636_v48 = vsub.f32 %v3632_v20, %v3635_v58  ;;  %v7090_v58 = vor.u32 %v8362_v51, %v7089_v50  ;;  %v7130_v50 = vor.u32 %v8372_v46, %v7129_v45  ;;  %v7131_v51 = vld [vmem:[%s12409_s3 + $0x178] sm:$0xf0]  ;;  %v7355_v45 = vld [vmem:[%s12410_s4 + $0x360] sm:$0xf]  ;;  %v8412_v46 = vld [vmem:[%s12410_s4 + $0x374] sm:$0xf0] }
 0xa67   : > { %v3637_v59 = vmul.f32 1.442695, %v3636_v48  ;;  %v7094_v48 = vor.u32 %v8361_v53, %v7091_v54  ;;  %3955 = vmatpush.bf16.msra.mxu2 %v7090_v58  ;;  %v8370_v53 = vld [vmem:[%s12409_s3 + $0x164] sm:$0xf0]  ;;  %v7134_v54 = vor.u32 %v8371_v47, %v7131_v51  ;;  %v7123_v58 = vld [vmem:[%s12409_s3 + $0x168] sm:$0xf0] }
 0xa68   : > { %v3574_v40 = vpop.xlane.xlu1 %3573  ;;  %v7357_v51 = vld [vmem:[%s12410_s4 + $0x378] sm:$0xf0] }
 0xa69   : > { %8644 = vpow2.f32 %v3637_v59  ;;  %v3575_v49 = vsub.f32 %v3571_v30, %v3574_v40  ;;  %v7081_v59 = vld [vmem:[%s12409_s3 + $0x110] sm:$0xf]  ;;  %v8360_v40 = vld [vmem:[%s12409_s3 + $0x114] sm:$0xf0]  ;;  %3981 = vmatpush.bf16.msra.mxu0 %v7094_v48  ;;  %v7122_v48 = vor.u32 %v8370_v53, %v7121_v12  ;;  %v7356_v12 = vor.u32 %v8412_v46, %v7355_v45  ;;  %v7237_v45 = vld [vmem:[%s12410_s4 + $0x288] sm:$0xf0] }
 0xa6a   : > { %v7403_v46 = vld [vmem:[%s12410_s4 + $0x3c0] sm:$0xf] }
 0xa6b   : > { %v3576_v60 = vmul.f32 1.442695, %v3575_v49  ;;  %v8359_v49 = vld [vmem:[%s12409_s3 + $0x114] sm:$0xf] }
 0xa6d   : > { %8646 = vpow2.f32 %v3576_v60  ;;  %v7083_v60 = vld [vmem:[%s12409_s3 + $0x118] sm:$0xf0] }
 0xa6f   : > { %v8645_v62 = vpop.eup %8644 }
 0xa70   : > { %v3639_v28 = vsel %vm930_vm7, %v8645_v62, 0.0  ;;  %v3514_v61 = vpop.xlane.xlu1 %3513  ;;  %v3642_v24 = vpack.c.bf16 %v8645_v62, %v8645_v62  ;;  %v7082_v62 = vor.u32 %v8360_v40, %v7081_v59  ;;  %v7113_v40 = vld [vmem:[%s12409_s3 + $0x150] sm:$0xf] }
 0xa71   : > { %3640 = vadd.xlane.f32.xlu2 %v3639_v28  ;;  %v3515_v29 = vsub.f32 %v3511_v35, %v3514_v61 }
 0xa72   : > { %3956 = vmatpush.bf16.msra.mxu2 %v7082_v62  ;;  %v7115_v62 = vld [vmem:[%s12409_s3 + $0x158] sm:$0xf0] }
 0xa73   : > { %v8647_v63 = vpop.eup %8646  ;;  %v3516_v0 = vmul.f32 1.442695, %v3515_v29  ;;  %v7086_v29 = vor.u32 %v8359_v49, %v7083_v60  ;;  %v8368_v49 = vld [vmem:[%s12409_s3 + $0x154] sm:$0xf0]  ;;  %v8367_v60 = vld [vmem:[%s12409_s3 + $0x154] sm:$0xf] }
 0xa74   : > { %v3578_v1 = vsel %vm930_vm7, %v8647_v63, 0.0  ;;  %v3581_v33 = vpack.c.bf16 %v8647_v63, %v8647_v63  ;;  %v7073_v63 = vld [vmem:[%s12409_s3 + $0x100] sm:$0xf] }
 0xa75   : > { %8648 = vpow2.f32 %v3516_v0  ;;  %3579 = vadd.xlane.f32.xlu1 %v3578_v1  ;;  %v8358_v0 = vld [vmem:[%s12409_s3 + $0x104] sm:$0xf0]  ;;  %3982 = vmatpush.bf16.msra.mxu0 %v7086_v29 }
 0xa77   : > { %v3583_v2 = vpop.permute.xlu0 %3582 }
 0xa78   : > { %v3588_v3 = vsel %vm944_vm6, %v3583_v2, 0  ;;  %v3748_v5 = vpop.xlane.xlu1 %3747  ;;  %v8357_v2 = vld [vmem:[%s12409_s3 + $0x104] sm:$0xf] }
 0xa79   : > { %3597 = vmatpush.bf16.msrb.mxu3 %v3588_v3  ;;  %v3749_v6 = vsub.f32 %v3745_v10, %v3748_v5  ;;  %v7075_v3 = vld [vmem:[%s12409_s3 + $0x108] sm:$0xf0]  ;;  %v7074_v5 = vor.u32 %v8358_v0, %v7073_v63 }
 0xa7b   : > { %v8649_v7 = vpop.eup %8648  ;;  %v3750_v9 = vmul.f32 1.442695, %v3749_v6  ;;  %v7065_v6 = vld [vmem:[%s12409_s3 + $0xf0] sm:$0xf]  ;;  %3957 = vmatpush.bf16.msra.mxu2 %v7074_v5  ;;  %v8366_v5 = vld [vmem:[%s12409_s3 + $0x144] sm:$0xf0] }
 0xa7c   : > { %7008 = vmatmul.msk.bf16.vlgmr.msrb.gmra.mxu3 %vm930_vm7, %v3581_v33  ;;  %v3521_v8 = vpack.c.bf16 %v8649_v7, %v8649_v7  ;;  %v3692_v11 = vpop.xlane.xlu2 %3691  ;;  %v3518_v13 = vsel %vm930_vm7, %v8649_v7, 0.0  ;;  %v7078_v33 = vor.u32 %v8357_v2, %v7075_v3  ;;  %v8356_v7 = vld [vmem:[%s12409_s3 + $0xf4] sm:$0xf0]  ;;  %v7105_v3 = vld [vmem:[%s12409_s3 + $0x140] sm:$0xf] }
 0xa7d   : > { %3713 = vmatpush.bf16.msra.mxu3 %v3704_v4  ;;  %8650 = vpow2.f32 %v3750_v9  ;;  %v3693_v16 = vsub.f32 %v3689_v43, %v3692_v11  ;;  %3519 = vadd.xlane.f32.xlu0 %v3518_v13  ;;  %v8355_v9 = vld [vmem:[%s12409_s3 + $0xf4] sm:$0xf]  ;;  %v7066_v13 = vor.u32 %v8356_v7, %v7065_v6  ;;  %v7106_v7 = vor.u32 %v8366_v5, %v7105_v3  ;;  %v8397_v3 = vld [vmem:[%s12410_s4 + $0x304] sm:$0xf] }
 0xa7e   : > { %7006 = vmatmul.msk.bf16.vlgmr.msra.gmra.mxu1 %vm930_vm7, %v3521_v8  ;;  %v7067_v8 = vld [vmem:[%s12409_s3 + $0xf8] sm:$0xf0]  ;;  %3983 = vmatpush.bf16.msra.mxu0 %v7078_v33  ;;  %v8365_v33 = vld [vmem:[%s12409_s3 + $0x144] sm:$0xf] }
 0xa7f   : > { %v3694_v17 = vmul.f32 1.442695, %v3693_v16  ;;  %3958 = vmatpush.bf16.msra.mxu2 %v7066_v13 }
 0xa81   : > { %8652 = vpow2.f32 %v3694_v17  ;;  %v7070_v17 = vor.u32 %v8355_v9, %v7067_v8  ;;  %3971 = vmatpush.bf16.msrb.mxu3 %v7130_v50  ;;  %v8409_v50 = vld [vmem:[%s12410_s4 + $0x364] sm:$0xf] }
 0xa82   : > { %v7360_v53 = vor.u32 %v8409_v50, %v7357_v51 }
 0xa83   : > { %v8651_v18 = vpop.eup %8650  ;;  %3984 = vmatpush.bf16.msra.mxu0 %v7070_v17 }
 0xa84   : > { %v3752_v20 = vsel %vm930_vm7, %v8651_v18, 0.0  ;;  %v3755_v32 = vpack.c.bf16 %v8651_v18, %v8651_v18 }
 0xa85   : > { %3460 = vadd.xlane.f32.xlu0 %v3459_v19  ;;  %3753 = vadd.xlane.f32.xlu2 %v3752_v20 }
 0xa86   : > { %3972 = vmatpush.bf16.msrb.mxu3 %v7122_v48  ;;  %v7333_v48 = vld [vmem:[%s12410_s4 + $0x348] sm:$0xf0] }
 0xa87   : > { %v8653_v21 = vpop.eup %8652 }
 0xa88   : > { %v3699_v22 = vpack.c.bf16 %v8653_v21, %v8653_v21  ;;  %v3696_v27 = vsel %vm930_vm7, %v8653_v21, 0.0 }
 0xa8c   : > { %7012 = vmatmul.msk.bf16.vlgmr.msra.gmra.mxu3 %vm930_vm7, %v3699_v22 }
 0xa8d   : > { %3697 = vadd.xlane.f32.xlu2 %v3696_v27  ;;  %v8354_v27 = vld [vmem:[%s12409_s3 + $0xe4] sm:$0xf0] }
 0xa8e   : > { %7010 = vmatmul.msk.bf16.vlgmr.msrb.gmra.mxu1 %vm930_vm7, %v3642_v24  ;;  %v7057_v24 = vld [vmem:[%s12409_s3 + $0xe0] sm:$0xf] }
 0xa90   : > { %v3760_v30 = vpop.permute.xlu1 %3759 }
 0xa91   : > { %v3765_v31 = vsel %vm944_vm6, %v3760_v30, 0  ;;  %v8353_v30 = vld [vmem:[%s12409_s3 + $0xe4] sm:$0xf] }
 0xa92   : > { %3774 = vmatpush.bf16.msra.mxu1 %v3765_v31  ;;  %v7058_v31 = vor.u32 %v8354_v27, %v7057_v24 }
 0xa94   : > { %3959 = vmatpush.bf16.msra.mxu2 %v7058_v31 }
 0xa96   : > { %3997 = vmatpush.bf16.msrb.mxu1 %v7134_v54  ;;  %v7331_v54 = vld [vmem:[%s12410_s4 + $0x330] sm:$0xf] }
 0xa9e   : > { %7014 = vmatmul.msk.bf16.vlgmr.msra.gmra.mxu1 %vm930_vm7, %v3755_v32  ;;  %v7059_v32 = vld [vmem:[%s12409_s3 + $0xe8] sm:$0xf0] }
 0xacc   : > { %v11088_v34 = vpop.f32.mrf.mxu3 }
 0xad4   : > { %v3480_v35 = vpop.f32.mrf.mxu3 }
 0xad5   : > { %v7049_v35 = vld [vmem:[%s12409_s3 + $0xd0] sm:$0xf] }
 0xae4   : > { %v3641_v43 = vpop.xlane.xlu2 %3640 }
 0xae8   : > { %v3580_v38 = vpop.xlane.xlu1 %3579 }
 0xaf0   : > { %v3520_v39 = vpop.xlane.xlu0 %3519 }
 0xaf1   : > { %8654 = vrcp.f32 %v3520_v39  ;;  %v8352_v39 = vld [vmem:[%s12409_s3 + $0xd4] sm:$0xf0] }
 0xaf2   : > { %8656 = vrcp.f32 %v3580_v38  ;;  %v7062_v38 = vor.u32 %v8353_v30, %v7059_v32  ;;  %v3830_v32 = vperm.slane %v10938_v23, 1 }
 0xaf3   : > { %8658 = vrcp.f32 %v3641_v43  ;;  %v8349_v43 = vld [vmem:[%s12409_s3 + $0xc4] sm:$0xf] }
 0xaf4   : > { %3985 = vmatpush.bf16.msra.mxu0 %v7062_v38  ;;  %v7046_v57 = vor.u32 %v8349_v43, %v7043_v55  ;;  %v3829_v38 = vperm.slane %v10943_v26, 1  ;;  %v7379_v26 = vld [vmem:[%s12410_s4 + $0x390] sm:$0xf] }
 0xaf7   : > { %v8655_v52 = vpop.eup %8654 }
 0xaf8   : > { %v8657_v10 = vpop.eup %8656  ;;  %v3754_v11 = vpop.xlane.xlu2 %3753 }
 0xaf9   : > { %v8659_v28 = vpop.eup %8658  ;;  %8660 = vrcp.f32 %v3754_v11  ;;  %v3461_v29 = vpop.xlane.xlu0 %3460 }
 0xafa   : > { %8662 = vrcp.f32 %v3461_v29 }
 0xafb   : > { %v3542_v42 = vpop.f32.mrf.mxu1 }
 0xafc   : > { %v3547_v36 = vmul.f32 %v8655_v52, %v3542_v42  ;;  %v8351_v52 = vld [vmem:[%s12409_s3 + $0xd4] sm:$0xf]  ;;  %v7051_v42 = vld [vmem:[%s12409_s3 + $0xd8] sm:$0xf0] }
 0xafe   : > { %3783 = vrot.lane.b32.xlu0 %v3547_v36, %s12422_s18  ;;  %v7050_v36 = vor.u32 %v8352_v39, %v7049_v35 }
 0xaff   : > { %v3599_v15 = vpop.f32.mrf.mxu3  ;;  %v8661_v19 = vpop.eup %8660 }
 0xb00   : > { %v3604_v56 = vmul.f32 %v8657_v10, %v3599_v15  ;;  %v7054_v10 = vor.u32 %v8351_v52, %v7051_v42  ;;  %3960 = vmatpush.bf16.msra.mxu2 %v7050_v36  ;;  %v7041_v15 = vld [vmem:[%s12409_s3 + $0xc0] sm:$0xf]  ;;  %v8663_v63 = vpop.eup %8662  ;;  %v3698_v0 = vpop.xlane.xlu2 %3697 }
 0xb01   : > { %8664 = vrcp.f32 %v3698_v0 }
 0xb02   : > { %3787 = vrot.lane.b32.xlu1 %v3604_v56, %s12421_s21  ;;  %3986 = vmatpush.bf16.msra.mxu0 %v7054_v10  ;;  %v8350_v56 = vld [vmem:[%s12409_s3 + $0xc4] sm:$0xf0] }
 0xb03   : > { %v3544_v44 = vpop.f32.mrf.mxu1 }
 0xb04   : > { %v7042_v44 = vor.u32 %v8350_v56, %v7041_v15 }
 0xb06   : > { %3961 = vmatpush.bf16.msra.mxu2 %v7042_v44  ;;  %3987 = vmatpush.bf16.msra.mxu0 %v7046_v57  ;;  %v7381_v57 = vld [vmem:[%s12410_s4 + $0x3a8] sm:$0xf0] }
 0xb07   : > { %v3601_v14 = vpop.f32.mrf.mxu3 }
 0xb08   : > { %v8369_v14 = vld [vmem:[%s12409_s3 + $0x164] sm:$0xf] }
 0xb09   : > { %v7126_v59 = vor.u32 %v8369_v14, %v7123_v58  ;;  %v8406_v14 = vld [vmem:[%s12410_s4 + $0x344] sm:$0xf0]  ;;  %v8403_v58 = vld [vmem:[%s12410_s4 + $0x334] sm:$0xf] }
 0xb0b   : > { %v3660_v61 = vpop.f32.mrf.mxu1  ;;  %3998 = vmatpush.bf16.msrb.mxu1 %v7126_v59  ;;  %v7332_v59 = vor.u32 %v8406_v14, %v7331_v54  ;;  %v7387_v54 = vld [vmem:[%s12410_s4 + $0x398] sm:$0xf] }
 0xb0c   : > { %v3665_v1 = vmul.f32 %v8659_v28, %v3660_v61  ;;  %v7114_v28 = vor.u32 %v8368_v49, %v7113_v40  ;;  %v7118_v61 = vor.u32 %v8367_v60, %v7115_v62  ;;  %v7336_v40 = vor.u32 %v8403_v58, %v7333_v48  ;;  %v8419_v58 = vld [vmem:[%s12410_s4 + $0x3ac] sm:$0xf0]  ;;  %v8416_v48 = vld [vmem:[%s12410_s4 + $0x39c] sm:$0xf] }
 0xb0e   : > { %3791 = vrot.lane.b32.xlu2 %v3665_v1, %s8785_s22  ;;  %3973 = vmatpush.bf16.msrb.mxu3 %v7114_v28  ;;  %v3483_v1 = vmul.f32 %v8663_v63, %v11088_v34  ;;  %v7107_v34 = vld [vmem:[%s12409_s3 + $0x148] sm:$0xf0]  ;;  %s5572_s22 = sshll.u32 %s5568_s13, 4  ;;  %s5573_s22 = int_to_ptr.hbm [resolvable:$true] %s5572_s22 }
 0xb0f   : > { %v11140_v4 = vpop.f32.mrf.mxu3  ;;  %3999 = vmatpush.bf16.msrb.mxu1 %v7118_v61  ;;  %v7110_v9 = vor.u32 %v8365_v33, %v7107_v34  ;;  %v7309_v33 = vld [vmem:[%s12410_s4 + $0x318] sm:$0xf0]  ;;  %s8725_s17 = sshra.s32 %s5573_s22, 4  ;;  %s8726_s17 = int_to_ptr.hbm [resolvable:$true] %s8725_s17 }
 0xb10   : > { %v7312_v34 = vor.u32 %v8397_v3, %v7309_v33  ;;  %v8440_v33 = vld [vmem:[%s12410_s4 + $0x45c] sm:$0xf]  ;;  %s8727_s21 = scalar_lea.hbm %s8726_s17, 4  ;;  %p8732_p3 = scmp.lt.s32.totalorder %s8726_s17, %s12414_s8 }
 0xb11   : > { %p8728_p0 = scmp.ne.s32.totalorder %s8726_s17, %s8727_s21  ;;  %p8733_p4 = scmp.lt.s32.totalorder %s8731_s23, %s8727_s21 }
 0xb12   : > { %3974 = vmatpush.bf16.msrb.mxu3 %v7106_v7  ;;  %v8442_v7 = vld [vmem:[%s12410_s4 + $0x464] sm:$0xf0] }
 0xb13   : > { %v3662_v16 = vpop.f32.mrf.mxu1  ;;  %4000 = vmatpush.bf16.msrb.mxu1 %v7110_v9  ;;  %p8729_p1 = pnand %p8728_p0, %p8869_p5  ;;  %p8734_p7 = por %p8733_p4, %p8732_p3 }
 0xb15   : > { %p8730_p2 = pneg %p8729_p1 }
 0xb17   : > { %v3717_v18 = vpop.f32.mrf.mxu3  ;;  %p8735_p8 = pnand %p8734_p7, %p8730_p2 }
 0xb18   : > { %v8665_v18 = vpop.eup %8664 }
 0xb1b   : > { %v3776_v20 = vpop.f32.mrf.mxu1 }
 0xb1c   : > { %v3781_v21 = vmul.f32 %v8661_v19, %v3776_v20  ;;  %v3720_v19 = vmul.f32 %v8665_v18, %v11140_v4  ;;  %v8391_v18 = vld [vmem:[%s12410_s4 + $0x2d4] sm:$0xf] }
 0xb1e   : > { %3795 = vrot.lane.b32.xlu0 %v3781_v21, %s12422_s18 }
 0xb23   : > { %v3778_v22 = vpop.f32.mrf.mxu1 }
 0xb68   : > { %v3792_v11 = vpop.permute.xlu2 %3791 }
 0xb70   : > { %v3784_v2 = vpop.permute.xlu0 %3783 }
 0xb71   : > { %v3798_v6 = vsel %vm908_vm5, %v3483_v1, %v3784_v2  ;;  %v7307_v1 = vld [vmem:[%s12410_s4 + $0x300] sm:$0xf]  ;;  %v8400_v2 = vld [vmem:[%s12410_s4 + $0x314] sm:$0xf0] }
 0xb72   : > { %v7308_v5 = vor.u32 %v8400_v2, %v7307_v1  ;;  %v7483_v1 = vld [vmem:[%s12410_s4 + $0x458] sm:$0xf]  ;;  %v8443_v2 = vld [vmem:[%s12410_s4 + $0x46c] sm:$0xf0] }
 0xb74   : > { %v3788_v8 = vpop.permute.xlu1 %3787 }
 0xb75   : > { %v3799_v13 = vsel %vm338_vm0, %v3798_v6, %v3788_v8  ;;  %v7475_v6 = vld [vmem:[%s12410_s4 + $0x450] sm:$0xf]  ;;  %v8439_v8 = vld [vmem:[%s12410_s4 + $0x454] sm:$0xf] }
 0xb76   : > { %v3800_v16 = vsel %vm1279_vm8, %v3799_v13, %v3792_v11  ;;  %v7476_v9 = vor.u32 %v8442_v7, %v7475_v6  ;;  %v7477_v11 = vld [vmem:[%s12410_s4 + $0x468] sm:$0xf0]  ;;  %v7485_v6 = vld [vmem:[%s12410_s4 + $0x470] sm:$0xf0]  ;;  %v7363_v7 = vld [vmem:[%s12410_s4 + $0x368] sm:$0xf] }
 0xb77   : > { %v3802_v17 = vpack.c.bf16 %v3800_v16, %v3800_v16  ;;  %v7480_v13 = vor.u32 %v8439_v8, %v7477_v11  ;;  %v7283_v16 = vld [vmem:[%s12410_s4 + $0x2d0] sm:$0xf]  ;;  %v8410_v8 = vld [vmem:[%s12410_s4 + $0x36c] sm:$0xf]  ;;  %v7365_v11 = vld [vmem:[%s12410_s4 + $0x380] sm:$0xf0] }
 0xb78   : > { %4504 = vmatpush.bf16.msra.mxu1 %v7476_v9  ;;  %v8413_v9 = vld [vmem:[%s12410_s4 + $0x37c] sm:$0xf0] }
 0xb79   : > { %3962 = vmatmul.bf16.vlgmr.msra.gmra.mxu2 %v3802_v17  ;;  %3988 = vmatmul.bf16.vlgmr.msra.gmra.mxu0 %v3802_v17  ;;  %v8394_v17 = vld [vmem:[%s12410_s4 + $0x2e4] sm:$0xf0] }
 0xb7a   : > { %4530 = vmatpush.bf16.msrb.mxu0 %v7480_v13  ;;  %v7364_v13 = vor.u32 %v8413_v9, %v7363_v7  ;;  %v8377_v7 = vld [vmem:[%s12410_s4 + $0x25c] sm:$0xf0]  ;;  %v7221_v9 = vld [vmem:[%s12410_s4 + $0x260] sm:$0xf0] }
 0xb90   : > { %v3796_v20 = vpop.permute.xlu0 %3795 }
 0xb91   : > { %v3801_v21 = vsel %vm908_vm5, %v3720_v19, %v3796_v20  ;;  %v7284_v19 = vor.u32 %v8394_v17, %v7283_v16  ;;  %v7285_v20 = vld [vmem:[%s12410_s4 + $0x2e8] sm:$0xf0]  ;;  %v7368_v16 = vor.u32 %v8410_v8, %v7365_v11  ;;  %v7459_v17 = vld [vmem:[%s12410_s4 + $0x428] sm:$0xf] }
 0xb92   : > { %v3803_v22 = vpack.c.bf16 %v3801_v21, %v3801_v21  ;;  %v7451_v21 = vld [vmem:[%s12410_s4 + $0x420] sm:$0xf] }
 0xb94   : > { %7135 = vmatmul.msk.bf16.vlgmr.msrb.gmra.mxu3 %vm338_vm0, %v3803_v22  ;;  %7136 = vmatmul.msk.bf16.vlgmr.msrb.gmra.mxu1 %vm338_vm0, %v3803_v22  ;;  %v8436_v22 = vld [vmem:[%s12410_s4 + $0x434] sm:$0xf0] }
 0xbf6   : > { %v3989_v24 = vpop.f32.mrf.mxu0 }
 0xbf7   : > { %v3990_v35 = vadd.f32 %v3989_v24, %v3830_v32  ;;  %v7288_v24 = vor.u32 %v8391_v18, %v7285_v20  ;;  %v8437_v18 = vld [vmem:[%s12410_s4 + $0x43c] sm:$0xf0] }
 0xbf8   : > { %v7460_v20 = vor.u32 %v8437_v18, %v7459_v17 }
 0xbfc   : > { %v3963_v27 = vpop.f32.mrf.mxu2 }
 0xbfd   : > { %v3964_v4 = vadd.f32 %v3963_v27, %v3829_v38  ;;  %v7452_v27 = vor.u32 %v8436_v22, %v7451_v21  ;;  %v8385_v38 = vld [vmem:[%s12410_s4 + $0x2a4] sm:$0xf]  ;;  %v7339_v22 = vld [vmem:[%s12410_s4 + $0x338] sm:$0xf] }
 0xbfe   : > { %v3991_v30 = vpop.f32.mrf.mxu0  ;;  %v7461_v21 = vld [vmem:[%s12410_s4 + $0x440] sm:$0xf0] }
 0xbff   : > { %v8433_v30 = vld [vmem:[%s12410_s4 + $0x424] sm:$0xf]  ;;  %4505 = vmatpush.bf16.msra.mxu1 %v7452_v27 }
 0xc04   : > { %v3965_v31 = vpop.f32.mrf.mxu2 }
 0xc05   : > { %v7453_v31 = vld [vmem:[%s12410_s4 + $0x438] sm:$0xf0] }
 0xc06   : > { %v7456_v32 = vor.u32 %v8433_v30, %v7453_v31  ;;  %v8404_v31 = vld [vmem:[%s12410_s4 + $0x33c] sm:$0xf] }
 0xc08   : > { %4531 = vmatpush.bf16.msrb.mxu0 %v7456_v32  ;;  %v7341_v32 = vld [vmem:[%s12410_s4 + $0x350] sm:$0xf0] }
 0xc11   : > { %v4002_v39 = vpop.f32.mrf.mxu1 }
 0xc12   : > { %v4003_v52 = vadd.f32 %v4002_v39, %v3990_v35  ;;  %v7259_v35 = vld [vmem:[%s12410_s4 + $0x2a0] sm:$0xf]  ;;  %v8388_v39 = vld [vmem:[%s12410_s4 + $0x2b4] sm:$0xf0] }
 0xc14   : > { %v11251_v42 = vadd.f32 %v4003_v52, %v10626_v37  ;;  %v8418_v37 = vld [vmem:[%s12410_s4 + $0x3a4] sm:$0xf0]  ;;  %v7260_v52 = vor.u32 %v8388_v39, %v7259_v35  ;;  %v7344_v35 = vor.u32 %v8404_v31, %v7341_v32  ;;  %v7435_v39 = vld [vmem:[%s12410_s4 + $0x3f8] sm:$0xf] }
 0xc15   : > { %v7380_v55 = vor.u32 %v8418_v37, %v7379_v26  ;;  %v7235_v37 = vld [vmem:[%s12410_s4 + $0x270] sm:$0xf] }
 0xc16   : > { %v4008_v43 = vsel %vm338_vm0, %v11251_v42, 0.0 }
 0xc17   : > { %v3976_v36 = vpop.f32.mrf.mxu3  ;;  %4487 = vmatpush.bf16.msra.mxu3 %v7380_v55  ;;  %v8379_v55 = vld [vmem:[%s12410_s4 + $0x274] sm:$0xf] }
 0xc18   : > { %v3977_v10 = vadd.f32 %v3976_v36, %v3964_v4  ;;  %v7261_v4 = vld [vmem:[%s12410_s4 + $0x2b8] sm:$0xf0]  ;;  %v7427_v36 = vld [vmem:[%s12410_s4 + $0x3f0] sm:$0xf]  ;;  %v7240_v50 = vor.u32 %v8379_v55, %v7237_v45  ;;  %v8425_v55 = vld [vmem:[%s12410_s4 + $0x3dc] sm:$0xf0] }
 0xc19   : > { %v4004_v15 = vpop.f32.mrf.mxu1 }
 0xc1a   : > { %v11254_v56 = vadd.f32 %v3977_v10, %v10629_v41  ;;  %v8415_v41 = vld [vmem:[%s12410_s4 + $0x394] sm:$0xf]  ;;  %v8430_v10 = vld [vmem:[%s12410_s4 + $0x404] sm:$0xf0]  ;;  %v7264_v15 = vor.u32 %v8385_v38, %v7261_v4  ;;  %v8431_v38 = vld [vmem:[%s12410_s4 + $0x40c] sm:$0xf0] }
 0xc1b   : > { %v7384_v47 = vor.u32 %v8415_v41, %v7381_v57  ;;  %4488 = vmatpush.bf16.msra.mxu3 %v7356_v12  ;;  %v8382_v41 = vld [vmem:[%s12410_s4 + $0x284] sm:$0xf0]  ;;  %v8421_v12 = vld [vmem:[%s12410_s4 + $0x3c4] sm:$0xf]  ;;  %v7436_v4 = vor.u32 %v8431_v38, %v7435_v39 }
 0xc1c   : > { %v4009_v23 = vadd.f32 %v4008_v43, %v11254_v56  ;;  %v7428_v43 = vor.u32 %v8430_v10, %v7427_v36  ;;  %v7236_v57 = vor.u32 %v8382_v41, %v7235_v37  ;;  %v7437_v36 = vld [vmem:[%s12410_s4 + $0x410] sm:$0xf0]  ;;  %v7315_v10 = vld [vmem:[%s12410_s4 + $0x308] sm:$0xf] }
 0xc1d   : > { %4513 = vmatpush.bf16.msrb.mxu2 %v7384_v47  ;;  %v8424_v47 = vld [vmem:[%s12410_s4 + $0x3d4] sm:$0xf0]  ;;  %v7411_v41 = vld [vmem:[%s12410_s4 + $0x3c8] sm:$0xf] }
 0xc1e   : > { %4010 = vadd.xlane.f32.xlu1 %v4009_v23  ;;  %v8427_v23 = vld [vmem:[%s12410_s4 + $0x3f4] sm:$0xf]  ;;  %4506 = vmatpush.bf16.msra.mxu1 %v7428_v43  ;;  %v7404_v51 = vor.u32 %v8424_v47, %v7403_v46  ;;  %v7412_v45 = vor.u32 %v8425_v55, %v7411_v41  ;;  %v7413_v46 = vld [vmem:[%s12410_s4 + $0x3e0] sm:$0xf0]  ;;  %v7291_v47 = vld [vmem:[%s12410_s4 + $0x2d8] sm:$0xf] }
 0xc1f   : > { %v3978_v44 = vpop.f32.mrf.mxu3  ;;  %4489 = vmatpush.bf16.msra.mxu3 %v7332_v59  ;;  %v7389_v59 = vld [vmem:[%s12410_s4 + $0x3b0] sm:$0xf0] }
 0xc20   : > { %v7429_v44 = vld [vmem:[%s12410_s4 + $0x408] sm:$0xf0] }
 0xc21   : > { %4514 = vmatpush.bf16.msrb.mxu2 %v7360_v53  ;;  %v7432_v26 = vor.u32 %v8427_v23, %v7429_v44  ;;  %v7405_v53 = vld [vmem:[%s12410_s4 + $0x3d8] sm:$0xf0]  ;;  %v8398_v44 = vld [vmem:[%s12410_s4 + $0x30c] sm:$0xf] }
 0xc22   : > { %v7408_v14 = vor.u32 %v8421_v12, %v7405_v53  ;;  %4507 = vmatpush.bf16.msra.mxu1 %v7404_v51 }
 0xc23   : > { %4490 = vmatpush.bf16.msra.mxu3 %v7308_v5  ;;  %4532 = vmatpush.bf16.msrb.mxu0 %v7432_v26  ;;  %v7484_v5 = vor.u32 %v8443_v2, %v7483_v1  ;;  %v7317_v26 = vld [vmem:[%s12410_s4 + $0x320] sm:$0xf0]  ;;  %v8383_v1 = vld [vmem:[%s12410_s4 + $0x28c] sm:$0xf0]  ;;  %v8380_v2 = vld [vmem:[%s12410_s4 + $0x27c] sm:$0xf] }
 0xc24   : > { %v7320_v37 = vor.u32 %v8398_v44, %v7317_v26  ;;  %v8441_v44 = vld [vmem:[%s12410_s4 + $0x464] sm:$0xf]  ;;  %v7493_v26 = vld [vmem:[%s12410_s4 + $0x478] sm:$0xf0] }
 0xc25   : > { %4515 = vmatpush.bf16.msrb.mxu2 %v7336_v40  ;;  %v7388_v40 = vor.u32 %v8419_v58, %v7387_v54  ;;  %v8392_v54 = vld [vmem:[%s12410_s4 + $0x2dc] sm:$0xf] }
 0xc27   : > { %4491 = vmatpush.bf16.msra.mxu3 %v7284_v19  ;;  %4533 = vmatpush.bf16.msrb.mxu0 %v7408_v14  ;;  %v8434_v19 = vld [vmem:[%s12410_s4 + $0x42c] sm:$0xf]  ;;  %v7293_v14 = vld [vmem:[%s12410_s4 + $0x2f0] sm:$0xf0] }
 0xc28   : > { %4539 = vmatpush.bf16.msrb.mxu1 %v7388_v40  ;;  %v7464_v27 = vor.u32 %v8434_v19, %v7461_v21  ;;  %v8389_v40 = vld [vmem:[%s12410_s4 + $0x2bc] sm:$0xf0]  ;;  %v11563_v21 = vld [vmem:[%s12413_s7 + $0x30] sm:$0xff] }
 0xc29   : > { %4516 = vmatpush.bf16.msrb.mxu2 %v7312_v34  ;;  %v7488_v34 = vor.u32 %v8440_v33, %v7485_v6  ;;  %v7219_v6 = vld [vmem:[%s12410_s4 + $0x248] sm:$0xf]  ;;  %v4039_v31 = vperm.slane %v11563_v21, 3 }
 0xc2a   : > { %v7220_v11 = vor.u32 %v8377_v7, %v7219_v6  ;;  %v7323_v6 = vld [vmem:[%s12410_s4 + $0x310] sm:$0xf]  ;;  %v8402_v7 = vld [vmem:[%s12410_s4 + $0x324] sm:$0xf0] }
 0xc2b   : > { %4492 = vmatpush.bf16.msra.mxu3 %v7260_v52  ;;  %v8428_v52 = vld [vmem:[%s12410_s4 + $0x3fc] sm:$0xf] }
 0xc2c   : > { %4540 = vmatpush.bf16.msrb.mxu1 %v7364_v13  ;;  %v7440_v43 = vor.u32 %v8428_v52, %v7437_v36  ;;  %v8420_v36 = vld [vmem:[%s12410_s4 + $0x3b4] sm:$0xf0] }
 0xc2d   : > { %4517 = vmatpush.bf16.msrb.mxu2 %v7288_v24  ;;  %v8407_v24 = vld [vmem:[%s12410_s4 + $0x34c] sm:$0xf0] }
 0xc2e   : > { %v7340_v30 = vor.u32 %v8407_v24, %v7339_v22  ;;  %v4035_v22 = vperm.slane %v11563_v21, 2  ;;  %v11569_v24 = vld [vmem:[%s12413_s7 + $0x38] sm:$0xff] }
 0xc2f   : > { %4493 = vmatpush.bf16.msra.mxu3 %v7236_v57  ;;  %v8422_v57 = vld [vmem:[%s12410_s4 + $0x3cc] sm:$0xf]  ;;  %v4040_v32 = vperm.slane %v11569_v24, 3 }
 0xc30   : > { %4541 = vmatpush.bf16.msrb.mxu1 %v7340_v30  ;;  %v7416_v12 = vor.u32 %v8422_v57, %v7413_v46  ;;  %v8414_v46 = vld [vmem:[%s12410_s4 + $0x384] sm:$0xf0] }
 0xc31   : > { %4518 = vmatpush.bf16.msrb.mxu2 %v7264_v15  ;;  %v8401_v15 = vld [vmem:[%s12410_s4 + $0x31c] sm:$0xf0] }
 0xc32   : > { %v7316_v23 = vor.u32 %v8401_v15, %v7315_v10  ;;  %v8417_v10 = vld [vmem:[%s12410_s4 + $0x3a4] sm:$0xf] }
 0xc34   : > { %4542 = vmatpush.bf16.msrb.mxu1 %v7316_v23  ;;  %v8444_v23 = vld [vmem:[%s12410_s4 + $0x474] sm:$0xf0] }
 0xc35   : > { %4519 = vmatpush.bf16.msrb.mxu2 %v7240_v50  ;;  %v8395_v50 = vld [vmem:[%s12410_s4 + $0x2ec] sm:$0xf0] }
 0xc36   : > { %v7292_v53 = vor.u32 %v8395_v50, %v7291_v47  ;;  %v8411_v47 = vld [vmem:[%s12410_s4 + $0x374] sm:$0xf]  ;;  %v7373_v50 = vld [vmem:[%s12410_s4 + $0x388] sm:$0xf0] }
 0xc38   : > { %4543 = vmatpush.bf16.msrb.mxu1 %v7292_v53  ;;  %v7467_v53 = vld [vmem:[%s12410_s4 + $0x430] sm:$0xf] }
 0xc91   : > { %v4011_v49 = vpop.xlane.xlu1 %4010 }
 0xc92   : > { %v4012_v60 = vmul.f32 %v4011_v49, %v8929_v25  ;;  %v7392_v49 = vor.u32 %v8416_v48, %v7389_v59  ;;  %v7296_v48 = vor.u32 %v8392_v54, %v7293_v14  ;;  %v7267_v59 = vld [vmem:[%s12410_s4 + $0x2a8] sm:$0xf]  ;;  %v8435_v14 = vld [vmem:[%s12410_s4 + $0x434] sm:$0xf] }
 0xc93   : > { %v8438_v54 = vld [vmem:[%s12410_s4 + $0x444] sm:$0xf0] }
 0xc94   : > { %v11297_v62 = vsub.f32 %v11254_v56, %v4012_v60  ;;  %v11300_v28 = vsub.f32 %v11251_v42, %v4012_v60  ;;  %v7211_v60 = vld [vmem:[%s12410_s4 + $0x240] sm:$0xf]  ;;  %4565 = vmatpush.bf16.msra.mxu0 %v7392_v49  ;;  %v8386_v49 = vld [vmem:[%s12410_s4 + $0x2ac] sm:$0xf] }
 0xc96   : > { %v4015_v61 = vmul.f32 %v11297_v62, %v11297_v62  ;;  %v4016_v29 = vmul.f32 %v11300_v28, %v11300_v28 }
 0xc98   : > { %v4017_v63 = vsel %vm338_vm0, %v4016_v29, 0.0  ;;  %v8373_v29 = vld [vmem:[%s12410_s4 + $0x244] sm:$0xf]  ;;  %4566 = vmatpush.bf16.msra.mxu0 %v7368_v16 }
 0xc99   : > { %v4018_v0 = vadd.f32 %v4017_v63, %v4015_v61  ;;  %v8376_v61 = vld [vmem:[%s12410_s4 + $0x254] sm:$0xf0] }
 0xc9a   : > { %v7212_v63 = vor.u32 %v8376_v61, %v7211_v60  ;;  %v7268_v61 = vor.u32 %v8389_v40, %v7267_v59  ;;  %v7376_v59 = vor.u32 %v8411_v47, %v7373_v50  ;;  %v7347_v40 = vld [vmem:[%s12410_s4 + $0x340] sm:$0xf] }
 0xc9b   : > { %4019 = vadd.xlane.f32.xlu0 %v4018_v0  ;;  %v7213_v0 = vld [vmem:[%s12410_s4 + $0x258] sm:$0xf0]  ;;  %v7251_v50 = vld [vmem:[%s12410_s4 + $0x280] sm:$0xf] }
 0xc9c   : > { %v7216_v3 = vor.u32 %v8373_v29, %v7213_v0  ;;  %4494 = vmatpush.bf16.msra.mxu3 %v7212_v63  ;;  %4567 = vmatpush.bf16.msra.mxu0 %v7344_v35  ;;  %v7269_v29 = vld [vmem:[%s12410_s4 + $0x2c0] sm:$0xf0]  ;;  %v7243_v0 = vld [vmem:[%s12410_s4 + $0x278] sm:$0xf] }
 0xc9d   : > { %v7272_v63 = vor.u32 %v8386_v49, %v7269_v29  ;;  %4544 = vmatpush.bf16.msrb.mxu1 %v7268_v61  ;;  %v8408_v49 = vld [vmem:[%s12410_s4 + $0x354] sm:$0xf0]  ;;  %v7349_v61 = vld [vmem:[%s12410_s4 + $0x358] sm:$0xf0]  ;;  %v7468_v29 = vor.u32 %v8438_v54, %v7467_v53 }
 0xc9e   : > { %4520 = vmatpush.bf16.msrb.mxu2 %v7216_v3  ;;  %v7245_v3 = vld [vmem:[%s12410_s4 + $0x290] sm:$0xf0]  ;;  %v7253_v53 = vld [vmem:[%s12410_s4 + $0x298] sm:$0xf0] }
 0xc9f   : > { %v7248_v33 = vor.u32 %v8380_v2, %v7245_v3  ;;  %v8429_v2 = vld [vmem:[%s12410_s4 + $0x404] sm:$0xf]  ;;  %v7445_v3 = vld [vmem:[%s12410_s4 + $0x418] sm:$0xf0] }
 0xca0   : > { %4556 = vmatpush.bf16.msrb.mxu3 %v7484_v5  ;;  %4568 = vmatpush.bf16.msra.mxu0 %v7320_v37  ;;  %v7244_v5 = vor.u32 %v8383_v1, %v7243_v0  ;;  %v7443_v0 = vld [vmem:[%s12410_s4 + $0x400] sm:$0xf]  ;;  %v8432_v1 = vld [vmem:[%s12410_s4 + $0x414] sm:$0xf0] }
 0xca2   : > { %4582 = vmatpush.bf16.msra.mxu2 %v7488_v34  ;;  %v8374_v34 = vld [vmem:[%s12410_s4 + $0x24c] sm:$0xf]  ;;  %4545 = vmatpush.bf16.msrb.mxu1 %v7244_v5  ;;  %v7348_v5 = vor.u32 %v8408_v49, %v7347_v40  ;;  %v8456_v40 = vld [vmem:[%s12411_s5 + $0x354] sm:$0xf0] }
 0xca3   : > { %v7224_v13 = vor.u32 %v8374_v34, %v7221_v9  ;;  %v8399_v34 = vld [vmem:[%s12410_s4 + $0x314] sm:$0xf]  ;;  %v7325_v9 = vld [vmem:[%s12410_s4 + $0x328] sm:$0xf0] }
 0xca4   : > { %4557 = vmatpush.bf16.msrb.mxu3 %v7460_v20  ;;  %4569 = vmatpush.bf16.msra.mxu0 %v7296_v48 }
 0xca6   : > { %4583 = vmatpush.bf16.msra.mxu2 %v7464_v27  ;;  %4546 = vmatpush.bf16.msrb.mxu1 %v7220_v11  ;;  %v4036_v27 = vperm.slane %v11569_v24, 2  ;;  %v7448_v11 = vor.u32 %v8429_v2, %v7445_v3 }
 0xca8   : > { %4558 = vmatpush.bf16.msrb.mxu3 %v7436_v4  ;;  %4570 = vmatpush.bf16.msra.mxu0 %v7272_v63  ;;  %v7395_v4 = vld [vmem:[%s12410_s4 + $0x3a0] sm:$0xf] }
 0xca9   : > { %v7396_v55 = vor.u32 %v8420_v36, %v7395_v4  ;;  %v8460_v4 = vld [vmem:[%s12411_s5 + $0x374] sm:$0xf0] }
 0xcaa   : > { %4584 = vmatpush.bf16.msra.mxu2 %v7440_v43 }
 0xcac   : > { %4559 = vmatpush.bf16.msrb.mxu3 %v7412_v45  ;;  %4571 = vmatpush.bf16.msra.mxu0 %v7248_v33  ;;  %v7371_v45 = vld [vmem:[%s12410_s4 + $0x370] sm:$0xf] }
 0xcad   : > { %v7372_v48 = vor.u32 %v8414_v46, %v7371_v45  ;;  %v8458_v45 = vld [vmem:[%s12411_s5 + $0x364] sm:$0xf0] }
 0xcae   : > { %4585 = vmatpush.bf16.msra.mxu2 %v7416_v12  ;;  %v7496_v12 = vor.u32 %v8441_v44, %v7493_v26  ;;  %v7777_v26 = vld [vmem:[%s12411_s5 + $0x460] sm:$0xf] }
 0xcb0   : > { %4572 = vmatpush.bf16.msra.mxu0 %v7224_v13  ;;  %v7419_v13 = vld [vmem:[%s12410_s4 + $0x3d0] sm:$0xf] }
 0xd0e   : > { %v4020_v51 = vpop.xlane.xlu0 %4019 }
 0xd0f   : > { %v4021_v58 = vmul.f32 %v4020_v51, %v8929_v25 }
 0xd11   : > { %v4022_v60 = vadd.f32 1e-05, %v4021_v58  ;;  %v7469_v58 = vld [vmem:[%s12410_s4 + $0x448] sm:$0xf0] }
 0xd12   : > { %v7472_v63 = vor.u32 %v8435_v14, %v7469_v58  ;;  %v7769_v58 = vld [vmem:[%s12411_s5 + $0x450] sm:$0xf] }
 0xd13   : > { %8666 = vrsqrt.f32 %v4022_v60  ;;  %vm4029_vm1 = vweird.f32 %v4022_v60 }
 0xd19   : > { %v8667_v8 = vpop.eup %8666 }
 0xd1a   : > { %v4024_v16 = vmul.f32 %v8667_v8, %v4022_v60  ;;  %vm4030_vm15 = vweird.f32 %v8667_v8  ;;  %v8405_v60 = vld [vmem:[%s12410_s4 + $0x344] sm:$0xf] }
 0xd1b   : > { %vm4031_vm2 = vmor %vm4029_vm1, %vm4030_vm15  ;;  %v7352_v33 = vor.u32 %v8405_v60, %v7349_v61  ;;  %v7227_v61 = vld [vmem:[%s12410_s4 + $0x250] sm:$0xf] }
 0xd1c   : > { %v4025_v17 = vmul.f32 %v8667_v8, %v4024_v16  ;;  %v8426_v16 = vld [vmem:[%s12410_s4 + $0x3e4] sm:$0xf0] }
 0xd1e   : > { %v4026_v18 = vmul.f32 0.5, %v4025_v17  ;;  %v8423_v17 = vld [vmem:[%s12410_s4 + $0x3d4] sm:$0xf] }
 0xd20   : > { %v4027_v19 = vsub.f32 1.5, %v4026_v18  ;;  %v7421_v18 = vld [vmem:[%s12410_s4 + $0x3e8] sm:$0xf0] }
 0xd22   : > { %v4028_v20 = vmul.f32 %v8667_v8, %v4027_v19  ;;  %v7324_v19 = vor.u32 %v8402_v7, %v7323_v6  ;;  %v8476_v6 = vld [vmem:[%s12411_s5 + $0x3f4] sm:$0xf0]  ;;  %v7761_v7 = vld [vmem:[%s12411_s5 + $0x440] sm:$0xf] }
 0xd24   : > { %v4032_v30 = vsel %vm4031_vm2, %v8667_v8, %v4028_v20  ;;  %v7444_v8 = vor.u32 %v8432_v1, %v7443_v0  ;;  %v7328_v20 = vor.u32 %v8399_v34, %v7325_v9  ;;  %v7229_v0 = vld [vmem:[%s12410_s4 + $0x268] sm:$0xf0]  ;;  %v7849_v1 = vld [vmem:[%s12411_s5 + $0x4f0] sm:$0xf]  ;;  %v8486_v34 = vld [vmem:[%s12411_s5 + $0x444] sm:$0xf0] }
 0xd25   : > { %v4033_v35 = vmul.f32 %v4032_v30, %v11297_v62  ;;  %v4034_v39 = vmul.f32 %v4032_v30, %v11300_v28  ;;  %v7397_v62 = vld [vmem:[%s12410_s4 + $0x3b8] sm:$0xf0]  ;;  %v7491_v28 = vld [vmem:[%s12410_s4 + $0x460] sm:$0xf]  ;;  %v8393_v30 = vld [vmem:[%s12410_s4 + $0x2e4] sm:$0xf] }
 0xd26   : > { %v7400_v57 = vor.u32 %v8417_v10, %v7397_v62  ;;  %v7492_v51 = vor.u32 %v8444_v23, %v7491_v28  ;;  %v7275_v62 = vld [vmem:[%s12410_s4 + $0x2b0] sm:$0xf]  ;;  %v8390_v28 = vld [vmem:[%s12410_s4 + $0x2c4] sm:$0xf0] }
 0xd27   : > { %v4037_v38 = vmul.f32 %v4035_v22, %v4033_v35  ;;  %v4038_v52 = vmul.f32 %v4036_v27, %v4034_v39  ;;  %v7299_v22 = vld [vmem:[%s12410_s4 + $0x2e0] sm:$0xf]  ;;  %v8396_v27 = vld [vmem:[%s12410_s4 + $0x2f4] sm:$0xf0]  ;;  %v7424_v35 = vor.u32 %v8423_v17, %v7421_v18  ;;  %v7785_v39 = vld [vmem:[%s12411_s5 + $0x470] sm:$0xf]  ;;  %v7276_v46 = vor.u32 %v8390_v28, %v7275_v62 }
 0xd28   : > { %v7300_v36 = vor.u32 %v8396_v27, %v7299_v22  ;;  %v7633_v17 = vld [vmem:[%s12411_s5 + $0x340] sm:$0xf]  ;;  %v8454_v18 = vld [vmem:[%s12411_s5 + $0x344] sm:$0xf0]  ;;  %v7762_v27 = vor.u32 %v8486_v34, %v7761_v7  ;;  %v8472_v62 = vld [vmem:[%s12411_s5 + $0x3d4] sm:$0xf0] }
 0xd29   : > { %v4041_v15 = vadd.f32 %v4039_v31, %v4037_v38  ;;  %v4042_v43 = vadd.f32 %v4040_v32, %v4038_v52  ;;  %v7301_v31 = vld [vmem:[%s12410_s4 + $0x2f8] sm:$0xf0]  ;;  %v7420_v32 = vor.u32 %v8426_v16, %v7419_v13  ;;  %v8492_v38 = vld [vmem:[%s12411_s5 + $0x474] sm:$0xf0]  ;;  %v7657_v52 = vld [vmem:[%s12411_s5 + $0x370] sm:$0xf] }
 0xd2a   : > { %v7304_v10 = vor.u32 %v8393_v30, %v7301_v31  ;;  %v7786_v23 = vor.u32 %v8492_v38, %v7785_v39  ;;  %v7658_v44 = vor.u32 %v8460_v4, %v7657_v52  ;;  %v7841_v16 = vld [vmem:[%s12411_s5 + $0x4e0] sm:$0xf]  ;;  %v8474_v22 = vld [vmem:[%s12411_s5 + $0x3e4] sm:$0xf0]  ;;  %v7753_v30 = vld [vmem:[%s12411_s5 + $0x430] sm:$0xf] }
 0xd2b   : > { %v11600_v37 = vpack.c.bf16 %v4041_v15, %v4041_v15  ;;  %v11602_v41 = vpack.c.bf16 %v4042_v43, %v4042_v43  ;;  %v8387_v15 = vld [vmem:[%s12410_s4 + $0x2b4] sm:$0xf]  ;;  %v7277_v43 = vld [vmem:[%s12410_s4 + $0x2c8] sm:$0xf0]  ;;  %v8484_v31 = vld [vmem:[%s12411_s5 + $0x434] sm:$0xf0] }
 0xd2c   : > { %v7280_v47 = vor.u32 %v8387_v15, %v7277_v43  ;;  %v7833_v38 = vld [vmem:[%s12411_s5 + $0x4d0] sm:$0xf]  ;;  %v8452_v4 = vld [vmem:[%s12411_s5 + $0x334] sm:$0xf0]  ;;  %v7754_v28 = vor.u32 %v8484_v31, %v7753_v30  ;;  %v7745_v15 = vld [vmem:[%s12411_s5 + $0x420] sm:$0xf] }
 0xd2d   : > { %4495 = vmatmul.bf16.vlgmr.msra.gmra.mxu3 %v11600_v37  ;;  %7497 = vmatmul.msk.bf16.vlgmr.msra.gmra.mxu1 %vm338_vm0, %v11602_v41  ;;  %v7625_v52 = vld [vmem:[%s12411_s5 + $0x330] sm:$0xf]  ;;  %v8482_v43 = vld [vmem:[%s12411_s5 + $0x424] sm:$0xf0]  ;;  %v8496_v7 = vld [vmem:[%s12411_s5 + $0x494] sm:$0xf0] }
 0xd2e   : > { %4521 = vmatmul.bf16.vlgmr.msrb.gmra.mxu2 %v11600_v37  ;;  %7498 = vmatmul.msk.bf16.vlgmr.msrb.gmra.mxu0 %vm338_vm0, %v11602_v41  ;;  %v7673_v34 = vld [vmem:[%s12411_s5 + $0x390] sm:$0xf]  ;;  %v8475_v31 = vld [vmem:[%s12411_s5 + $0x3f4] sm:$0xf] }
 0xd2f   : > { %4591 = vmatpush.bf16.msra.mxu3 %v7396_v55  ;;  %4617 = vmatpush.bf16.msrb.mxu2 %v7400_v57  ;;  %v8490_v55 = vld [vmem:[%s12411_s5 + $0x464] sm:$0xf0]  ;;  %v7649_v57 = vld [vmem:[%s12411_s5 + $0x360] sm:$0xf] }
 0xd30   : > { %4608 = vmatpush.bf16.msra.mxu1 %v7492_v51  ;;  %4634 = vmatpush.bf16.msrb.mxu0 %v7496_v12  ;;  %v8384_v51 = vld [vmem:[%s12410_s4 + $0x294] sm:$0xf0]  ;;  %v8381_v12 = vld [vmem:[%s12410_s4 + $0x284] sm:$0xf]  ;;  %v7778_v54 = vor.u32 %v8490_v55, %v7777_v26  ;;  %v7650_v14 = vor.u32 %v8458_v45, %v7649_v57  ;;  %v7617_v55 = vld [vmem:[%s12411_s5 + $0x320] sm:$0xf] }
 0xd31   : > { %v7252_v49 = vor.u32 %v8384_v51, %v7251_v50  ;;  %v7256_v60 = vor.u32 %v8381_v12, %v7253_v53  ;;  %v8450_v57 = vld [vmem:[%s12411_s5 + $0x324] sm:$0xf0]  ;;  %v7697_v45 = vld [vmem:[%s12411_s5 + $0x3c0] sm:$0xf]  ;;  %v7737_v50 = vld [vmem:[%s12411_s5 + $0x410] sm:$0xf] }
 0xd32   : > { %v8480_v51 = vld [vmem:[%s12411_s5 + $0x414] sm:$0xf0]  ;;  %v7618_v12 = vor.u32 %v8450_v57, %v7617_v55  ;;  %v8473_v57 = vld [vmem:[%s12411_s5 + $0x3e4] sm:$0xf] }
 0xd33   : > { %4592 = vmatpush.bf16.msra.mxu3 %v7372_v48  ;;  %4618 = vmatpush.bf16.msrb.mxu2 %v7376_v59  ;;  %v8488_v48 = vld [vmem:[%s12411_s5 + $0x454] sm:$0xf0]  ;;  %v7641_v59 = vld [vmem:[%s12411_s5 + $0x350] sm:$0xf] }
 0xd34   : > { %4609 = vmatpush.bf16.msra.mxu1 %v7468_v29  ;;  %4635 = vmatpush.bf16.msrb.mxu0 %v7472_v63  ;;  %v8378_v29 = vld [vmem:[%s12410_s4 + $0x264] sm:$0xf0]  ;;  %v8375_v63 = vld [vmem:[%s12410_s4 + $0x254] sm:$0xf]  ;;  %v7770_v2 = vor.u32 %v8488_v48, %v7769_v58  ;;  %v7642_v3 = vor.u32 %v8456_v40, %v7641_v59  ;;  %v7609_v58 = vld [vmem:[%s12411_s5 + $0x310] sm:$0xf] }
 0xd35   : > { %v7228_v9 = vor.u32 %v8378_v29, %v7227_v61  ;;  %v8448_v48 = vld [vmem:[%s12411_s5 + $0x314] sm:$0xf0]  ;;  %v7689_v40 = vld [vmem:[%s12411_s5 + $0x3b0] sm:$0xf] }
 0xd36   : > { %v8500_v59 = vld [vmem:[%s12411_s5 + $0x4b4] sm:$0xf0]  ;;  %v7610_v61 = vor.u32 %v8448_v48, %v7609_v58  ;;  %v8471_v58 = vld [vmem:[%s12411_s5 + $0x3d4] sm:$0xf] }
 0xd37   : > { %4593 = vmatpush.bf16.msra.mxu3 %v7348_v5  ;;  %4619 = vmatpush.bf16.msrb.mxu2 %v7352_v33  ;;  %v8508_v5 = vld [vmem:[%s12411_s5 + $0x4f4] sm:$0xf0]  ;;  %v7721_v33 = vld [vmem:[%s12411_s5 + $0x3f0] sm:$0xf] }
 0xd38   : > { %4610 = vmatpush.bf16.msra.mxu1 %v7444_v8  ;;  %4636 = vmatpush.bf16.msrb.mxu0 %v7448_v11  ;;  %v7232_v8 = vor.u32 %v8375_v63, %v7229_v0  ;;  %v7850_v11 = vor.u32 %v8508_v5, %v7849_v1  ;;  %v7722_v13 = vor.u32 %v8476_v6, %v7721_v33  ;;  %v7809_v0 = vld [vmem:[%s12411_s5 + $0x4a0] sm:$0xf]  ;;  %v8498_v1 = vld [vmem:[%s12411_s5 + $0x4a4] sm:$0xf0]  ;;  %v7801_v6 = vld [vmem:[%s12411_s5 + $0x490] sm:$0xf] }
 0xd39   : > { %v7810_v5 = vor.u32 %v8498_v1, %v7809_v0  ;;  %v8453_v1 = vld [vmem:[%s12411_s5 + $0x344] sm:$0xf] }
 0xd3b   : > { %4594 = vmatpush.bf16.msra.mxu3 %v7324_v19  ;;  %4620 = vmatpush.bf16.msrb.mxu2 %v7328_v20  ;;  %v8506_v19 = vld [vmem:[%s12411_s5 + $0x4e4] sm:$0xf0]  ;;  %v7713_v20 = vld [vmem:[%s12411_s5 + $0x3e0] sm:$0xf] }
 0xd3c   : > { %4611 = vmatpush.bf16.msra.mxu1 %v7420_v32  ;;  %4637 = vmatpush.bf16.msrb.mxu0 %v7424_v35  ;;  %v7634_v32 = vor.u32 %v8454_v18, %v7633_v17  ;;  %v7842_v35 = vor.u32 %v8506_v19, %v7841_v16  ;;  %v7714_v39 = vor.u32 %v8474_v22, %v7713_v20  ;;  %v8478_v16 = vld [vmem:[%s12411_s5 + $0x404] sm:$0xf0]  ;;  %v7793_v17 = vld [vmem:[%s12411_s5 + $0x480] sm:$0xf]  ;;  %v8459_v20 = vld [vmem:[%s12411_s5 + $0x374] sm:$0xf] }
 0xd3d   : > { %4547 = vmatmul.bf16.vlgmr.msrb.gmra.mxu1 %v11600_v37  ;;  %7499 = vmatmul.msk.bf16.vlgmr.msrb.gmra.mxu3 %vm338_vm0, %v11602_v41  ;;  %v8494_v19 = vld [vmem:[%s12411_s5 + $0x484] sm:$0xf0]  ;;  %v7659_v22 = vld [vmem:[%s12411_s5 + $0x378] sm:$0xf0] }
 0xd3e   : > { %4573 = vmatmul.bf16.vlgmr.msra.gmra.mxu0 %v11600_v37  ;;  %7500 = vmatmul.msk.bf16.vlgmr.msra.gmra.mxu2 %vm338_vm0, %v11602_v41  ;;  %v7662_v30 = vor.u32 %v8459_v20, %v7659_v22  ;;  %v7691_v20 = vld [vmem:[%s12411_s5 + $0x3b8] sm:$0xf0]  ;;  %v7881_v22 = vld [vmem:[%s12411_s5 + $0x530] sm:$0xf] }
 0xd3f   : > { %4595 = vmatpush.bf16.msra.mxu3 %v7300_v36  ;;  %4621 = vmatpush.bf16.msrb.mxu2 %v7304_v10  ;;  %v8504_v36 = vld [vmem:[%s12411_s5 + $0x4d4] sm:$0xf0]  ;;  %v7705_v10 = vld [vmem:[%s12411_s5 + $0x3d0] sm:$0xf] }
 0xd40   : > { %5260 = vmatpush.bf16.msra.mxu0 %v7786_v23  ;;  %5234 = vmatpush.bf16.msrb.mxu1 %v7658_v44  ;;  %v7626_v23 = vor.u32 %v8452_v4, %v7625_v52  ;;  %v7834_v44 = vor.u32 %v8504_v36, %v7833_v38  ;;  %v7706_v26 = vor.u32 %v8472_v62, %v7705_v10  ;;  %v8446_v38 = vld [vmem:[%s12411_s5 + $0x304] sm:$0xf0]  ;;  %v7665_v52 = vld [vmem:[%s12411_s5 + $0x380] sm:$0xf]  ;;  %v7913_v62 = vld [vmem:[%s12411_s5 + $0x570] sm:$0xf] }
 0xd41   : > { %v8462_v4 = vld [vmem:[%s12411_s5 + $0x384] sm:$0xf0] }
 0xd42   : > { %v7666_v10 = vor.u32 %v8462_v4, %v7665_v52  ;;  %v7619_v52 = vld [vmem:[%s12411_s5 + $0x328] sm:$0xf0]  ;;  %v8465_v4 = vld [vmem:[%s12411_s5 + $0x3a4] sm:$0xf] }
 0xd43   : > { %4596 = vmatpush.bf16.msra.mxu3 %v7276_v46  ;;  %4622 = vmatpush.bf16.msrb.mxu2 %v7280_v47  ;;  %v8470_v46 = vld [vmem:[%s12411_s5 + $0x3c4] sm:$0xf0]  ;;  %v7746_v47 = vor.u32 %v8482_v43, %v7745_v15  ;;  %v7977_v15 = vld [vmem:[%s12411_s5 + $0x5f0] sm:$0xf] }
 0xd44   : > { %5261 = vmatpush.bf16.msra.mxu0 %v7778_v54  ;;  %5235 = vmatpush.bf16.msrb.mxu1 %v7650_v14  ;;  %v7698_v54 = vor.u32 %v8470_v46, %v7697_v45  ;;  %v7817_v14 = vld [vmem:[%s12411_s5 + $0x4b0] sm:$0xf]  ;;  %v7905_v46 = vld [vmem:[%s12411_s5 + $0x560] sm:$0xf] }
 0xd45   : > { %v7818_v29 = vor.u32 %v8500_v59, %v7817_v14  ;;  %v7643_v14 = vld [vmem:[%s12411_s5 + $0x358] sm:$0xf0] }
 0xd46   : > { %v7707_v59 = vld [vmem:[%s12411_s5 + $0x3d8] sm:$0xf0] }
 0xd47   : > { %4597 = vmatpush.bf16.msra.mxu3 %v7252_v49  ;;  %4623 = vmatpush.bf16.msrb.mxu2 %v7256_v60  ;;  %v8468_v49 = vld [vmem:[%s12411_s5 + $0x3b4] sm:$0xf0]  ;;  %v7738_v60 = vor.u32 %v8480_v51, %v7737_v50  ;;  %v7969_v50 = vld [vmem:[%s12411_s5 + $0x5e0] sm:$0xf] }
 0xd48   : > { %5262 = vmatpush.bf16.msra.mxu0 %v7770_v2  ;;  %5236 = vmatpush.bf16.msrb.mxu1 %v7642_v3  ;;  %v7690_v63 = vor.u32 %v8468_v49, %v7689_v40  ;;  %v7681_v2 = vld [vmem:[%s12411_s5 + $0x3a0] sm:$0xf]  ;;  %v8466_v3 = vld [vmem:[%s12411_s5 + $0x3a4] sm:$0xf0]  ;;  %v7710_v40 = vor.u32 %v8471_v58, %v7707_v59  ;;  %v7897_v49 = vld [vmem:[%s12411_s5 + $0x550] sm:$0xf] }
 0xd49   : > { %v7682_v33 = vor.u32 %v8466_v3, %v7681_v2  ;;  %v7635_v2 = vld [vmem:[%s12411_s5 + $0x348] sm:$0xf0]  ;;  %v8469_v3 = vld [vmem:[%s12411_s5 + $0x3c4] sm:$0xf] }
 0xd4a   : > { %v7603_v58 = vld [vmem:[%s12411_s5 + $0x308] sm:$0xf0] }
 0xd4b   : > { %4598 = vmatpush.bf16.msra.mxu3 %v7228_v9  ;;  %4624 = vmatpush.bf16.msrb.mxu2 %v7232_v8  ;;  %v8464_v9 = vld [vmem:[%s12411_s5 + $0x394] sm:$0xf0]  ;;  %v7802_v8 = vor.u32 %v8496_v7, %v7801_v6  ;;  %v7889_v7 = vld [vmem:[%s12411_s5 + $0x540] sm:$0xf] }
 0xd4c   : > { %5263 = vmatpush.bf16.msra.mxu0 %v7762_v27  ;;  %5237 = vmatpush.bf16.msrb.mxu1 %v7634_v32  ;;  %v7794_v27 = vor.u32 %v8494_v19, %v7793_v17  ;;  %v7723_v32 = vld [vmem:[%s12411_s5 + $0x3f8] sm:$0xf0] }
 0xd4d   : > { %7501 = vmatmul.msk.bf16.vlgmr.msra.gmra.mxu1 %vm338_vm0, %v11602_v41  ;;  %v7627_v17 = vld [vmem:[%s12411_s5 + $0x338] sm:$0xf0] }
 0xd4e   : > { %4599 = vmatmul.bf16.vlgmr.msra.gmra.mxu3 %v11600_v37  ;;  %4625 = vmatmul.bf16.vlgmr.msrb.gmra.mxu2 %v11600_v37  ;;  %v7825_v37 = vld [vmem:[%s12411_s5 + $0x4c0] sm:$0xf] }
 0xd4f   : > { %5273 = vmatpush.bf16.msra.mxu2 %v7850_v11  ;;  %5247 = vmatpush.bf16.msrb.mxu3 %v7722_v13  ;;  %v7674_v11 = vor.u32 %v8464_v9, %v7673_v34  ;;  %v7729_v13 = vld [vmem:[%s12411_s5 + $0x400] sm:$0xf]  ;;  %v8518_v34 = vld [vmem:[%s12411_s5 + $0x544] sm:$0xf0] }
 0xd50   : > { %7502 = vmatmul.msk.bf16.vlgmr.msrb.gmra.mxu0 %vm338_vm0, %v11602_v41  ;;  %v8502_v41 = vld [vmem:[%s12411_s5 + $0x4c4] sm:$0xf0]  ;;  %5238 = vmatpush.bf16.msrb.mxu1 %v7626_v23  ;;  %v7730_v18 = vor.u32 %v8478_v16, %v7729_v13  ;;  %v8540_v23 = vld [vmem:[%s12411_s5 + $0x5f4] sm:$0xf0]  ;;  %v7953_v9 = vld [vmem:[%s12411_s5 + $0x5c0] sm:$0xf] }
 0xd51   : > { %5264 = vmatpush.bf16.msra.mxu0 %v7754_v28  ;;  %v7826_v53 = vor.u32 %v8502_v41, %v7825_v37  ;;  %v8524_v28 = vld [vmem:[%s12411_s5 + $0x574] sm:$0xf0]  ;;  %v7978_v37 = vor.u32 %v8540_v23, %v7977_v15  ;;  %v7715_v41 = vld [vmem:[%s12411_s5 + $0x3e8] sm:$0xf0]  ;;  %v8451_v16 = vld [vmem:[%s12411_s5 + $0x334] sm:$0xf] }
 0xd52   : > { %v7914_v43 = vor.u32 %v8524_v28, %v7913_v62  ;;  %v7718_v45 = vor.u32 %v8473_v57, %v7715_v41  ;;  %v7630_v19 = vor.u32 %v8451_v16, %v7627_v17  ;;  %v7873_v28 = vld [vmem:[%s12411_s5 + $0x520] sm:$0xf]  ;;  %v8514_v15 = vld [vmem:[%s12411_s5 + $0x524] sm:$0xf0]  ;;  %v8463_v57 = vld [vmem:[%s12411_s5 + $0x394] sm:$0xf] }
 0xd53   : > { %5274 = vmatpush.bf16.msra.mxu2 %v7842_v35  ;;  %5248 = vmatpush.bf16.msrb.mxu3 %v7714_v39  ;;  %v7601_v35 = vld [vmem:[%s12411_s5 + $0x300] sm:$0xf]  ;;  %v7726_v39 = vor.u32 %v8475_v31, %v7723_v32  ;;  %v7945_v32 = vld [vmem:[%s12411_s5 + $0x5b0] sm:$0xf]  ;;  %v7874_v23 = vor.u32 %v8514_v15, %v7873_v28  ;;  %v8491_v16 = vld [vmem:[%s12411_s5 + $0x474] sm:$0xf] }
 0xd54   : > { %5239 = vmatpush.bf16.msrb.mxu1 %v7618_v12  ;;  %v7602_v36 = vor.u32 %v8446_v38, %v7601_v35  ;;  %v8538_v12 = vld [vmem:[%s12411_s5 + $0x5e4] sm:$0xf0]  ;;  %v8532_v35 = vld [vmem:[%s12411_s5 + $0x5b4] sm:$0xf0]  ;;  %v7787_v17 = vld [vmem:[%s12411_s5 + $0x478] sm:$0xf0] }
 0xd55   : > { %5265 = vmatpush.bf16.msra.mxu0 %v7746_v47  ;;  %v8522_v47 = vld [vmem:[%s12411_s5 + $0x564] sm:$0xf0]  ;;  %v7946_v38 = vor.u32 %v8532_v35, %v7945_v32  ;;  %v7779_v32 = vld [vmem:[%s12411_s5 + $0x468] sm:$0xf0] }
 0xd56   : > { %v7906_v51 = vor.u32 %v8522_v47, %v7905_v46  ;;  %v7865_v47 = vld [vmem:[%s12411_s5 + $0x510] sm:$0xf] }
 0xd57   : > { %5275 = vmatpush.bf16.msra.mxu2 %v7834_v44  ;;  %5249 = vmatpush.bf16.msrb.mxu3 %v7706_v26  ;;  %v8457_v44 = vld [vmem:[%s12411_s5 + $0x364] sm:$0xf]  ;;  %v7651_v26 = vld [vmem:[%s12411_s5 + $0x368] sm:$0xf0] }
 0xd58   : > { %5240 = vmatpush.bf16.msrb.mxu1 %v7610_v61  ;;  %v7654_v55 = vor.u32 %v8457_v44, %v7651_v26  ;;  %v7961_v61 = vld [vmem:[%s12411_s5 + $0x5d0] sm:$0xf]  ;;  %v8530_v44 = vld [vmem:[%s12411_s5 + $0x5a4] sm:$0xf0] }
 0xd59   : > { %5266 = vmatpush.bf16.msra.mxu0 %v7738_v60  ;;  %v8520_v60 = vld [vmem:[%s12411_s5 + $0x554] sm:$0xf0] }
 0xd5b   : > { %5276 = vmatpush.bf16.msra.mxu2 %v7826_v53  ;;  %5250 = vmatpush.bf16.msrb.mxu3 %v7698_v54  ;;  %v7970_v53 = vor.u32 %v8538_v12, %v7969_v50  ;;  %v8455_v54 = vld [vmem:[%s12411_s5 + $0x354] sm:$0xf]  ;;  %v8512_v50 = vld [vmem:[%s12411_s5 + $0x514] sm:$0xf0] }
 0xd5c   : > { %5241 = vmatpush.bf16.msrb.mxu1 %v7602_v36  ;;  %v7646_v48 = vor.u32 %v8455_v54, %v7643_v14  ;;  %v7683_v36 = vld [vmem:[%s12411_s5 + $0x3a8] sm:$0xf0]  ;;  %v7866_v12 = vor.u32 %v8512_v50, %v7865_v47  ;;  %v8445_v14 = vld [vmem:[%s12411_s5 + $0x304] sm:$0xf] }
 0xd5d   : > { %5267 = vmatpush.bf16.msra.mxu0 %v7730_v18  ;;  %v8467_v18 = vld [vmem:[%s12411_s5 + $0x3b4] sm:$0xf]  ;;  %v7686_v62 = vor.u32 %v8465_v4, %v7683_v36  ;;  %v7606_v59 = vor.u32 %v8445_v14, %v7603_v58  ;;  %v7843_v4 = vld [vmem:[%s12411_s5 + $0x4e8] sm:$0xf0]  ;;  %v8485_v47 = vld [vmem:[%s12411_s5 + $0x444] sm:$0xf] }
 0xd5e   : > { %v7763_v50 = vld [vmem:[%s12411_s5 + $0x448] sm:$0xf0] }
 0xd5f   : > { %5277 = vmatpush.bf16.msra.mxu2 %v7818_v29  ;;  %5251 = vmatpush.bf16.msrb.mxu3 %v7690_v63  ;;  %v7898_v29 = vor.u32 %v8520_v60, %v7897_v49  ;;  %v8536_v63 = vld [vmem:[%s12411_s5 + $0x5d4] sm:$0xf0]  ;;  %v7857_v60 = vld [vmem:[%s12411_s5 + $0x500] sm:$0xf] }
 0xd60   : > { %5286 = vmatpush.bf16.msra.mxu1 %v7914_v43  ;;  %v7962_v0 = vor.u32 %v8536_v63, %v7961_v61  ;;  %v7937_v43 = vld [vmem:[%s12411_s5 + $0x5a0] sm:$0xf]  ;;  %v8510_v61 = vld [vmem:[%s12411_s5 + $0x504] sm:$0xf0] }
 0xd61   : > { %5312 = vmatpush.bf16.msrb.mxu0 %v7662_v30  ;;  %v7694_v30 = vor.u32 %v8467_v18, %v7691_v20  ;;  %v7938_v26 = vor.u32 %v8530_v44, %v7937_v43  ;;  %v8526_v63 = vld [vmem:[%s12411_s5 + $0x584] sm:$0xf0]  ;;  %v8487_v44 = vld [vmem:[%s12411_s5 + $0x454] sm:$0xf] }
 0xd63   : > { %5278 = vmatpush.bf16.msra.mxu2 %v7810_v5  ;;  %5252 = vmatpush.bf16.msrb.mxu3 %v7682_v33  ;;  %v7638_v5 = vor.u32 %v8453_v1, %v7635_v2  ;;  %v7699_v33 = vld [vmem:[%s12411_s5 + $0x3c8] sm:$0xf0]  ;;  %v7858_v1 = vor.u32 %v8510_v61, %v7857_v60  ;;  %v8539_v60 = vld [vmem:[%s12411_s5 + $0x5f4] sm:$0xf]  ;;  %v7979_v61 = vld [vmem:[%s12411_s5 + $0x5f8] sm:$0xf0] }
 0xd64   : > { %5287 = vmatpush.bf16.msra.mxu1 %v7906_v51  ;;  %v7702_v6 = vor.u32 %v8469_v3, %v7699_v33  ;;  %v7929_v51 = vld [vmem:[%s12411_s5 + $0x590] sm:$0xf]  ;;  %v4119_v33 = vperm.slane %v11569_v24, 4  ;;  %v7851_v24 = vld [vmem:[%s12411_s5 + $0x4f8] sm:$0xf0] }
 0xd65   : > { %5313 = vmatpush.bf16.msrb.mxu0 %v7654_v55  ;;  %v7611_v55 = vld [vmem:[%s12411_s5 + $0x318] sm:$0xf0] }
 0xd67   : > { %5279 = vmatpush.bf16.msra.mxu2 %v7802_v8  ;;  %5253 = vmatpush.bf16.msrb.mxu3 %v7674_v11  ;;  %v7890_v8 = vor.u32 %v8518_v34, %v7889_v7  ;;  %v8534_v11 = vld [vmem:[%s12411_s5 + $0x5c4] sm:$0xf0] }
 0xd68   : > { %5288 = vmatpush.bf16.msra.mxu1 %v7898_v29  ;;  %v7954_v13 = vor.u32 %v8534_v11, %v7953_v9  ;;  %v7921_v29 = vld [vmem:[%s12411_s5 + $0x580] sm:$0xf] }
 0xd69   : > { %5314 = vmatpush.bf16.msrb.mxu0 %v7646_v48  ;;  %v8461_v48 = vld [vmem:[%s12411_s5 + $0x384] sm:$0xf]  ;;  %v7922_v2 = vor.u32 %v8526_v63, %v7921_v29  ;;  %v7766_v29 = vor.u32 %v8485_v47, %v7763_v50 }
 0xd6b   : > { %5280 = vmatpush.bf16.msra.mxu2 %v7794_v27  ;;  %5254 = vmatpush.bf16.msrb.mxu3 %v7666_v10  ;;  %v8516_v27 = vld [vmem:[%s12411_s5 + $0x534] sm:$0xf0] }
 0xd6c   : > { %5289 = vmatpush.bf16.msra.mxu1 %v7890_v8  ;;  %v7882_v31 = vor.u32 %v8516_v27, %v7881_v22  ;;  %v7790_v22 = vor.u32 %v8491_v16, %v7787_v17  ;;  %v8537_v16 = vld [vmem:[%s12411_s5 + $0x5e4] sm:$0xf]  ;;  %v7971_v17 = vld [vmem:[%s12411_s5 + $0x5e8] sm:$0xf0] }
 0xd6d   : > { %5315 = vmatpush.bf16.msrb.mxu0 %v7638_v5  ;;  %v4118_v5 = vperm.slane %v11563_v21, 4  ;;  %v8507_v21 = vld [vmem:[%s12411_s5 + $0x4f4] sm:$0xf] }
 0xd6f   : > { %5325 = vmatpush.bf16.msrb.mxu2 %v7726_v39  ;;  %5299 = vmatpush.bf16.msra.mxu3 %v7978_v37  ;;  %v8449_v39 = vld [vmem:[%s12411_s5 + $0x324] sm:$0xf]  ;;  %v8447_v37 = vld [vmem:[%s12411_s5 + $0x314] sm:$0xf] }
 0xd70   : > { %v7622_v10 = vor.u32 %v8449_v39, %v7619_v52  ;;  %5290 = vmatpush.bf16.msra.mxu1 %v7882_v31  ;;  %v7614_v41 = vor.u32 %v8447_v37, %v7611_v55  ;;  %v8489_v31 = vld [vmem:[%s12411_s5 + $0x464] sm:$0xf]  ;;  %v8503_v55 = vld [vmem:[%s12411_s5 + $0x4d4] sm:$0xf] }
 0xd71   : > { %5316 = vmatpush.bf16.msrb.mxu0 %v7630_v19  ;;  %v8505_v52 = vld [vmem:[%s12411_s5 + $0x4e4] sm:$0xf]  ;;  %v7782_v28 = vor.u32 %v8489_v31, %v7779_v32  ;;  %v7811_v31 = vld [vmem:[%s12411_s5 + $0x4a8] sm:$0xf0] }
 0xd73   : > { %5326 = vmatpush.bf16.msrb.mxu2 %v7718_v45  ;;  %5300 = vmatpush.bf16.msra.mxu3 %v7970_v53  ;;  %v7675_v45 = vld [vmem:[%s12411_s5 + $0x398] sm:$0xf0]  ;;  %v8528_v53 = vld [vmem:[%s12411_s5 + $0x594] sm:$0xf0] }
 0xd74   : > { %5291 = vmatpush.bf16.msra.mxu1 %v7874_v23  ;;  %v7678_v46 = vor.u32 %v8463_v57, %v7675_v45  ;;  %v7930_v54 = vor.u32 %v8528_v53, %v7929_v51  ;;  %v7846_v23 = vor.u32 %v8505_v52, %v7843_v4  ;;  %v7835_v57 = vld [vmem:[%s12411_s5 + $0x4d8] sm:$0xf0]  ;;  %v8501_v53 = vld [vmem:[%s12411_s5 + $0x4c4] sm:$0xf] }
 0xd75   : > { %5317 = vmatpush.bf16.msrb.mxu0 %v7622_v10  ;;  %v334_v10 = vld [vmem:[%s12413_s7 + $0x48] sm:$0xff]  ;;  %v7899_v52 = vld [vmem:[%s12411_s5 + $0x558] sm:$0xf0] }
 0xd76   : > { %v4121_v37 = vperm.slane %v334_v10, 4  ;;  %v8535_v10 = vld [vmem:[%s12411_s5 + $0x5d4] sm:$0xf] }
 0xd77   : > { %5327 = vmatpush.bf16.msrb.mxu2 %v7710_v40  ;;  %5301 = vmatpush.bf16.msra.mxu3 %v7962_v0  ;;  %v7667_v40 = vld [vmem:[%s12411_s5 + $0x388] sm:$0xf0] }
 0xd78   : > { %5292 = vmatpush.bf16.msra.mxu1 %v7866_v12  ;;  %v7670_v49 = vor.u32 %v8461_v48, %v7667_v40  ;;  %v8523_v48 = vld [vmem:[%s12411_s5 + $0x574] sm:$0xf] }
 0xd79   : > { %5318 = vmatpush.bf16.msrb.mxu0 %v7614_v41 }
 0xd7b   : > { %5328 = vmatpush.bf16.msrb.mxu2 %v7702_v6  ;;  %5302 = vmatpush.bf16.msra.mxu3 %v7954_v13 }
 0xd7c   : > { %5293 = vmatpush.bf16.msra.mxu1 %v7858_v1 }
 0xd7d   : > { %5319 = vmatpush.bf16.msrb.mxu0 %v7606_v59  ;;  %v7915_v59 = vld [vmem:[%s12411_s5 + $0x578] sm:$0xf0] }
 0xd7f   : > { %5329 = vmatpush.bf16.msrb.mxu2 %v7694_v30  ;;  %5303 = vmatpush.bf16.msra.mxu3 %v7946_v38  ;;  %v7854_v30 = vor.u32 %v8507_v21, %v7851_v24  ;;  %v333_v38 = vld [vmem:[%s12413_s7 + $0x40] sm:$0xff] }
 0xd80   : > { %v4120_v15 = vperm.slane %v333_v38, 4  ;;  %v8481_v24 = vld [vmem:[%s12411_s5 + $0x424] sm:$0xf]  ;;  %v8519_v38 = vld [vmem:[%s12411_s5 + $0x554] sm:$0xf] }
 0xd83   : > { %5330 = vmatpush.bf16.msrb.mxu2 %v7686_v62  ;;  %5304 = vmatpush.bf16.msra.mxu3 %v7938_v26  ;;  %v7771_v26 = vld [vmem:[%s12411_s5 + $0x458] sm:$0xf0] }
 0xd84   : > { %v7774_v41 = vor.u32 %v8487_v44, %v7771_v26  ;;  %v7739_v44 = vld [vmem:[%s12411_s5 + $0x418] sm:$0xf0] }
 0xd87   : > { %5331 = vmatpush.bf16.msrb.mxu2 %v7678_v46  ;;  %5305 = vmatpush.bf16.msra.mxu3 %v7930_v54  ;;  %v7838_v46 = vor.u32 %v8503_v55, %v7835_v57  ;;  %v7827_v54 = vld [vmem:[%s12411_s5 + $0x4c8] sm:$0xf0]  ;;  %v8495_v55 = vld [vmem:[%s12411_s5 + $0x494] sm:$0xf]  ;;  %v7803_v57 = vld [vmem:[%s12411_s5 + $0x498] sm:$0xf0] }
 0xd88   : > { %v7830_v1 = vor.u32 %v8501_v53, %v7827_v54  ;;  %v7806_v54 = vor.u32 %v8495_v55, %v7803_v57 }
 0xd8b   : > { %5332 = vmatpush.bf16.msrb.mxu2 %v7670_v49  ;;  %5306 = vmatpush.bf16.msra.mxu3 %v7922_v2  ;;  %v8483_v2 = vld [vmem:[%s12411_s5 + $0x434] sm:$0xf] }
 0xdaa   : > { %v4509_v0 = vpop.f32.mrf.mxu1 }
 0xdab   : > { %v4535_v3 = vpop.f32.mrf.mxu0 }
 0xdb0   : > { %v4496_v6 = vpop.f32.mrf.mxu3 }
 0xdb1   : > { %v4497_v7 = vadd.f32 %v4496_v6, %v4118_v5  ;;  %v4522_v34 = vpop.f32.mrf.mxu2  ;;  %v8499_v6 = vld [vmem:[%s12411_s5 + $0x4b4] sm:$0xf] }
 0xdb2   : > { %v4523_v9 = vadd.f32 %v4522_v34, %v4119_v33  ;;  %v4511_v8 = vpop.f32.mrf.mxu1  ;;  %v7918_v33 = vor.u32 %v8523_v48, %v7915_v59  ;;  %v8493_v59 = vld [vmem:[%s12411_s5 + $0x484] sm:$0xf] }
 0xdb3   : > { %v4510_v11 = vadd.f32 %v4509_v0, %v4497_v7  ;;  %v4537_v13 = vpop.f32.mrf.mxu0  ;;  %v7819_v7 = vld [vmem:[%s12411_s5 + $0x4b8] sm:$0xf0]  ;;  %v8521_v8 = vld [vmem:[%s12411_s5 + $0x564] sm:$0xf] }
 0xdb4   : > { %v4536_v18 = vadd.f32 %v4535_v3, %v4523_v9  ;;  %v7755_v3 = vld [vmem:[%s12411_s5 + $0x438] sm:$0xf0]  ;;  %v7982_v9 = vor.u32 %v8539_v60, %v7979_v61  ;;  %v7822_v21 = vor.u32 %v8499_v6, %v7819_v7 }
 0xdb5   : > { %v4643_v19 = vmax.f32 %v4510_v11, 0.0  ;;  %v7907_v11 = vld [vmem:[%s12411_s5 + $0x568] sm:$0xf0] }
 0xdb6   : > { %v4644_v20 = vmax.f32 %v4536_v18, 0.0  ;;  %v7758_v18 = vor.u32 %v8483_v2, %v7755_v3  ;;  %v8531_v3 = vld [vmem:[%s12411_s5 + $0x5b4] sm:$0xf] }
 0xdb7   : > { %v12140_v27 = vpack.c.bf16 %v4643_v19, %v4643_v19  ;;  %v7747_v19 = vld [vmem:[%s12411_s5 + $0x428] sm:$0xf0] }
 0xdb8   : > { %v12148_v35 = vpack.c.bf16 %v4644_v20, %v4644_v20  ;;  %v4498_v39 = vpop.f32.mrf.mxu3 }
 0xdb9   : > { %v4524_v36 = vpop.f32.mrf.mxu2  ;;  %5242 = vmatmul.bf16.vlgmr.msrb.gmra.mxu1 %v12140_v27  ;;  %v7974_v39 = vor.u32 %v8537_v16, %v7971_v17  ;;  %v8513_v17 = vld [vmem:[%s12411_s5 + $0x524] sm:$0xf] }
 0xdba   : > { %5255 = vmatmul.bf16.vlgmr.msrb.gmra.mxu3 %v12148_v35  ;;  %v4548_v62 = vpop.f32.mrf.mxu1  ;;  %5338 = vmatpush.bf16.msrb.mxu1 %v7790_v22  ;;  %v7910_v22 = vor.u32 %v8521_v8, %v7907_v11  ;;  %v335_v36 = vld [vmem:[%s12413_s7 + $0x50] sm:$0xff] }
 0xdbb   : > { %v4574_v43 = vpop.f32.mrf.mxu0  ;;  %5351 = vmatpush.bf16.msrb.mxu3 %v7854_v30  ;;  %v4549_v45 = vadd.f32 %v4548_v62, %v4120_v15  ;;  %v8497_v30 = vld [vmem:[%s12411_s5 + $0x4a4] sm:$0xf]  ;;  %v7963_v62 = vld [vmem:[%s12411_s5 + $0x5d8] sm:$0xf0]  ;;  %v4122_v47 = vperm.slane %v335_v36, 4 }
 0xdbc   : > { %v4575_v51 = vadd.f32 %v4574_v43, %v4121_v37  ;;  %v336_v15 = vld [vmem:[%s12413_s7 + $0x58] sm:$0xff]  ;;  %v7814_v43 = vor.u32 %v8497_v30, %v7811_v31  ;;  %v7902_v37 = vor.u32 %v8519_v38, %v7899_v52  ;;  %v8511_v52 = vld [vmem:[%s12411_s5 + $0x514] sm:$0xf] }
 0xdbd   : > { %v4123_v50 = vperm.slane %v336_v15, 4  ;;  %v8525_v15 = vld [vmem:[%s12411_s5 + $0x584] sm:$0xf] }
 0xdbe   : > { %5339 = vmatpush.bf16.msrb.mxu1 %v7782_v28  ;;  %v7750_v28 = vor.u32 %v8481_v24, %v7747_v19  ;;  %v8529_v19 = vld [vmem:[%s12411_s5 + $0x5a4] sm:$0xf] }
 0xdbf   : > { %5352 = vmatpush.bf16.msrb.mxu3 %v7846_v23  ;;  %v8479_v23 = vld [vmem:[%s12411_s5 + $0x414] sm:$0xf] }
 0xdc0   : > { %v4561_v12 = vpop.f32.mrf.mxu3  ;;  %v7742_v53 = vor.u32 %v8479_v23, %v7739_v44 }
 0xdc1   : > { %v4562_v14 = vadd.f32 %v4561_v12, %v4549_v45  ;;  %v4587_v58 = vpop.f32.mrf.mxu2  ;;  %v8517_v45 = vld [vmem:[%s12411_s5 + $0x544] sm:$0xf]  ;;  %v7955_v12 = vld [vmem:[%s12411_s5 + $0x5c8] sm:$0xf0] }
 0xdc2   : > { %v4588_v40 = vadd.f32 %v4587_v58, %v4575_v51  ;;  %v4550_v49 = vpop.f32.mrf.mxu1  ;;  %5340 = vmatpush.bf16.msrb.mxu1 %v7774_v41  ;;  %v7966_v41 = vor.u32 %v8535_v10, %v7963_v62  ;;  %v8533_v51 = vld [vmem:[%s12411_s5 + $0x5c4] sm:$0xf]  ;;  %v7731_v58 = vld [vmem:[%s12411_s5 + $0x408] sm:$0xf0] }
 0xdc3   : > { %v4645_v63 = vmax.f32 %v4562_v14, 0.0  ;;  %v4576_v0 = vpop.f32.mrf.mxu0  ;;  %5353 = vmatpush.bf16.msrb.mxu3 %v7838_v46  ;;  %v7891_v46 = vld [vmem:[%s12411_s5 + $0x548] sm:$0xf0]  ;;  %v8477_v14 = vld [vmem:[%s12411_s5 + $0x404] sm:$0xf]  ;;  %v7958_v61 = vor.u32 %v8533_v51, %v7955_v12 }
 0xdc4   : > { %v4646_v5 = vmax.f32 %v4588_v40, 0.0  ;;  %v7894_v48 = vor.u32 %v8517_v45, %v7891_v46  ;;  %v7795_v40 = vld [vmem:[%s12411_s5 + $0x488] sm:$0xf0]  ;;  %v8509_v62 = vld [vmem:[%s12411_s5 + $0x504] sm:$0xf] }
 0xdc5   : > { %v12212_v34 = vpack.c.bf16 %v4645_v63, %v4645_v63  ;;  %v7883_v63 = vld [vmem:[%s12411_s5 + $0x538] sm:$0xf0]  ;;  %v7798_v6 = vor.u32 %v8493_v59, %v7795_v40 }
 0xdc6   : > { %v12220_v13 = vpack.c.bf16 %v4646_v5, %v4646_v5  ;;  %5341 = vmatpush.bf16.msrb.mxu1 %v7766_v29  ;;  %v8515_v29 = vld [vmem:[%s12411_s5 + $0x534] sm:$0xf]  ;;  %v7947_v5 = vld [vmem:[%s12411_s5 + $0x5b8] sm:$0xf0] }
 0xdc7   : > { %5268 = vmatmul.bf16.vlgmr.msra.gmra.mxu0 %v12212_v34  ;;  %5354 = vmatpush.bf16.msrb.mxu3 %v7830_v1  ;;  %v7886_v11 = vor.u32 %v8515_v29, %v7883_v63  ;;  %v7950_v16 = vor.u32 %v8531_v3, %v7947_v5 }
 0xdc8   : > { %5281 = vmatmul.bf16.vlgmr.msra.gmra.mxu2 %v12220_v13  ;;  %v4563_v20 = vpop.f32.mrf.mxu3  ;;  %5364 = vmatpush.bf16.msra.mxu0 %v7918_v33  ;;  %v7734_v33 = vor.u32 %v8477_v14, %v7731_v58 }
 0xdc9   : > { %v4589_v32 = vpop.f32.mrf.mxu2  ;;  %5377 = vmatpush.bf16.msra.mxu2 %v7982_v9  ;;  %v7939_v20 = vld [vmem:[%s12411_s5 + $0x5a8] sm:$0xf0] }
 0xdca   : > { %v4613_v4 = vpop.f32.mrf.mxu1  ;;  %5342 = vmatpush.bf16.msrb.mxu1 %v7758_v18  ;;  %v7875_v18 = vld [vmem:[%s12411_s5 + $0x528] sm:$0xf0]  ;;  %v7942_v38 = vor.u32 %v8529_v19, %v7939_v20 }
 0xdcb   : > { %5355 = vmatpush.bf16.msrb.mxu3 %v7822_v21  ;;  %v7878_v31 = vor.u32 %v8513_v17, %v7875_v18 }
 0xdcc   : > { %5365 = vmatpush.bf16.msra.mxu0 %v7910_v22 }
 0xdcd   : > { %v4639_v26 = vpop.f32.mrf.mxu0  ;;  %5378 = vmatpush.bf16.msra.mxu2 %v7974_v39 }
 0xdce   : > { %5343 = vmatpush.bf16.msrb.mxu1 %v7750_v28  ;;  %v7859_v28 = vld [vmem:[%s12411_s5 + $0x508] sm:$0xf0] }
 0xdcf   : > { %5356 = vmatpush.bf16.msrb.mxu3 %v7814_v43  ;;  %v7923_v43 = vld [vmem:[%s12411_s5 + $0x588] sm:$0xf0]  ;;  %v7862_v23 = vor.u32 %v8509_v62, %v7859_v28  ;;  %v8552_v62 = vld [vmem:[#allocation2 + $0x58] sm:$0xff]  ;;  %v8543_v28 = vld [vmem:[#allocation2 + $0x10] sm:$0xff] }
 0xdd0   : > { %5366 = vmatpush.bf16.msra.mxu0 %v7902_v37  ;;  %v7926_v44 = vor.u32 %v8525_v15, %v7923_v43  ;;  %v8551_v15 = vld [vmem:[#allocation2 + $0x50] sm:$0xff]  ;;  %v8542_v43 = vld [vmem:[#allocation2 + $0x8] sm:$0xff] }
 0xdd1   : > { %v4600_v49 = vpop.f32.mrf.mxu3  ;;  %v4626_v60 = vpop.f32.mrf.mxu2  ;;  %5379 = vmatpush.bf16.msra.mxu2 %v7966_v41 }
 0xdd2   : > { %v4601_v0 = vadd.f32 %v4600_v49, %v4122_v47  ;;  %v4627_v1 = vadd.f32 %v4626_v60, %v4123_v50  ;;  %v4615_v2 = vpop.f32.mrf.mxu1  ;;  %5344 = vmatpush.bf16.msrb.mxu1 %v7742_v53 }
 0xdd3   : > { %5357 = vmatpush.bf16.msrb.mxu3 %v7806_v54 }
 0xdd4   : > { %v4614_v7 = vadd.f32 %v4613_v4, %v4601_v0  ;;  %v4640_v9 = vadd.f32 %v4639_v26, %v4627_v1  ;;  %5367 = vmatpush.bf16.msra.mxu0 %v7894_v48  ;;  %v7867_v4 = vld [vmem:[%s12411_s5 + $0x518] sm:$0xf0] }
 0xdd5   : > { %v4641_v8 = vpop.f32.mrf.mxu0  ;;  %5380 = vmatpush.bf16.msra.mxu2 %v7958_v61  ;;  %v7870_v36 = vor.u32 %v8511_v52, %v7867_v4  ;;  %v12357_v48 = vld [vmem:[%s12413_s7 + $0x38] sm:$0xff] }
 0xdd6   : > { %v4647_v21 = vmax.f32 %v4614_v7, 0.0  ;;  %v4648_v24 = vmax.f32 %v4640_v9, 0.0  ;;  %5345 = vmatpush.bf16.msrb.mxu1 %v7734_v33  ;;  %v4753_v59 = vperm.slane %v12357_v48, 5 }
 0xdd7   : > { %5320 = vmatmul.bf16.vlgmr.msrb.gmra.mxu0 %v12140_v27  ;;  %5358 = vmatpush.bf16.msrb.mxu3 %v7798_v6  ;;  %v8527_v27 = vld [vmem:[%s12411_s5 + $0x594] sm:$0xf] }
 0xdd8   : > { %v4653_v22 = vpack.c.bf16 %v4647_v21, %v4647_v21  ;;  %v4654_v30 = vpack.c.bf16 %v4648_v24, %v4648_v24  ;;  %5333 = vmatmul.bf16.vlgmr.msrb.gmra.mxu2 %v12148_v35  ;;  %5368 = vmatpush.bf16.msra.mxu0 %v7886_v11  ;;  %v7931_v35 = vld [vmem:[%s12411_s5 + $0x598] sm:$0xf0] }
 0xdd9   : > { %v4602_v32 = vpop.f32.mrf.mxu3  ;;  %v4628_v39 = vpop.f32.mrf.mxu2  ;;  %5381 = vmatpush.bf16.msra.mxu2 %v7950_v16  ;;  %v7934_v10 = vor.u32 %v8527_v27, %v7931_v35 }
 0xdda   : > { %5294 = vmatmul.bf16.vlgmr.msra.gmra.mxu1 %v4653_v22  ;;  %5307 = vmatmul.bf16.vlgmr.msra.gmra.mxu3 %v4654_v30 }
 0xddb   : > { %5546 = vmatpush.bf16.msra.mxu3 %v8552_v62 }
 0xddc   : > { %5369 = vmatpush.bf16.msra.mxu0 %v7878_v31 }
 0xddd   : > { %5382 = vmatpush.bf16.msra.mxu2 %v7942_v38 }
 0xddf   : > { %5547 = vmatpush.bf16.msra.mxu3 %v8551_v15 }
 0xde0   : > { %5370 = vmatpush.bf16.msra.mxu0 %v7870_v36  ;;  %v8545_v36 = vld [vmem:[#allocation2 + $0x20] sm:$0xff] }
 0xde1   : > { %5383 = vmatpush.bf16.msra.mxu2 %v7934_v10  ;;  %v8544_v10 = vld [vmem:[#allocation2 + $0x18] sm:$0xff] }
 0xde4   : > { %5371 = vmatpush.bf16.msra.mxu0 %v7862_v23  ;;  %v8550_v23 = vld [vmem:[#allocation2 + $0x48] sm:$0xff] }
 0xde5   : > { %5384 = vmatpush.bf16.msra.mxu2 %v7926_v44  ;;  %5548 = vmatpush.bf16.msra.mxu3 %v8550_v23  ;;  %v8541_v44 = vld [vmem:[#allocation2] sm:$0xff] }
 0xde7   : > { %5372 = vmatmul.bf16.vlgmr.msra.gmra.mxu0 %v4653_v22 }
 0xde8   : > { %5385 = vmatmul.bf16.vlgmr.msra.gmra.mxu2 %v4654_v30  ;;  %v8548_v30 = vld [vmem:[#allocation2 + $0x38] sm:$0xff] }
 0xde9   : > { %5529 = vmatpush.bf16.msra.mxu1 %v8548_v30 }
 0xdea   : > { %5346 = vmatmul.bf16.vlgmr.msrb.gmra.mxu1 %v12212_v34  ;;  %5359 = vmatmul.bf16.vlgmr.msrb.gmra.mxu3 %v12220_v13  ;;  %v12351_v34 = vld [vmem:[%s12413_s7 + $0x30] sm:$0xff] }
 0xdeb   : > { %v4752_v13 = vperm.slane %v12351_v34, 5 }
 0xe36   : > { %v5243_v26 = vpop.f32.mrf.mxu1 }
 0xe37   : > { %v5244_v60 = vadd.f32 %v5243_v26, %v4752_v13  ;;  %v8549_v26 = vld [vmem:[#allocation2 + $0x40] sm:$0xff] }
 0xe38   : > { %5549 = vmatpush.bf16.msra.mxu3 %v8549_v26 }
 0xe3d   : > { %v5256_v37 = vpop.f32.mrf.mxu3 }
 0xe3e   : > { %v5245_v55 = vpop.f32.mrf.mxu1  ;;  %v5257_v63 = vadd.f32 %v5256_v37, %v5244_v60 }
 0xe44   : > { %v5269_v57 = vpop.f32.mrf.mxu0 }
 0xe45   : > { %v5258_v41 = vpop.f32.mrf.mxu3  ;;  %v5270_v1 = vadd.f32 %v5269_v57, %v5257_v63 }
 0xe4b   : > { %v5282_v45 = vpop.f32.mrf.mxu2 }
 0xe4c   : > { %v5271_v46 = vpop.f32.mrf.mxu0  ;;  %v5283_v33 = vadd.f32 %v5282_v45, %v5270_v1 }
 0xe53   : > { %v5284_v47 = vpop.f32.mrf.mxu2 }
 0xe54   : > { %v5321_v50 = vpop.f32.mrf.mxu0 }
 0xe55   : > { %v5322_v29 = vadd.f32 %v5321_v50, %v4753_v59 }
 0xe57   : > { %v5295_v51 = vpop.f32.mrf.mxu1 }
 0xe58   : > { %v5296_v9 = vadd.f32 %v5295_v51, %v5283_v33 }
 0xe5b   : > { %v5334_v12 = vpop.f32.mrf.mxu2 }
 0xe5c   : > { %v5323_v53 = vpop.f32.mrf.mxu0  ;;  %v5335_v0 = vadd.f32 %v5334_v12, %v5322_v29  ;;  %v5419_v12 = vperm.slane %v12351_v34, 6 }
 0xe5d   : > { %v5308_v54 = vpop.f32.mrf.mxu3  ;;  %v5420_v53 = vperm.slane %v12357_v48, 6 }
 0xe5e   : > { %v5309_v16 = vadd.f32 %v5308_v54, %v5296_v9 }
 0xe5f   : > { %v5297_v14 = vpop.f32.mrf.mxu1 }
 0xe60   : > { %v5390_v24 = vadd.f32 %v5309_v16, %v11254_v56  ;;  %v8546_v56 = vld [vmem:[#allocation2 + $0x28] sm:$0xff] }
 0xe63   : > { %v5336_v58 = vpop.f32.mrf.mxu2 }
 0xe64   : > { %v5373_v40 = vpop.f32.mrf.mxu0  ;;  %v5423_v58 = vperm.slane %v12351_v34, 7 }
 0xe65   : > { %v5310_v49 = vpop.f32.mrf.mxu3 }
 0xe67   : > { %v5347_v61 = vpop.f32.mrf.mxu1 }
 0xe68   : > { %v5348_v3 = vadd.f32 %v5347_v61, %v5335_v0 }
 0xe6b   : > { %v5386_v2 = vpop.f32.mrf.mxu2 }
 0xe6c   : > { %v5375_v5 = vpop.f32.mrf.mxu0 }
 0xe6d   : > { %v5360_v6 = vpop.f32.mrf.mxu3 }
 0xe6e   : > { %v5361_v7 = vadd.f32 %v5360_v6, %v5348_v3 }
 0xe6f   : > { %v5349_v8 = vpop.f32.mrf.mxu1 }
 0xe70   : > { %v5374_v11 = vadd.f32 %v5373_v40, %v5361_v7 }
 0xe72   : > { %v5387_v17 = vadd.f32 %v5386_v2, %v5374_v11 }
 0xe73   : > { %v5388_v18 = vpop.f32.mrf.mxu2 }
 0xe74   : > { %v5391_v21 = vadd.f32 %v5387_v17, %v11251_v42  ;;  %v8547_v42 = vld [vmem:[#allocation2 + $0x30] sm:$0xff] }
 0xe75   : > { %v5362_v19 = vpop.f32.mrf.mxu3  ;;  %5530 = vmatpush.bf16.msra.mxu1 %v8547_v42 }
 0xe76   : > { %v5392_v20 = vsel %vm338_vm0, %v5391_v21, 0.0 }
 0xe77   : > { %v5393_v22 = vadd.f32 %v5392_v20, %v5390_v24 }
 0xe79   : > { %5394 = vadd.xlane.f32.xlu2 %v5393_v22  ;;  %5531 = vmatpush.bf16.msra.mxu1 %v8546_v56 }
 0xe7d   : > { %5532 = vmatpush.bf16.msra.mxu1 %v8545_v36 }
 0xe81   : > { %5533 = vmatpush.bf16.msra.mxu1 %v8544_v10 }
 0xe85   : > { %5534 = vmatpush.bf16.msra.mxu1 %v8543_v28 }
 0xe89   : > { %5535 = vmatpush.bf16.msra.mxu1 %v8542_v43 }
 0xe8d   : > { %5536 = vmatpush.bf16.msra.mxu1 %v8541_v44 }
 0xeec   : > { %v5395_v31 = vpop.xlane.xlu2 %5394 }
 0xeed   : > { %v5396_v32 = vmul.f32 %v5395_v31, %v8929_v25 }
 0xeef   : > { %v5397_v39 = vsub.f32 %v5390_v24, %v5396_v32  ;;  %v5398_v38 = vsub.f32 %v5391_v21, %v5396_v32 }
 0xef1   : > { %v5399_v52 = vmul.f32 %v5397_v39, %v5397_v39  ;;  %v5400_v4 = vmul.f32 %v5398_v38, %v5398_v38 }
 0xef3   : > { %v5401_v27 = vsel %vm338_vm0, %v5400_v4, 0.0 }
 0xef4   : > { %v5402_v35 = vadd.f32 %v5401_v27, %v5399_v52 }
 0xef6   : > { %5403 = vadd.xlane.f32.xlu1 %v5402_v35 }
 0xf69   : > { %v5404_v37 = vpop.xlane.xlu1 %5403 }
 0xf6a   : > { %v5405_v55 = vmul.f32 %v5404_v37, %v8929_v25  ;;  %v5424_v25 = vperm.slane %v12357_v48, 7  ;;  %v8609_v48 = vld [vmem:[%s12413_s7 + $0x60] ss:$0 sm:$0xff] }
 0xf6c   : > { %v5406_v57 = vadd.f32 1e-05, %v5405_v55 }
 0xf6e   : > { %8668 = vrsqrt.f32 %v5406_v57  ;;  %vm5413_vm4 = vweird.f32 %v5406_v57 }
 0xf74   : > { %v8669_v41 = vpop.eup %8668 }
 0xf75   : > { %v5408_v45 = vmul.f32 %v8669_v41, %v5406_v57  ;;  %vm5414_vm3 = vweird.f32 %v8669_v41 }
 0xf76   : > { %vm5415_vm5 = vmor %vm5413_vm4, %vm5414_vm3 }
 0xf77   : > { %v5409_v46 = vmul.f32 %v8669_v41, %v5408_v45 }
 0xf79   : > { %v5410_v47 = vmul.f32 0.5, %v5409_v46 }
 0xf7b   : > { %v5411_v50 = vsub.f32 1.5, %v5410_v47 }
 0xf7d   : > { %v5412_v51 = vmul.f32 %v8669_v41, %v5411_v50 }
 0xf7f   : > { %v5416_v54 = vsel %vm5415_vm5, %v8669_v41, %v5412_v51 }
 0xf80   : > { %v5417_v14 = vmul.f32 %v5416_v54, %v5397_v39  ;;  %v5418_v13 = vmul.f32 %v5416_v54, %v5398_v38 }
 0xf82   : > { %v5421_v59 = vmul.f32 %v5419_v12, %v5417_v14  ;;  %v5422_v40 = vmul.f32 %v5420_v53, %v5418_v13 }
 0xf84   : > { %v5426_v49 = vadd.f32 %v5424_v25, %v5422_v40  ;;  %v5425_v60 = vadd.f32 %v5423_v58, %v5421_v59 }
 0xf86   : > { %v5428_v61 = vpack.c.bf16 %v5426_v49, %v5426_v49  ;;  %v5427_v29 = vpack.c.bf16 %v5425_v60, %v5425_v60 }
 0xf88   : > { %5537 = vmatmul.bf16.vlgmr.msra.gmra.mxu1 %v5427_v29  ;;  %8031 = vmatmul.msk.bf16.vlgmr.msra.gmra.mxu3 %vm338_vm0, %v5428_v61 }
0x1005   : > { %v5538_v63 = vpop.f32.mrf.mxu1 }
0x1006   : > { %v5539_v34 = vadd.f32 %v8609_v48, %v5538_v63 }
0x100b   : > { %v5551_v0 = vpop.f32.mrf.mxu3 }
0x100c   : > { %v5552_v1 = vadd.f32 %v5551_v0, %v5539_v34 }
0x100d   : > { %v5540_v2 = vpop.f32.mrf.mxu1 }
0x100e   : > { %v5555_v3 = vpack.c.bf16 %v5552_v1, %v5552_v1 }
0x1010   : > { %5556 = vst [vmem:[%s315_s20] sm:$0xf] %v5555_v3 }
0x1011   : > { %8738 = shalt.err (!%p8735_p8)
}
0x1012   : > { %8557 = dma.vmem_to_hbm [thread:$0]  (%p8869_p5), %s5571_s12, 64, %s5573_s22, %s5558_s9  }
0x1013   : > { %v5553_v5 = vpop.f32.mrf.mxu3 }
0x1014 PF: > { %p8569_p9 = scmp.ge.s32.totalorder %s8777_s30, 2  ;;  %s5584_s19 = sand.u32 1, %s8765_s27  }
0x1015   : > { %s5585_s18 = scalar_lea.sflag [#allocation4], %s5584_s19 }
0x1016   : > { %p8564_p10 = pnand %p8569_p9, %p8873_p6 }
0x1018   : > { %p8565_p11 = pneg %p8564_p10 }
0x101a   : > { %8760 = dma.done.wait (%p8565_p11), %s5585_s18, 64  }
0x101b   : > { %8762 = vsyncadd (%p8565_p11), %s5585_s18, 4294967232  ;;  %p19_p12 = scmp.ge.s32.totalorder %s8856_s11, 4   ;;  %s12423_s27 = smov %s8769_s28 }
0x101c   : > { %s12424_s28 = smov %s8773_s29  ;;  %s12425_s29 = smov %s8867_s14 }
0x101d   : > { %s12426_s30 = smov %s8856_s11  ;;  %21 = sbr.rel (!%p19_p12) target bundleno = 4 (0x4), region = 96 }
0x1022   :  { %5591 = vsyncpa [#allocation3], 1 }
0x1023   :  { %5593 = vsyncpa [#allocation3 + $0x1], 1 }
0x1024   :  { %5594 = vsyncpa [#allocation4], 1 }
0x1025   :  { %5596 = vsyncpa [#allocation4 + $0x1], 1 }

</bundles_post_ra>
